<compile_context>
chip_gen: v5e
topology: v5e:2x2
jax: 0.10.0
libtpu: 0.0.40
codegen_flags: <defaults>
</compile_context>

<pallas_src>
import functools
import math

import jax
import jax.numpy as jnp
from jax.experimental import pallas as pl
from jax.experimental.pallas import tpu as pltpu


# Scoped-VMEM budget: above the 16/32 MiB defaults, below v7x's 64 MiB physical VMEM.
_VMEM_LIMIT_BYTES = 48 * 1024 * 1024


def _largest_divisor_leq(n, cap):
    cap = int(max(1, min(n, cap)))
    for d in range(cap, 0, -1):
        if n % d == 0:
            return d
    return 1


# ----------------------------- Pallas kernels ------------------------------------


def _linear_kernel(x_ref, w_ref, b_ref, o_ref):
    # o = x @ w_t + b     x:(tm,K) f32, w_t:(K,N) bf16, b:(1,N) f32
    xb = x_ref[...].astype(jnp.bfloat16)
    o_ref[...] = (
        jnp.dot(xb, w_ref[...], preferred_element_type=jnp.float32) + b_ref[...]
    )


def linear(x, w_t, b_row):
    """x:(M,K) @ w_t:(K,N) + b:(1,N) -> (M,N).  Grid over row tiles ('parallel')."""
    M, K = x.shape
    N = w_t.shape[1]
    tm = _largest_divisor_leq(M, 512)
    return pl.pallas_call(
        _linear_kernel,
        out_shape=jax.ShapeDtypeStruct((M, N), jnp.float32),
        grid=(M // tm,),
        in_specs=[
            pl.BlockSpec((tm, K), lambda i: (i, 0)),
            pl.BlockSpec((K, N), lambda i: (0, 0)),
            pl.BlockSpec((1, N), lambda i: (0, 0)),
        ],
        out_specs=pl.BlockSpec((tm, N), lambda i: (i, 0)),
        compiler_params=pltpu.CompilerParams(
            dimension_semantics=("parallel",),
            vmem_limit_bytes=_VMEM_LIMIT_BYTES),
    )(x, w_t, b_row)


def _attn_block_kernel(xq_ref, xkv_ref,
                       wq_ref, wk_ref, wv_ref, wo_ref,
                       bq_ref, bk_ref, bv_ref, bo_ref,
                       g_ref, bn_ref,
                       o_ref, attn_ref,
                       *, num_heads, tn, sq, sk, scale, eps, approx):
    """Fused attention sub-layer over a block of `tn` attention-batch groups:
       LayerNorm(xq + OutProj(MHA(xq, xkv)))  on rows laid out (group, seq)."""
    f32 = jnp.float32
    bf16 = jnp.bfloat16

    xq = xq_ref[...]                           # (tn*sq, E) f32 (residual path)
    xq_b = xq.astype(bf16)
    xkv_b = xkv_ref[...].astype(bf16)          # (tn*sk, E)

    # Flattened QKV projections on the MXU (bf16 operands, f32 accumulate).
    # Softmax scale folded into q (scales a (R,E) tensor, never a (S,S) one).
    q = (jnp.dot(xq_b, wq_ref[...], preferred_element_type=f32) + bq_ref[...]) * scale
    k = jnp.dot(xkv_b, wk_ref[...], preferred_element_type=f32) + bk_ref[...]
    v = jnp.dot(xkv_b, wv_ref[...], preferred_element_type=f32) + bv_ref[...]

    E = q.shape[-1]
    dh = E // num_heads

    # Small per-(group, head) attention core, statically unrolled (tn and heads are
    # bounded at wrapper level).  Head outputs are written slice-by-slice into the
    # VMEM scratch `attn_ref` instead of a lane-axis concatenate.
    for g in range(tn):
        r0, r1 = g * sq, (g + 1) * sq
        c0, c1 = g * sk, (g + 1) * sk
        for h in range(num_heads):
            lo, hi = h * dh, (h + 1) * dh
            qh = q[r0:r1, lo:hi].astype(bf16)          # (sq, dh)
            kh = k[c0:c1, lo:hi].astype(bf16)          # (sk, dh)
            vh = v[c0:c1, lo:hi].astype(bf16)          # (sk, dh)
            s = jax.lax.dot_general(                   # (sq, sk) = qh @ kh^T
                qh, kh, (((1,), (1,)), ((), ())),
                preferred_element_type=f32)
            m = jnp.max(s, axis=-1, keepdims=True)
            p = jnp.exp(s - m)
            l = jnp.sum(p, axis=-1, keepdims=True)
            if approx:
                p = p * pl.reciprocal(l, approx=True)  # EUP slot
            else:
                p = p / l                              # exact (validation mode)
            attn_ref[r0:r1, lo:hi] = jnp.dot(
                p.astype(bf16), vh, preferred_element_type=f32)

    # Single flattened output projection + residual + LayerNorm (f32 epilogue).
    attn = attn_ref[...].astype(bf16)                  # (tn*sq, E)
    proj = jnp.dot(attn, wo_ref[...], preferred_element_type=f32) + bo_ref[...]
    y = xq + proj                                      # dropout = identity; residual
    mean = jnp.mean(y, axis=-1, keepdims=True)
    c = y - mean
    var = jnp.mean(c * c, axis=-1, keepdims=True)
    o_ref[...] = c * jax.lax.rsqrt(var + eps) * g_ref[...] + bn_ref[...]


def _pick_group_tile(n_groups, sq, num_heads):
    # Target a few hundred rows per grid step (amortize ~0.35us step overhead and
    # feed the MXU) while bounding the unrolled (group, head) inner loop.
    row_cap = max(1, 512 // max(sq, 1))
    unroll_cap = max(1, 32 // max(num_heads, 1))
    tn = _largest_divisor_leq(n_groups, min(row_cap, unroll_cap))
    # v7x has 2 TensorCores: prefer >=2 grid steps when that still keeps >=128 rows.
    if tn == n_groups and n_groups > 1:
        half = _largest_divisor_leq(n_groups, n_groups // 2)
        if half * sq >= 128:
            tn = half
    return tn


def attn_block(xq2, xkv2, ap, gamma, beta, *, num_heads, n_groups, sq, sk,
               eps=1e-5, approx_reciprocal=True):
    """Fused attention sub-layer.
    xq2:(n_groups*sq, E), xkv2:(n_groups*sk, E); rows ordered (group, seq)."""
    E = xq2.shape[1]
    scale = 1.0 / math.sqrt(E // num_heads)
    tn = _pick_group_tile(n_groups, sq, num_heads)
    rq, rk = tn * sq, tn * sk
    wmap = lambda i: (0, 0)
    kernel = functools.partial(
        _attn_block_kernel, num_heads=num_heads, tn=tn, sq=sq, sk=sk,
        scale=scale, eps=eps, approx=approx_reciprocal)
    return pl.pallas_call(
        kernel,
        out_shape=jax.ShapeDtypeStruct((n_groups * sq, E), jnp.float32),
        grid=(n_groups // tn,),
        in_specs=[
            pl.BlockSpec((rq, E), lambda i: (i, 0)),   # xq rows for this group block
            pl.BlockSpec((rk, E), lambda i: (i, 0)),   # xkv rows
            pl.BlockSpec((E, E), wmap),                # wq_t (bf16, resident)
            pl.BlockSpec((E, E), wmap),                # wk_t
            pl.BlockSpec((E, E), wmap),                # wv_t
            pl.BlockSpec((E, E), wmap),                # wo_t
            pl.BlockSpec((1, E), wmap),                # bq
            pl.BlockSpec((1, E), wmap),                # bk
            pl.BlockSpec((1, E), wmap),                # bv
            pl.BlockSpec((1, E), wmap),                # bo
            pl.BlockSpec((1, E), wmap),                # gamma
            pl.BlockSpec((1, E), wmap),                # beta
        ],
        out_specs=pl.BlockSpec((rq, E), lambda i: (i, 0)),
        scratch_shapes=[pltpu.VMEM((rq, E), jnp.float32)],   # per-head write target
        compiler_params=pltpu.CompilerParams(
            dimension_semantics=("parallel",),
            vmem_limit_bytes=_VMEM_LIMIT_BYTES),
    )(xq2, xkv2, ap["wq_t"], ap["wk_t"], ap["wv_t"], ap["wo_t"],
      ap["bq"], ap["bk"], ap["bv"], ap["bo"], gamma, beta)


def _ffn_block_kernel(x_ref, w1_ref, b1_ref, w2_ref, b2_ref, g_ref, bn_ref,
                      o_ref, acc_ref, *, eps):
    """Tiled FFN: accumulate relu(x@W1+b1)@W2 over the feed-forward axis, then
    bias + residual + LayerNorm epilogue on the last reduction step."""
    fi = pl.program_id(1)
    xb = x_ref[...].astype(jnp.bfloat16)
    h = jnp.dot(xb, w1_ref[...], preferred_element_type=jnp.float32) + b1_ref[...]
    h = jnp.maximum(h, 0.0)
    partial = jnp.dot(h.astype(jnp.bfloat16), w2_ref[...],
                      preferred_element_type=jnp.float32)

    @pl.when(fi == 0)          # skip zero-init: first step writes the accumulator
    def _():
        acc_ref[...] = partial

    @pl.when(fi > 0)
    def _():
        acc_ref[...] += partial

    @pl.when(fi == pl.num_programs(1) - 1)
    def _():
        y = acc_ref[...] + b2_ref[...] + x_ref[...]    # dropout = identity; residual
        mean = jnp.mean(y, axis=-1, keepdims=True)
        c = y - mean
        var = jnp.mean(c * c, axis=-1, keepdims=True)
        o_ref[...] = c * jax.lax.rsqrt(var + eps) * g_ref[...] + bn_ref[...]


def ffn_block(x, w1_t, b1, w2_t, b2, gamma, beta, eps=1e-5):
    """Fused FFN sub-layer on flattened tokens x:(M,E).  Grid: (row tiles, Fd tiles)."""
    M, E = x.shape
    Fd = w1_t.shape[1]
    tm = _largest_divisor_leq(M, 512)       # bigger row tiles halve weight re-streaming
    tf = _largest_divisor_leq(Fd, 1024)
    kernel = functools.partial(_ffn_block_kernel, eps=eps)
    return pl.pallas_call(
        kernel,
        out_shape=jax.ShapeDtypeStruct((M, E), jnp.float32),
        grid=(M // tm, Fd // tf),
        in_specs=[
            pl.BlockSpec((tm, E), lambda i, f: (i, 0)),   # x (resident across f)
            pl.BlockSpec((E, tf), lambda i, f: (0, f)),   # w1_t (bf16, streamed)
            pl.BlockSpec((1, tf), lambda i, f: (0, f)),   # b1
            pl.BlockSpec((tf, E), lambda i, f: (f, 0)),   # w2_t (bf16, streamed)
            pl.BlockSpec((1, E), lambda i, f: (0, 0)),    # b2
            pl.BlockSpec((1, E), lambda i, f: (0, 0)),    # gamma
            pl.BlockSpec((1, E), lambda i, f: (0, 0)),    # beta
        ],
        out_specs=pl.BlockSpec((tm, E), lambda i, f: (i, 0)),
        scratch_shapes=[pltpu.VMEM((tm, E), jnp.float32)],
        compiler_params=pltpu.CompilerParams(
            dimension_semantics=("parallel", "arbitrary"),
            vmem_limit_bytes=_VMEM_LIMIT_BYTES),
    )(x, w1_t, b1, w2_t, b2, gamma, beta)


# ----------------------------- layer glue (plain JAX, layout only) ----------------


def encoder_layer(h, lp, *, num_heads, n_groups, seq):
    # post-norm TransformerEncoderLayer (PyTorch default, norm_first=False)
    h1 = attn_block(h, h, lp["self_attn"], lp["norm1_w"], lp["norm1_b"],
                    num_heads=num_heads, n_groups=n_groups, sq=seq, sk=seq)
    return ffn_block(h1, lp["lin1_w_t"], lp["lin1_b"], lp["lin2_w_t"], lp["lin2_b"],
                     lp["norm2_w"], lp["norm2_b"])


def decoder_layer(h, mem, lp, *, num_heads, n_groups, seq):
    # post-norm TransformerDecoderLayer: self-attn -> cross-attn -> FFN (no masks)
    h1 = attn_block(h, h, lp["self_attn"], lp["norm1_w"], lp["norm1_b"],
                    num_heads=num_heads, n_groups=n_groups, sq=seq, sk=seq)
    h2 = attn_block(h1, mem, lp["cross_attn"], lp["norm2_w"], lp["norm2_b"],
                    num_heads=num_heads, n_groups=n_groups, sq=seq, sk=seq)
    return ffn_block(h2, lp["lin1_w_t"], lp["lin1_b"], lp["lin2_w_t"], lp["lin2_b"],
                     lp["norm3_w"], lp["norm3_b"])


def transformer_autoencoder_forward(x, params, *, patch_size, num_heads):
    B, C, T = x.shape
    P = T // patch_size
    E = params["proj_w_t"].shape[1]

    # PatchEmbedding.  Patches are extracted directly in (patch, seq) row order so
    # the projection output is already in the transformer's internal 2-D layout —
    # this folds the old (B,P,E)->(P,B,E) transpose into the patch reshape.
    xp = x[:, :, : P * patch_size].reshape(B, C, P, patch_size)
    xp = xp.transpose(2, 0, 1, 3).reshape(P * B, C * patch_size)
    x_embed = linear(xp, params["proj_w_t"], params["proj_b"])       # (P*B, E)

    h = x_embed
    for lp in params["enc_layers"]:
        h = encoder_layer(h, lp, num_heads=num_heads, n_groups=P, seq=B)
    latent2 = h                                                      # (P*B, E)

    d = x_embed
    for lp in params["dec_layers"]:
        d = decoder_layer(d, latent2, lp, num_heads=num_heads, n_groups=P, seq=B)

    # Reconstruction head: rows back in (batch, patch) order, then the same raw
    # row-major view(B, C, -1) as the PyTorch module.
    d_bp = d.reshape(P, B, E).transpose(1, 0, 2).reshape(B * P, E)
    recon = linear(d_bp, params["recon_w_t"], params["recon_b"])     # (B*P, C*ps)
    recon = recon.reshape(B, C, -1)
    latent = latent2.reshape(P, B, E).transpose(1, 0, 2)             # (B, P, E)
    return recon, latent


# ----------------------------- deterministic parameter init ----------------------


def init_params(key, input_dim, embed_dim, patch_size, num_heads, num_layers,
                dim_feedforward=2048):
    keys = iter(jax.random.split(key, 256))
    E, Fd = embed_dim, dim_feedforward

    def w(shape, scale=0.02):
        # matmul weights pre-transposed (in, out) and stored bf16 (MXU-native,
        # half the HBM/VMEM footprint).
        return (scale * jax.random.normal(next(keys), shape, jnp.float32)
                ).astype(jnp.bfloat16)

    def row(n):
        return 0.02 * jax.random.normal(next(keys), (1, n), jnp.float32)

    def ones(n):
        return jnp.ones((1, n), jnp.float32)

    def zeros(n):
        return jnp.zeros((1, n), jnp.float32)

    def attn_params():
        return dict(wq_t=w((E, E)), wk_t=w((E, E)), wv_t=w((E, E)), wo_t=w((E, E)),
                    bq=row(E), bk=row(E), bv=row(E), bo=row(E))

    def enc_layer():
        return dict(
            self_attn=attn_params(),
            lin1_w_t=w((E, Fd)), lin1_b=row(Fd),
            lin2_w_t=w((Fd, E)), lin2_b=row(E),
            norm1_w=ones(E), norm1_b=zeros(E),
            norm2_w=ones(E), norm2_b=zeros(E),
        )

    def dec_layer():
        d = enc_layer()
        d["cross_attn"] = attn_params()
        d["norm3_w"] = ones(E)
        d["norm3_b"] = zeros(E)
        return d

    return dict(
        proj_w_t=w((input_dim * patch_size, E)), proj_b=row(E),
        enc_layers=[enc_layer() for _ in range(num_layers)],
        dec_layers=[dec_layer() for _ in range(num_layers)],
        recon_w_t=w((E, input_dim * patch_size)), recon_b=row(input_dim * patch_size),
    )


# ----------------------------- main -----------------------------------------------

if __name__ == "__main__":
    B, C, T = 2, 4, 16
    embed_dim, patch_size, num_heads, num_layers = 32, 4, 4, 2

    key = jax.random.PRNGKey(0)
    kx, kp = jax.random.split(key)
    x = jax.random.normal(kx, (B, C, T), jnp.float32)
    params = init_params(kp, C, embed_dim, patch_size, num_heads, num_layers)

    fwd = jax.jit(functools.partial(transformer_autoencoder_forward,
                                    patch_size=patch_size, num_heads=num_heads))
    recon, latent = fwd(x, params)
    jax.block_until_ready((recon, latent))

    assert recon.shape == (B, C, T), recon.shape
    assert latent.shape == (B, T // patch_size, embed_dim), latent.shape
    assert jnp.all(jnp.isfinite(recon)) and jnp.all(jnp.isfinite(latent))
    print("KERNEL_OK")
</pallas_src>

<mosaic_0001>
module attributes {stable_mosaic.version = 11 : i64} {
  func.func @_linear_kernel(%arg0: i32, %arg1: memref<8x16xf32, #tpu.memory_space<vmem>>, %arg2: memref<16x32xbf16, #tpu.memory_space<vmem>>, %arg3: memref<1x32xf32, #tpu.memory_space<vmem>>, %arg4: memref<8x32xf32, #tpu.memory_space<vmem>>) attributes {dimension_semantics = [#tpu.dimension_semantics<parallel>], iteration_bounds = array<i64: 1>, scalar_prefetch = 0 : i64, scratch_operands = 0 : i64, tpu.core_type = #tpu.core_type<tc>, window_params = [{transform_indices = @transform_0, window_bounds = array<i64: 8, 16>}, {pipeline_mode = #tpu.pipeline_mode<synchronous>, transform_indices = @transform_1, window_bounds = array<i64: 16, 32>}, {pipeline_mode = #tpu.pipeline_mode<synchronous>, transform_indices = @transform_2, window_bounds = array<i64: 1, 32>}, {transform_indices = @transform_3, window_bounds = array<i64: 8, 32>}]} {
    %c0 = arith.constant 0 : index
    %c0_0 = arith.constant 0 : index
    %0 = vector.load %arg1[%c0, %c0_0] : memref<8x16xf32, #tpu.memory_space<vmem>>, vector<8x16xf32>
    %1 = arith.truncf %0 : vector<8x16xf32> to vector<8x16xbf16>
    %c0_1 = arith.constant 0 : index
    %c0_2 = arith.constant 0 : index
    %2 = vector.load %arg2[%c0_1, %c0_2] : memref<16x32xbf16, #tpu.memory_space<vmem>>, vector<16x32xbf16>
    %cst = arith.constant dense<0.000000e+00> : vector<8x32xf32>
    %3 = tpu.matmul %1, %2, %cst {dimension_numbers = #tpu.dot_dimension_numbers<[1], [0], [0], [1], [0, 0, 1, 1], [], []>} : vector<8x16xbf16>, vector<16x32xbf16>, vector<8x32xf32> -> vector<8x32xf32>
    %c0_3 = arith.constant 0 : index
    %c0_4 = arith.constant 0 : index
    %4 = vector.load %arg3[%c0_3, %c0_4] : memref<1x32xf32, #tpu.memory_space<vmem>>, vector<1x32xf32>
    %5 = vector.broadcast %4 : vector<1x32xf32> to vector<8x32xf32>
    %6 = arith.addf %3, %5 : vector<8x32xf32>
    %c0_5 = arith.constant 0 : index
    %c0_6 = arith.constant 0 : index
    %7 = vector.load %arg4[%c0_5, %c0_6] : memref<8x32xf32, #tpu.memory_space<vmem>>, vector<8x32xf32>
    tpu.vector_store %arg4[%c0_5, %c0_6], %6 {strides = array<i32>} : memref<8x32xf32, #tpu.memory_space<vmem>>, vector<8x32xf32>,
    return
  }
  func.func @transform_0(%arg0: i32) -> (i32, i32) {
    %c0_i32 = arith.constant 0 : i32
    %c0_i32_0 = arith.constant 0 : i32
    return %arg0, %c0_i32 : i32, i32
  }
  func.func @transform_1(%arg0: i32) -> (i32, i32) {
    %c0_i32 = arith.constant 0 : i32
    %c0_i32_0 = arith.constant 0 : i32
    %c0_i32_1 = arith.constant 0 : i32
    return %c0_i32, %c0_i32_0 : i32, i32
  }
  func.func @transform_2(%arg0: i32) -> (i32, i32) {
    %c0_i32 = arith.constant 0 : i32
    %c0_i32_0 = arith.constant 0 : i32
    %c0_i32_1 = arith.constant 0 : i32
    return %c0_i32, %c0_i32_0 : i32, i32
  }
  func.func @transform_3(%arg0: i32) -> (i32, i32) {
    %c0_i32 = arith.constant 0 : i32
    %c0_i32_0 = arith.constant 0 : i32
    return %arg0, %c0_i32 : i32, i32
  }
}

module attributes {stable_mosaic.version = 11 : i64} {
  func.func @_attn_block_kernel(%arg0: i32, %arg1: memref<8x32xf32, #tpu.memory_space<vmem>>, %arg2: memref<8x32xf32, #tpu.memory_space<vmem>>, %arg3: memref<32x32xbf16, #tpu.memory_space<vmem>>, %arg4: memref<32x32xbf16, #tpu.memory_space<vmem>>, %arg5: memref<32x32xbf16, #tpu.memory_space<vmem>>, %arg6: memref<32x32xbf16, #tpu.memory_space<vmem>>, %arg7: memref<1x32xf32, #tpu.memory_space<vmem>>, %arg8: memref<1x32xf32, #tpu.memory_space<vmem>>, %arg9: memref<1x32xf32, #tpu.memory_space<vmem>>, %arg10: memref<1x32xf32, #tpu.memory_space<vmem>>, %arg11: memref<1x32xf32, #tpu.memory_space<vmem>>, %arg12: memref<1x32xf32, #tpu.memory_space<vmem>>, %arg13: memref<8x32xf32, #tpu.memory_space<vmem>>, %arg14: memref<8x32xf32, #tpu.memory_space<vmem>>) attributes {dimension_semantics = [#tpu.dimension_semantics<parallel>], iteration_bounds = array<i64: 1>, scalar_prefetch = 0 : i64, scratch_operands = 1 : i64, tpu.core_type = #tpu.core_type<tc>, window_params = [{transform_indices = @transform_0, window_bounds = array<i64: 8, 32>}, {transform_indices = @transform_1, window_bounds = array<i64: 8, 32>}, {pipeline_mode = #tpu.pipeline_mode<synchronous>, transform_indices = @transform_2, window_bounds = array<i64: 32, 32>}, {pipeline_mode = #tpu.pipeline_mode<synchronous>, transform_indices = @transform_3, window_bounds = array<i64: 32, 32>}, {pipeline_mode = #tpu.pipeline_mode<synchronous>, transform_indices = @transform_4, window_bounds = array<i64: 32, 32>}, {pipeline_mode = #tpu.pipeline_mode<synchronous>, transform_indices = @transform_5, window_bounds = array<i64: 32, 32>}, {pipeline_mode = #tpu.pipeline_mode<synchronous>, transform_indices = @transform_6, window_bounds = array<i64: 1, 32>}, {pipeline_mode = #tpu.pipeline_mode<synchronous>, transform_indices = @transform_7, window_bounds = array<i64: 1, 32>}, {pipeline_mode = #tpu.pipeline_mode<synchronous>, transform_indices = @transform_8, window_bounds = array<i64: 1, 32>}, {pipeline_mode = #tpu.pipeline_mode<synchronous>, transform_indices = @transform_9, window_bounds = array<i64: 1, 32>}, {pipeline_mode = #tpu.pipeline_mode<synchronous>, transform_indices = @transform_10, window_bounds = array<i64: 1, 32>}, {pipeline_mode = #tpu.pipeline_mode<synchronous>, transform_indices = @transform_11, window_bounds = array<i64: 1, 32>}, {transform_indices = @transform_12, window_bounds = array<i64: 8, 32>}]} {
    %c0 = arith.constant 0 : index
    %c0_0 = arith.constant 0 : index
    %0 = vector.load %arg1[%c0, %c0_0] : memref<8x32xf32, #tpu.memory_space<vmem>>, vector<8x32xf32>
    %1 = arith.truncf %0 : vector<8x32xf32> to vector<8x32xbf16>
    %c0_1 = arith.constant 0 : index
    %c0_2 = arith.constant 0 : index
    %2 = vector.load %arg2[%c0_1, %c0_2] : memref<8x32xf32, #tpu.memory_space<vmem>>, vector<8x32xf32>
    %3 = arith.truncf %2 : vector<8x32xf32> to vector<8x32xbf16>
    %c0_3 = arith.constant 0 : index
    %c0_4 = arith.constant 0 : index
    %4 = vector.load %arg3[%c0_3, %c0_4] : memref<32x32xbf16, #tpu.memory_space<vmem>>, vector<32x32xbf16>
    %cst = arith.constant dense<0.000000e+00> : vector<8x32xf32>
    %5 = tpu.matmul %1, %4, %cst {dimension_numbers = #tpu.dot_dimension_numbers<[1], [0], [0], [1], [0, 0, 1, 1], [], []>} : vector<8x32xbf16>, vector<32x32xbf16>, vector<8x32xf32> -> vector<8x32xf32>
    %c0_5 = arith.constant 0 : index
    %c0_6 = arith.constant 0 : index
    %6 = vector.load %arg7[%c0_5, %c0_6] : memref<1x32xf32, #tpu.memory_space<vmem>>, vector<1x32xf32>
    %7 = vector.broadcast %6 : vector<1x32xf32> to vector<8x32xf32>
    %8 = arith.addf %5, %7 : vector<8x32xf32>
    %cst_7 = arith.constant 0.353553385 : f32
    %9 = vector.broadcast %cst_7 : f32 to vector<8x32xf32>
    %10 = arith.mulf %8, %9 : vector<8x32xf32>
    %c0_8 = arith.constant 0 : index
    %c0_9 = arith.constant 0 : index
    %11 = vector.load %arg4[%c0_8, %c0_9] : memref<32x32xbf16, #tpu.memory_space<vmem>>, vector<32x32xbf16>
    %cst_10 = arith.constant dense<0.000000e+00> : vector<8x32xf32>
    %12 = tpu.matmul %3, %11, %cst_10 {dimension_numbers = #tpu.dot_dimension_numbers<[1], [0], [0], [1], [0, 0, 1, 1], [], []>} : vector<8x32xbf16>, vector<32x32xbf16>, vector<8x32xf32> -> vector<8x32xf32>
    %c0_11 = arith.constant 0 : index
    %c0_12 = arith.constant 0 : index
    %13 = vector.load %arg8[%c0_11, %c0_12] : memref<1x32xf32, #tpu.memory_space<vmem>>, vector<1x32xf32>
    %14 = vector.broadcast %13 : vector<1x32xf32> to vector<8x32xf32>
    %15 = arith.addf %12, %14 : vector<8x32xf32>
    %c0_13 = arith.constant 0 : index
    %c0_14 = arith.constant 0 : index
    %16 = vector.load %arg5[%c0_13, %c0_14] : memref<32x32xbf16, #tpu.memory_space<vmem>>, vector<32x32xbf16>
    %cst_15 = arith.constant dense<0.000000e+00> : vector<8x32xf32>
    %17 = tpu.matmul %3, %16, %cst_15 {dimension_numbers = #tpu.dot_dimension_numbers<[1], [0], [0], [1], [0, 0, 1, 1], [], []>} : vector<8x32xbf16>, vector<32x32xbf16>, vector<8x32xf32> -> vector<8x32xf32>
    %c0_16 = arith.constant 0 : index
    %c0_17 = arith.constant 0 : index
    %18 = vector.load %arg9[%c0_16, %c0_17] : memref<1x32xf32, #tpu.memory_space<vmem>>, vector<1x32xf32>
    %19 = vector.broadcast %18 : vector<1x32xf32> to vector<8x32xf32>
    %20 = arith.addf %17, %19 : vector<8x32xf32>
    %21 = vector.extract_strided_slice %10 {offsets = [0, 0], sizes = [2, 8], strides = [1, 1]} : vector<8x32xf32> to vector<2x8xf32>
    %22 = arith.truncf %21 : vector<2x8xf32> to vector<2x8xbf16>
    %23 = vector.extract_strided_slice %15 {offsets = [0, 0], sizes = [2, 8], strides = [1, 1]} : vector<8x32xf32> to vector<2x8xf32>
    %24 = arith.truncf %23 : vector<2x8xf32> to vector<2x8xbf16>
    %25 = vector.extract_strided_slice %20 {offsets = [0, 0], sizes = [2, 8], strides = [1, 1]} : vector<8x32xf32> to vector<2x8xf32>
    %26 = arith.truncf %25 : vector<2x8xf32> to vector<2x8xbf16>
    %cst_18 = arith.constant dense<0.000000e+00> : vector<2x2xf32>
    %27 = tpu.matmul %22, %24, %cst_18 {dimension_numbers = #tpu.dot_dimension_numbers<[1], [1], [0], [0], [0, 0, 1, 0], [], []>} : vector<2x8xbf16>, vector<2x8xbf16>, vector<2x2xf32> -> vector<2x2xf32>
    %cst_19 = arith.constant dense<0xFF800000> : vector<2xf32>
    %28 = vector.multi_reduction <maximumf>, %27, %cst_19 [1] : vector<2x2xf32> to vector<2xf32>
    %29 = vector.shape_cast %28 : vector<2xf32> to vector<2x1xf32>
    %30 = vector.broadcast %29 : vector<2x1xf32> to vector<2x2xf32>
    %31 = arith.subf %27, %30 : vector<2x2xf32>
    %32 = math.exp %31 : vector<2x2xf32>
    %cst_20 = arith.constant dense<0.000000e+00> : vector<2xf32>
    %33 = vector.multi_reduction <add>, %32, %cst_20 [1] : vector<2x2xf32> to vector<2xf32>
    %34 = vector.shape_cast %33 : vector<2xf32> to vector<2x1xf32>
    %35 = tpu.reciprocal %34 {approx = true} : vector<2x1xf32> -> vector<2x1xf32>
    %36 = vector.broadcast %35 : vector<2x1xf32> to vector<2x2xf32>
    %37 = arith.mulf %32, %36 : vector<2x2xf32>
    %38 = arith.truncf %37 : vector<2x2xf32> to vector<2x2xbf16>
    %cst_21 = arith.constant dense<0.000000e+00> : vector<2x8xf32>
    %39 = tpu.matmul %38, %26, %cst_21 {dimension_numbers = #tpu.dot_dimension_numbers<[1], [0], [0], [1], [0, 0, 1, 1], [], []>} : vector<2x2xbf16>, vector<2x8xbf16>, vector<2x8xf32> -> vector<2x8xf32>
    %c0_22 = arith.constant 0 : index
    %c0_23 = arith.constant 0 : index
    %40 = vector.load %arg14[%c0_22, %c0_23] : memref<8x32xf32, #tpu.memory_space<vmem>>, vector<2x8xf32>
    tpu.vector_store %arg14[%c0_22, %c0_23], %39 {strides = array<i32>} : memref<8x32xf32, #tpu.memory_space<vmem>>, vector<2x8xf32>,
    %41 = vector.extract_strided_slice %10 {offsets = [0, 8], sizes = [2, 8], strides = [1, 1]} : vector<8x32xf32> to vector<2x8xf32>
    %42 = arith.truncf %41 : vector<2x8xf32> to vector<2x8xbf16>
    %43 = vector.extract_strided_slice %15 {offsets = [0, 8], sizes = [2, 8], strides = [1, 1]} : vector<8x32xf32> to vector<2x8xf32>
    %44 = arith.truncf %43 : vector<2x8xf32> to vector<2x8xbf16>
    %45 = vector.extract_strided_slice %20 {offsets = [0, 8], sizes = [2, 8], strides = [1, 1]} : vector<8x32xf32> to vector<2x8xf32>
    %46 = arith.truncf %45 : vector<2x8xf32> to vector<2x8xbf16>
    %cst_24 = arith.constant dense<0.000000e+00> : vector<2x2xf32>
    %47 = tpu.matmul %42, %44, %cst_24 {dimension_numbers = #tpu.dot_dimension_numbers<[1], [1], [0], [0], [0, 0, 1, 0], [], []>} : vector<2x8xbf16>, vector<2x8xbf16>, vector<2x2xf32> -> vector<2x2xf32>
    %cst_25 = arith.constant dense<0xFF800000> : vector<2xf32>
    %48 = vector.multi_reduction <maximumf>, %47, %cst_25 [1] : vector<2x2xf32> to vector<2xf32>
    %49 = vector.shape_cast %48 : vector<2xf32> to vector<2x1xf32>
    %50 = vector.broadcast %49 : vector<2x1xf32> to vector<2x2xf32>
    %51 = arith.subf %47, %50 : vector<2x2xf32>
    %52 = math.exp %51 : vector<2x2xf32>
    %cst_26 = arith.constant dense<0.000000e+00> : vector<2xf32>
    %53 = vector.multi_reduction <add>, %52, %cst_26 [1] : vector<2x2xf32> to vector<2xf32>
    %54 = vector.shape_cast %53 : vector<2xf32> to vector<2x1xf32>
    %55 = tpu.reciprocal %54 {approx = true} : vector<2x1xf32> -> vector<2x1xf32>
    %56 = vector.broadcast %55 : vector<2x1xf32> to vector<2x2xf32>
    %57 = arith.mulf %52, %56 : vector<2x2xf32>
    %58 = arith.truncf %57 : vector<2x2xf32> to vector<2x2xbf16>
    %cst_27 = arith.constant dense<0.000000e+00> : vector<2x8xf32>
    %59 = tpu.matmul %58, %46, %cst_27 {dimension_numbers = #tpu.dot_dimension_numbers<[1], [0], [0], [1], [0, 0, 1, 1], [], []>} : vector<2x2xbf16>, vector<2x8xbf16>, vector<2x8xf32> -> vector<2x8xf32>
    %c0_28 = arith.constant 0 : index
    %c8 = arith.constant 8 : index
    %60 = vector.load %arg14[%c0_28, %c8] : memref<8x32xf32, #tpu.memory_space<vmem>>, vector<2x8xf32>
    tpu.vector_store %arg14[%c0_28, %c8], %59 {strides = array<i32>} : memref<8x32xf32, #tpu.memory_space<vmem>>, vector<2x8xf32>,
    %61 = vector.extract_strided_slice %10 {offsets = [0, 16], sizes = [2, 8], strides = [1, 1]} : vector<8x32xf32> to vector<2x8xf32>
    %62 = arith.truncf %61 : vector<2x8xf32> to vector<2x8xbf16>
    %63 = vector.extract_strided_slice %15 {offsets = [0, 16], sizes = [2, 8], strides = [1, 1]} : vector<8x32xf32> to vector<2x8xf32>
    %64 = arith.truncf %63 : vector<2x8xf32> to vector<2x8xbf16>
    %65 = vector.extract_strided_slice %20 {offsets = [0, 16], sizes = [2, 8], strides = [1, 1]} : vector<8x32xf32> to vector<2x8xf32>
    %66 = arith.truncf %65 : vector<2x8xf32> to vector<2x8xbf16>
    %cst_29 = arith.constant dense<0.000000e+00> : vector<2x2xf32>
    %67 = tpu.matmul %62, %64, %cst_29 {dimension_numbers = #tpu.dot_dimension_numbers<[1], [1], [0], [0], [0, 0, 1, 0], [], []>} : vector<2x8xbf16>, vector<2x8xbf16>, vector<2x2xf32> -> vector<2x2xf32>
    %cst_30 = arith.constant dense<0xFF800000> : vector<2xf32>
    %68 = vector.multi_reduction <maximumf>, %67, %cst_30 [1] : vector<2x2xf32> to vector<2xf32>
    %69 = vector.shape_cast %68 : vector<2xf32> to vector<2x1xf32>
    %70 = vector.broadcast %69 : vector<2x1xf32> to vector<2x2xf32>
    %71 = arith.subf %67, %70 : vector<2x2xf32>
    %72 = math.exp %71 : vector<2x2xf32>
    %cst_31 = arith.constant dense<0.000000e+00> : vector<2xf32>
    %73 = vector.multi_reduction <add>, %72, %cst_31 [1] : vector<2x2xf32> to vector<2xf32>
    %74 = vector.shape_cast %73 : vector<2xf32> to vector<2x1xf32>
    %75 = tpu.reciprocal %74 {approx = true} : vector<2x1xf32> -> vector<2x1xf32>
    %76 = vector.broadcast %75 : vector<2x1xf32> to vector<2x2xf32>
    %77 = arith.mulf %72, %76 : vector<2x2xf32>
    %78 = arith.truncf %77 : vector<2x2xf32> to vector<2x2xbf16>
    %cst_32 = arith.constant dense<0.000000e+00> : vector<2x8xf32>
    %79 = tpu.matmul %78, %66, %cst_32 {dimension_numbers = #tpu.dot_dimension_numbers<[1], [0], [0], [1], [0, 0, 1, 1], [], []>} : vector<2x2xbf16>, vector<2x8xbf16>, vector<2x8xf32> -> vector<2x8xf32>
    %c0_33 = arith.constant 0 : index
    %c16 = arith.constant 16 : index
    %80 = vector.load %arg14[%c0_33, %c16] : memref<8x32xf32, #tpu.memory_space<vmem>>, vector<2x8xf32>
    tpu.vector_store %arg14[%c0_33, %c16], %79 {strides = array<i32>} : memref<8x32xf32, #tpu.memory_space<vmem>>, vector<2x8xf32>,
    %81 = vector.extract_strided_slice %10 {offsets = [0, 24], sizes = [2, 8], strides = [1, 1]} : vector<8x32xf32> to vector<2x8xf32>
    %82 = arith.truncf %81 : vector<2x8xf32> to vector<2x8xbf16>
    %83 = vector.extract_strided_slice %15 {offsets = [0, 24], sizes = [2, 8], strides = [1, 1]} : vector<8x32xf32> to vector<2x8xf32>
    %84 = arith.truncf %83 : vector<2x8xf32> to vector<2x8xbf16>
    %85 = vector.extract_strided_slice %20 {offsets = [0, 24], sizes = [2, 8], strides = [1, 1]} : vector<8x32xf32> to vector<2x8xf32>
    %86 = arith.truncf %85 : vector<2x8xf32> to vector<2x8xbf16>
    %cst_34 = arith.constant dense<0.000000e+00> : vector<2x2xf32>
    %87 = tpu.matmul %82, %84, %cst_34 {dimension_numbers = #tpu.dot_dimension_numbers<[1], [1], [0], [0], [0, 0, 1, 0], [], []>} : vector<2x8xbf16>, vector<2x8xbf16>, vector<2x2xf32> -> vector<2x2xf32>
    %cst_35 = arith.constant dense<0xFF800000> : vector<2xf32>
    %88 = vector.multi_reduction <maximumf>, %87, %cst_35 [1] : vector<2x2xf32> to vector<2xf32>
    %89 = vector.shape_cast %88 : vector<2xf32> to vector<2x1xf32>
    %90 = vector.broadcast %89 : vector<2x1xf32> to vector<2x2xf32>
    %91 = arith.subf %87, %90 : vector<2x2xf32>
    %92 = math.exp %91 : vector<2x2xf32>
    %cst_36 = arith.constant dense<0.000000e+00> : vector<2xf32>
    %93 = vector.multi_reduction <add>, %92, %cst_36 [1] : vector<2x2xf32> to vector<2xf32>
    %94 = vector.shape_cast %93 : vector<2xf32> to vector<2x1xf32>
    %95 = tpu.reciprocal %94 {approx = true} : vector<2x1xf32> -> vector<2x1xf32>
    %96 = vector.broadcast %95 : vector<2x1xf32> to vector<2x2xf32>
    %97 = arith.mulf %92, %96 : vector<2x2xf32>
    %98 = arith.truncf %97 : vector<2x2xf32> to vector<2x2xbf16>
    %cst_37 = arith.constant dense<0.000000e+00> : vector<2x8xf32>
    %99 = tpu.matmul %98, %86, %cst_37 {dimension_numbers = #tpu.dot_dimension_numbers<[1], [0], [0], [1], [0, 0, 1, 1], [], []>} : vector<2x2xbf16>, vector<2x8xbf16>, vector<2x8xf32> -> vector<2x8xf32>
    %c0_38 = arith.constant 0 : index
    %c24 = arith.constant 24 : index
    %100 = vector.load %arg14[%c0_38, %c24] : memref<8x32xf32, #tpu.memory_space<vmem>>, vector<2x8xf32>
    tpu.vector_store %arg14[%c0_38, %c24], %99 {strides = array<i32>} : memref<8x32xf32, #tpu.memory_space<vmem>>, vector<2x8xf32>,
    %101 = vector.extract_strided_slice %10 {offsets = [2, 0], sizes = [2, 8], strides = [1, 1]} : vector<8x32xf32> to vector<2x8xf32>
    %102 = arith.truncf %101 : vector<2x8xf32> to vector<2x8xbf16>
    %103 = vector.extract_strided_slice %15 {offsets = [2, 0], sizes = [2, 8], strides = [1, 1]} : vector<8x32xf32> to vector<2x8xf32>
    %104 = arith.truncf %103 : vector<2x8xf32> to vector<2x8xbf16>
    %105 = vector.extract_strided_slice %20 {offsets = [2, 0], sizes = [2, 8], strides = [1, 1]} : vector<8x32xf32> to vector<2x8xf32>
    %106 = arith.truncf %105 : vector<2x8xf32> to vector<2x8xbf16>
    %cst_39 = arith.constant dense<0.000000e+00> : vector<2x2xf32>
    %107 = tpu.matmul %102, %104, %cst_39 {dimension_numbers = #tpu.dot_dimension_numbers<[1], [1], [0], [0], [0, 0, 1, 0], [], []>} : vector<2x8xbf16>, vector<2x8xbf16>, vector<2x2xf32> -> vector<2x2xf32>
    %cst_40 = arith.constant dense<0xFF800000> : vector<2xf32>
    %108 = vector.multi_reduction <maximumf>, %107, %cst_40 [1] : vector<2x2xf32> to vector<2xf32>
    %109 = vector.shape_cast %108 : vector<2xf32> to vector<2x1xf32>
    %110 = vector.broadcast %109 : vector<2x1xf32> to vector<2x2xf32>
    %111 = arith.subf %107, %110 : vector<2x2xf32>
    %112 = math.exp %111 : vector<2x2xf32>
    %cst_41 = arith.constant dense<0.000000e+00> : vector<2xf32>
    %113 = vector.multi_reduction <add>, %112, %cst_41 [1] : vector<2x2xf32> to vector<2xf32>
    %114 = vector.shape_cast %113 : vector<2xf32> to vector<2x1xf32>
    %115 = tpu.reciprocal %114 {approx = true} : vector<2x1xf32> -> vector<2x1xf32>
    %116 = vector.broadcast %115 : vector<2x1xf32> to vector<2x2xf32>
    %117 = arith.mulf %112, %116 : vector<2x2xf32>
    %118 = arith.truncf %117 : vector<2x2xf32> to vector<2x2xbf16>
    %cst_42 = arith.constant dense<0.000000e+00> : vector<2x8xf32>
    %119 = tpu.matmul %118, %106, %cst_42 {dimension_numbers = #tpu.dot_dimension_numbers<[1], [0], [0], [1], [0, 0, 1, 1], [], []>} : vector<2x2xbf16>, vector<2x8xbf16>, vector<2x8xf32> -> vector<2x8xf32>
    %c2 = arith.constant 2 : index
    %c0_43 = arith.constant 0 : index
    %120 = vector.load %arg14[%c2, %c0_43] : memref<8x32xf32, #tpu.memory_space<vmem>>, vector<2x8xf32>
    tpu.vector_store %arg14[%c2, %c0_43], %119 {strides = array<i32>} : memref<8x32xf32, #tpu.memory_space<vmem>>, vector<2x8xf32>,
    %121 = vector.extract_strided_slice %10 {offsets = [2, 8], sizes = [2, 8], strides = [1, 1]} : vector<8x32xf32> to vector<2x8xf32>
    %122 = arith.truncf %121 : vector<2x8xf32> to vector<2x8xbf16>
    %123 = vector.extract_strided_slice %15 {offsets = [2, 8], sizes = [2, 8], strides = [1, 1]} : vector<8x32xf32> to vector<2x8xf32>
    %124 = arith.truncf %123 : vector<2x8xf32> to vector<2x8xbf16>
    %125 = vector.extract_strided_slice %20 {offsets = [2, 8], sizes = [2, 8], strides = [1, 1]} : vector<8x32xf32> to vector<2x8xf32>
    %126 = arith.truncf %125 : vector<2x8xf32> to vector<2x8xbf16>
    %cst_44 = arith.constant dense<0.000000e+00> : vector<2x2xf32>
    %127 = tpu.matmul %122, %124, %cst_44 {dimension_numbers = #tpu.dot_dimension_numbers<[1], [1], [0], [0], [0, 0, 1, 0], [], []>} : vector<2x8xbf16>, vector<2x8xbf16>, vector<2x2xf32> -> vector<2x2xf32>
    %cst_45 = arith.constant dense<0xFF800000> : vector<2xf32>
    %128 = vector.multi_reduction <maximumf>, %127, %cst_45 [1] : vector<2x2xf32> to vector<2xf32>
    %129 = vector.shape_cast %128 : vector<2xf32> to vector<2x1xf32>
    %130 = vector.broadcast %129 : vector<2x1xf32> to vector<2x2xf32>
    %131 = arith.subf %127, %130 : vector<2x2xf32>
    %132 = math.exp %131 : vector<2x2xf32>
    %cst_46 = arith.constant dense<0.000000e+00> : vector<2xf32>
    %133 = vector.multi_reduction <add>, %132, %cst_46 [1] : vector<2x2xf32> to vector<2xf32>
    %134 = vector.shape_cast %133 : vector<2xf32> to vector<2x1xf32>
    %135 = tpu.reciprocal %134 {approx = true} : vector<2x1xf32> -> vector<2x1xf32>
    %136 = vector.broadcast %135 : vector<2x1xf32> to vector<2x2xf32>
    %137 = arith.mulf %132, %136 : vector<2x2xf32>
    %138 = arith.truncf %137 : vector<2x2xf32> to vector<2x2xbf16>
    %cst_47 = arith.constant dense<0.000000e+00> : vector<2x8xf32>
    %139 = tpu.matmul %138, %126, %cst_47 {dimension_numbers = #tpu.dot_dimension_numbers<[1], [0], [0], [1], [0, 0, 1, 1], [], []>} : vector<2x2xbf16>, vector<2x8xbf16>, vector<2x8xf32> -> vector<2x8xf32>
    %c2_48 = arith.constant 2 : index
    %c8_49 = arith.constant 8 : index
    %140 = vector.load %arg14[%c2_48, %c8_49] : memref<8x32xf32, #tpu.memory_space<vmem>>, vector<2x8xf32>
    tpu.vector_store %arg14[%c2_48, %c8_49], %139 {strides = array<i32>} : memref<8x32xf32, #tpu.memory_space<vmem>>, vector<2x8xf32>,
    %141 = vector.extract_strided_slice %10 {offsets = [2, 16], sizes = [2, 8], strides = [1, 1]} : vector<8x32xf32> to vector<2x8xf32>
    %142 = arith.truncf %141 : vector<2x8xf32> to vector<2x8xbf16>
    %143 = vector.extract_strided_slice %15 {offsets = [2, 16], sizes = [2, 8], strides = [1, 1]} : vector<8x32xf32> to vector<2x8xf32>
    %144 = arith.truncf %143 : vector<2x8xf32> to vector<2x8xbf16>
    %145 = vector.extract_strided_slice %20 {offsets = [2, 16], sizes = [2, 8], strides = [1, 1]} : vector<8x32xf32> to vector<2x8xf32>
    %146 = arith.truncf %145 : vector<2x8xf32> to vector<2x8xbf16>
    %cst_50 = arith.constant dense<0.000000e+00> : vector<2x2xf32>
    %147 = tpu.matmul %142, %144, %cst_50 {dimension_numbers = #tpu.dot_dimension_numbers<[1], [1], [0], [0], [0, 0, 1, 0], [], []>} : vector<2x8xbf16>, vector<2x8xbf16>, vector<2x2xf32> -> vector<2x2xf32>
    %cst_51 = arith.constant dense<0xFF800000> : vector<2xf32>
    %148 = vector.multi_reduction <maximumf>, %147, %cst_51 [1] : vector<2x2xf32> to vector<2xf32>
    %149 = vector.shape_cast %148 : vector<2xf32> to vector<2x1xf32>
    %150 = vector.broadcast %149 : vector<2x1xf32> to vector<2x2xf32>
    %151 = arith.subf %147, %150 : vector<2x2xf32>
    %152 = math.exp %151 : vector<2x2xf32>
    %cst_52 = arith.constant dense<0.000000e+00> : vector<2xf32>
    %153 = vector.multi_reduction <add>, %152, %cst_52 [1] : vector<2x2xf32> to vector<2xf32>
    %154 = vector.shape_cast %153 : vector<2xf32> to vector<2x1xf32>
    %155 = tpu.reciprocal %154 {approx = true} : vector<2x1xf32> -> vector<2x1xf32>
    %156 = vector.broadcast %155 : vector<2x1xf32> to vector<2x2xf32>
    %157 = arith.mulf %152, %156 : vector<2x2xf32>
    %158 = arith.truncf %157 : vector<2x2xf32> to vector<2x2xbf16>
    %cst_53 = arith.constant dense<0.000000e+00> : vector<2x8xf32>
    %159 = tpu.matmul %158, %146, %cst_53 {dimension_numbers = #tpu.dot_dimension_numbers<[1], [0], [0], [1], [0, 0, 1, 1], [], []>} : vector<2x2xbf16>, vector<2x8xbf16>, vector<2x8xf32> -> vector<2x8xf32>
    %c2_54 = arith.constant 2 : index
    %c16_55 = arith.constant 16 : index
    %160 = vector.load %arg14[%c2_54, %c16_55] : memref<8x32xf32, #tpu.memory_space<vmem>>, vector<2x8xf32>
    tpu.vector_store %arg14[%c2_54, %c16_55], %159 {strides = array<i32>} : memref<8x32xf32, #tpu.memory_space<vmem>>, vector<2x8xf32>,
    %161 = vector.extract_strided_slice %10 {offsets = [2, 24], sizes = [2, 8], strides = [1, 1]} : vector<8x32xf32> to vector<2x8xf32>
    %162 = arith.truncf %161 : vector<2x8xf32> to vector<2x8xbf16>
    %163 = vector.extract_strided_slice %15 {offsets = [2, 24], sizes = [2, 8], strides = [1, 1]} : vector<8x32xf32> to vector<2x8xf32>
    %164 = arith.truncf %163 : vector<2x8xf32> to vector<2x8xbf16>
    %165 = vector.extract_strided_slice %20 {offsets = [2, 24], sizes = [2, 8], strides = [1, 1]} : vector<8x32xf32> to vector<2x8xf32>
    %166 = arith.truncf %165 : vector<2x8xf32> to vector<2x8xbf16>
    %cst_56 = arith.constant dense<0.000000e+00> : vector<2x2xf32>
    %167 = tpu.matmul %162, %164, %cst_56 {dimension_numbers = #tpu.dot_dimension_numbers<[1], [1], [0], [0], [0, 0, 1, 0], [], []>} : vector<2x8xbf16>, vector<2x8xbf16>, vector<2x2xf32> -> vector<2x2xf32>
    %cst_57 = arith.constant dense<0xFF800000> : vector<2xf32>
    %168 = vector.multi_reduction <maximumf>, %167, %cst_57 [1] : vector<2x2xf32> to vector<2xf32>
    %169 = vector.shape_cast %168 : vector<2xf32> to vector<2x1xf32>
    %170 = vector.broadcast %169 : vector<2x1xf32> to vector<2x2xf32>
    %171 = arith.subf %167, %170 : vector<2x2xf32>
    %172 = math.exp %171 : vector<2x2xf32>
    %cst_58 = arith.constant dense<0.000000e+00> : vector<2xf32>
    %173 = vector.multi_reduction <add>, %172, %cst_58 [1] : vector<2x2xf32> to vector<2xf32>
    %174 = vector.shape_cast %173 : vector<2xf32> to vector<2x1xf32>
    %175 = tpu.reciprocal %174 {approx = true} : vector<2x1xf32> -> vector<2x1xf32>
    %176 = vector.broadcast %175 : vector<2x1xf32> to vector<2x2xf32>
    %177 = arith.mulf %172, %176 : vector<2x2xf32>
    %178 = arith.truncf %177 : vector<2x2xf32> to vector<2x2xbf16>
    %cst_59 = arith.constant dense<0.000000e+00> : vector<2x8xf32>
    %179 = tpu.matmul %178, %166, %cst_59 {dimension_numbers = #tpu.dot_dimension_numbers<[1], [0], [0], [1], [0, 0, 1, 1], [], []>} : vector<2x2xbf16>, vector<2x8xbf16>, vector<2x8xf32> -> vector<2x8xf32>
    %c2_60 = arith.constant 2 : index
    %c24_61 = arith.constant 24 : index
    %180 = vector.load %arg14[%c2_60, %c24_61] : memref<8x32xf32, #tpu.memory_space<vmem>>, vector<2x8xf32>
    tpu.vector_store %arg14[%c2_60, %c24_61], %179 {strides = array<i32>} : memref<8x32xf32, #tpu.memory_space<vmem>>, vector<2x8xf32>,
    %181 = vector.extract_strided_slice %10 {offsets = [4, 0], sizes = [2, 8], strides = [1, 1]} : vector<8x32xf32> to vector<2x8xf32>
    %182 = arith.truncf %181 : vector<2x8xf32> to vector<2x8xbf16>
    %183 = vector.extract_strided_slice %15 {offsets = [4, 0], sizes = [2, 8], strides = [1, 1]} : vector<8x32xf32> to vector<2x8xf32>
    %184 = arith.truncf %183 : vector<2x8xf32> to vector<2x8xbf16>
    %185 = vector.extract_strided_slice %20 {offsets = [4, 0], sizes = [2, 8], strides = [1, 1]} : vector<8x32xf32> to vector<2x8xf32>
    %186 = arith.truncf %185 : vector<2x8xf32> to vector<2x8xbf16>
    %cst_62 = arith.constant dense<0.000000e+00> : vector<2x2xf32>
    %187 = tpu.matmul %182, %184, %cst_62 {dimension_numbers = #tpu.dot_dimension_numbers<[1], [1], [0], [0], [0, 0, 1, 0], [], []>} : vector<2x8xbf16>, vector<2x8xbf16>, vector<2x2xf32> -> vector<2x2xf32>
    %cst_63 = arith.constant dense<0xFF800000> : vector<2xf32>
    %188 = vector.multi_reduction <maximumf>, %187, %cst_63 [1] : vector<2x2xf32> to vector<2xf32>
    %189 = vector.shape_cast %188 : vector<2xf32> to vector<2x1xf32>
    %190 = vector.broadcast %189 : vector<2x1xf32> to vector<2x2xf32>
    %191 = arith.subf %187, %190 : vector<2x2xf32>
    %192 = math.exp %191 : vector<2x2xf32>
    %cst_64 = arith.constant dense<0.000000e+00> : vector<2xf32>
    %193 = vector.multi_reduction <add>, %192, %cst_64 [1] : vector<2x2xf32> to vector<2xf32>
    %194 = vector.shape_cast %193 : vector<2xf32> to vector<2x1xf32>
    %195 = tpu.reciprocal %194 {approx = true} : vector<2x1xf32> -> vector<2x1xf32>
    %196 = vector.broadcast %195 : vector<2x1xf32> to vector<2x2xf32>
    %197 = arith.mulf %192, %196 : vector<2x2xf32>
    %198 = arith.truncf %197 : vector<2x2xf32> to vector<2x2xbf16>
    %cst_65 = arith.constant dense<0.000000e+00> : vector<2x8xf32>
    %199 = tpu.matmul %198, %186, %cst_65 {dimension_numbers = #tpu.dot_dimension_numbers<[1], [0], [0], [1], [0, 0, 1, 1], [], []>} : vector<2x2xbf16>, vector<2x8xbf16>, vector<2x8xf32> -> vector<2x8xf32>
    %c4 = arith.constant 4 : index
    %c0_66 = arith.constant 0 : index
    %200 = vector.load %arg14[%c4, %c0_66] : memref<8x32xf32, #tpu.memory_space<vmem>>, vector<2x8xf32>
    tpu.vector_store %arg14[%c4, %c0_66], %199 {strides = array<i32>} : memref<8x32xf32, #tpu.memory_space<vmem>>, vector<2x8xf32>,
    %201 = vector.extract_strided_slice %10 {offsets = [4, 8], sizes = [2, 8], strides = [1, 1]} : vector<8x32xf32> to vector<2x8xf32>
    %202 = arith.truncf %201 : vector<2x8xf32> to vector<2x8xbf16>
    %203 = vector.extract_strided_slice %15 {offsets = [4, 8], sizes = [2, 8], strides = [1, 1]} : vector<8x32xf32> to vector<2x8xf32>
    %204 = arith.truncf %203 : vector<2x8xf32> to vector<2x8xbf16>
    %205 = vector.extract_strided_slice %20 {offsets = [4, 8], sizes = [2, 8], strides = [1, 1]} : vector<8x32xf32> to vector<2x8xf32>
    %206 = arith.truncf %205 : vector<2x8xf32> to vector<2x8xbf16>
    %cst_67 = arith.constant dense<0.000000e+00> : vector<2x2xf32>
    %207 = tpu.matmul %202, %204, %cst_67 {dimension_numbers = #tpu.dot_dimension_numbers<[1], [1], [0], [0], [0, 0, 1, 0], [], []>} : vector<2x8xbf16>, vector<2x8xbf16>, vector<2x2xf32> -> vector<2x2xf32>
    %cst_68 = arith.constant dense<0xFF800000> : vector<2xf32>
    %208 = vector.multi_reduction <maximumf>, %207, %cst_68 [1] : vector<2x2xf32> to vector<2xf32>
    %209 = vector.shape_cast %208 : vector<2xf32> to vector<2x1xf32>
    %210 = vector.broadcast %209 : vector<2x1xf32> to vector<2x2xf32>
    %211 = arith.subf %207, %210 : vector<2x2xf32>
    %212 = math.exp %211 : vector<2x2xf32>
    %cst_69 = arith.constant dense<0.000000e+00> : vector<2xf32>
    %213 = vector.multi_reduction <add>, %212, %cst_69 [1] : vector<2x2xf32> to vector<2xf32>
    %214 = vector.shape_cast %213 : vector<2xf32> to vector<2x1xf32>
    %215 = tpu.reciprocal %214 {approx = true} : vector<2x1xf32> -> vector<2x1xf32>
    %216 = vector.broadcast %215 : vector<2x1xf32> to vector<2x2xf32>
    %217 = arith.mulf %212, %216 : vector<2x2xf32>
    %218 = arith.truncf %217 : vector<2x2xf32> to vector<2x2xbf16>
    %cst_70 = arith.constant dense<0.000000e+00> : vector<2x8xf32>
    %219 = tpu.matmul %218, %206, %cst_70 {dimension_numbers = #tpu.dot_dimension_numbers<[1], [0], [0], [1], [0, 0, 1, 1], [], []>} : vector<2x2xbf16>, vector<2x8xbf16>, vector<2x8xf32> -> vector<2x8xf32>
    %c4_71 = arith.constant 4 : index
    %c8_72 = arith.constant 8 : index
    %220 = vector.load %arg14[%c4_71, %c8_72] : memref<8x32xf32, #tpu.memory_space<vmem>>, vector<2x8xf32>
    tpu.vector_store %arg14[%c4_71, %c8_72], %219 {strides = array<i32>} : memref<8x32xf32, #tpu.memory_space<vmem>>, vector<2x8xf32>,
    %221 = vector.extract_strided_slice %10 {offsets = [4, 16], sizes = [2, 8], strides = [1, 1]} : vector<8x32xf32> to vector<2x8xf32>
    %222 = arith.truncf %221 : vector<2x8xf32> to vector<2x8xbf16>
    %223 = vector.extract_strided_slice %15 {offsets = [4, 16], sizes = [2, 8], strides = [1, 1]} : vector<8x32xf32> to vector<2x8xf32>
    %224 = arith.truncf %223 : vector<2x8xf32> to vector<2x8xbf16>
    %225 = vector.extract_strided_slice %20 {offsets = [4, 16], sizes = [2, 8], strides = [1, 1]} : vector<8x32xf32> to vector<2x8xf32>
    %226 = arith.truncf %225 : vector<2x8xf32> to vector<2x8xbf16>
    %cst_73 = arith.constant dense<0.000000e+00> : vector<2x2xf32>
    %227 = tpu.matmul %222, %224, %cst_73 {dimension_numbers = #tpu.dot_dimension_numbers<[1], [1], [0], [0], [0, 0, 1, 0], [], []>} : vector<2x8xbf16>, vector<2x8xbf16>, vector<2x2xf32> -> vector<2x2xf32>
    %cst_74 = arith.constant dense<0xFF800000> : vector<2xf32>
    %228 = vector.multi_reduction <maximumf>, %227, %cst_74 [1] : vector<2x2xf32> to vector<2xf32>
    %229 = vector.shape_cast %228 : vector<2xf32> to vector<2x1xf32>
    %230 = vector.broadcast %229 : vector<2x1xf32> to vector<2x2xf32>
    %231 = arith.subf %227, %230 : vector<2x2xf32>
    %232 = math.exp %231 : vector<2x2xf32>
    %cst_75 = arith.constant dense<0.000000e+00> : vector<2xf32>
    %233 = vector.multi_reduction <add>, %232, %cst_75 [1] : vector<2x2xf32> to vector<2xf32>
    %234 = vector.shape_cast %233 : vector<2xf32> to vector<2x1xf32>
    %235 = tpu.reciprocal %234 {approx = true} : vector<2x1xf32> -> vector<2x1xf32>
    %236 = vector.broadcast %235 : vector<2x1xf32> to vector<2x2xf32>
    %237 = arith.mulf %232, %236 : vector<2x2xf32>
    %238 = arith.truncf %237 : vector<2x2xf32> to vector<2x2xbf16>
    %cst_76 = arith.constant dense<0.000000e+00> : vector<2x8xf32>
    %239 = tpu.matmul %238, %226, %cst_76 {dimension_numbers = #tpu.dot_dimension_numbers<[1], [0], [0], [1], [0, 0, 1, 1], [], []>} : vector<2x2xbf16>, vector<2x8xbf16>, vector<2x8xf32> -> vector<2x8xf32>
    %c4_77 = arith.constant 4 : index
    %c16_78 = arith.constant 16 : index
    %240 = vector.load %arg14[%c4_77, %c16_78] : memref<8x32xf32, #tpu.memory_space<vmem>>, vector<2x8xf32>
    tpu.vector_store %arg14[%c4_77, %c16_78], %239 {strides = array<i32>} : memref<8x32xf32, #tpu.memory_space<vmem>>, vector<2x8xf32>,
    %241 = vector.extract_strided_slice %10 {offsets = [4, 24], sizes = [2, 8], strides = [1, 1]} : vector<8x32xf32> to vector<2x8xf32>
    %242 = arith.truncf %241 : vector<2x8xf32> to vector<2x8xbf16>
    %243 = vector.extract_strided_slice %15 {offsets = [4, 24], sizes = [2, 8], strides = [1, 1]} : vector<8x32xf32> to vector<2x8xf32>
    %244 = arith.truncf %243 : vector<2x8xf32> to vector<2x8xbf16>
    %245 = vector.extract_strided_slice %20 {offsets = [4, 24], sizes = [2, 8], strides = [1, 1]} : vector<8x32xf32> to vector<2x8xf32>
    %246 = arith.truncf %245 : vector<2x8xf32> to vector<2x8xbf16>
    %cst_79 = arith.constant dense<0.000000e+00> : vector<2x2xf32>
    %247 = tpu.matmul %242, %244, %cst_79 {dimension_numbers = #tpu.dot_dimension_numbers<[1], [1], [0], [0], [0, 0, 1, 0], [], []>} : vector<2x8xbf16>, vector<2x8xbf16>, vector<2x2xf32> -> vector<2x2xf32>
    %cst_80 = arith.constant dense<0xFF800000> : vector<2xf32>
    %248 = vector.multi_reduction <maximumf>, %247, %cst_80 [1] : vector<2x2xf32> to vector<2xf32>
    %249 = vector.shape_cast %248 : vector<2xf32> to vector<2x1xf32>
    %250 = vector.broadcast %249 : vector<2x1xf32> to vector<2x2xf32>
    %251 = arith.subf %247, %250 : vector<2x2xf32>
    %252 = math.exp %251 : vector<2x2xf32>
    %cst_81 = arith.constant dense<0.000000e+00> : vector<2xf32>
    %253 = vector.multi_reduction <add>, %252, %cst_81 [1] : vector<2x2xf32> to vector<2xf32>
    %254 = vector.shape_cast %253 : vector<2xf32> to vector<2x1xf32>
    %255 = tpu.reciprocal %254 {approx = true} : vector<2x1xf32> -> vector<2x1xf32>
    %256 = vector.broadcast %255 : vector<2x1xf32> to vector<2x2xf32>
    %257 = arith.mulf %252, %256 : vector<2x2xf32>
    %258 = arith.truncf %257 : vector<2x2xf32> to vector<2x2xbf16>
    %cst_82 = arith.constant dense<0.000000e+00> : vector<2x8xf32>
    %259 = tpu.matmul %258, %246, %cst_82 {dimension_numbers = #tpu.dot_dimension_numbers<[1], [0], [0], [1], [0, 0, 1, 1], [], []>} : vector<2x2xbf16>, vector<2x8xbf16>, vector<2x8xf32> -> vector<2x8xf32>
    %c4_83 = arith.constant 4 : index
    %c24_84 = arith.constant 24 : index
    %260 = vector.load %arg14[%c4_83, %c24_84] : memref<8x32xf32, #tpu.memory_space<vmem>>, vector<2x8xf32>
    tpu.vector_store %arg14[%c4_83, %c24_84], %259 {strides = array<i32>} : memref<8x32xf32, #tpu.memory_space<vmem>>, vector<2x8xf32>,
    %261 = vector.extract_strided_slice %10 {offsets = [6, 0], sizes = [2, 8], strides = [1, 1]} : vector<8x32xf32> to vector<2x8xf32>
    %262 = arith.truncf %261 : vector<2x8xf32> to vector<2x8xbf16>
    %263 = vector.extract_strided_slice %15 {offsets = [6, 0], sizes = [2, 8], strides = [1, 1]} : vector<8x32xf32> to vector<2x8xf32>
    %264 = arith.truncf %263 : vector<2x8xf32> to vector<2x8xbf16>
    %265 = vector.extract_strided_slice %20 {offsets = [6, 0], sizes = [2, 8], strides = [1, 1]} : vector<8x32xf32> to vector<2x8xf32>
    %266 = arith.truncf %265 : vector<2x8xf32> to vector<2x8xbf16>
    %cst_85 = arith.constant dense<0.000000e+00> : vector<2x2xf32>
    %267 = tpu.matmul %262, %264, %cst_85 {dimension_numbers = #tpu.dot_dimension_numbers<[1], [1], [0], [0], [0, 0, 1, 0], [], []>} : vector<2x8xbf16>, vector<2x8xbf16>, vector<2x2xf32> -> vector<2x2xf32>
    %cst_86 = arith.constant dense<0xFF800000> : vector<2xf32>
    %268 = vector.multi_reduction <maximumf>, %267, %cst_86 [1] : vector<2x2xf32> to vector<2xf32>
    %269 = vector.shape_cast %268 : vector<2xf32> to vector<2x1xf32>
    %270 = vector.broadcast %269 : vector<2x1xf32> to vector<2x2xf32>
    %271 = arith.subf %267, %270 : vector<2x2xf32>
    %272 = math.exp %271 : vector<2x2xf32>
    %cst_87 = arith.constant dense<0.000000e+00> : vector<2xf32>
    %273 = vector.multi_reduction <add>, %272, %cst_87 [1] : vector<2x2xf32> to vector<2xf32>
    %274 = vector.shape_cast %273 : vector<2xf32> to vector<2x1xf32>
    %275 = tpu.reciprocal %274 {approx = true} : vector<2x1xf32> -> vector<2x1xf32>
    %276 = vector.broadcast %275 : vector<2x1xf32> to vector<2x2xf32>
    %277 = arith.mulf %272, %276 : vector<2x2xf32>
    %278 = arith.truncf %277 : vector<2x2xf32> to vector<2x2xbf16>
    %cst_88 = arith.constant dense<0.000000e+00> : vector<2x8xf32>
    %279 = tpu.matmul %278, %266, %cst_88 {dimension_numbers = #tpu.dot_dimension_numbers<[1], [0], [0], [1], [0, 0, 1, 1], [], []>} : vector<2x2xbf16>, vector<2x8xbf16>, vector<2x8xf32> -> vector<2x8xf32>
    %c6 = arith.constant 6 : index
    %c0_89 = arith.constant 0 : index
    %280 = vector.load %arg14[%c6, %c0_89] : memref<8x32xf32, #tpu.memory_space<vmem>>, vector<2x8xf32>
    tpu.vector_store %arg14[%c6, %c0_89], %279 {strides = array<i32>} : memref<8x32xf32, #tpu.memory_space<vmem>>, vector<2x8xf32>,
    %281 = vector.extract_strided_slice %10 {offsets = [6, 8], sizes = [2, 8], strides = [1, 1]} : vector<8x32xf32> to vector<2x8xf32>
    %282 = arith.truncf %281 : vector<2x8xf32> to vector<2x8xbf16>
    %283 = vector.extract_strided_slice %15 {offsets = [6, 8], sizes = [2, 8], strides = [1, 1]} : vector<8x32xf32> to vector<2x8xf32>
    %284 = arith.truncf %283 : vector<2x8xf32> to vector<2x8xbf16>
    %285 = vector.extract_strided_slice %20 {offsets = [6, 8], sizes = [2, 8], strides = [1, 1]} : vector<8x32xf32> to vector<2x8xf32>
    %286 = arith.truncf %285 : vector<2x8xf32> to vector<2x8xbf16>
    %cst_90 = arith.constant dense<0.000000e+00> : vector<2x2xf32>
    %287 = tpu.matmul %282, %284, %cst_90 {dimension_numbers = #tpu.dot_dimension_numbers<[1], [1], [0], [0], [0, 0, 1, 0], [], []>} : vector<2x8xbf16>, vector<2x8xbf16>, vector<2x2xf32> -> vector<2x2xf32>
    %cst_91 = arith.constant dense<0xFF800000> : vector<2xf32>
    %288 = vector.multi_reduction <maximumf>, %287, %cst_91 [1] : vector<2x2xf32> to vector<2xf32>
    %289 = vector.shape_cast %288 : vector<2xf32> to vector<2x1xf32>
    %290 = vector.broadcast %289 : vector<2x1xf32> to vector<2x2xf32>
    %291 = arith.subf %287, %290 : vector<2x2xf32>
    %292 = math.exp %291 : vector<2x2xf32>
    %cst_92 = arith.constant dense<0.000000e+00> : vector<2xf32>
    %293 = vector.multi_reduction <add>, %292, %cst_92 [1] : vector<2x2xf32> to vector<2xf32>
    %294 = vector.shape_cast %293 : vector<2xf32> to vector<2x1xf32>
    %295 = tpu.reciprocal %294 {approx = true} : vector<2x1xf32> -> vector<2x1xf32>
    %296 = vector.broadcast %295 : vector<2x1xf32> to vector<2x2xf32>
    %297 = arith.mulf %292, %296 : vector<2x2xf32>
    %298 = arith.truncf %297 : vector<2x2xf32> to vector<2x2xbf16>
    %cst_93 = arith.constant dense<0.000000e+00> : vector<2x8xf32>
    %299 = tpu.matmul %298, %286, %cst_93 {dimension_numbers = #tpu.dot_dimension_numbers<[1], [0], [0], [1], [0, 0, 1, 1], [], []>} : vector<2x2xbf16>, vector<2x8xbf16>, vector<2x8xf32> -> vector<2x8xf32>
    %c6_94 = arith.constant 6 : index
    %c8_95 = arith.constant 8 : index
    %300 = vector.load %arg14[%c6_94, %c8_95] : memref<8x32xf32, #tpu.memory_space<vmem>>, vector<2x8xf32>
    tpu.vector_store %arg14[%c6_94, %c8_95], %299 {strides = array<i32>} : memref<8x32xf32, #tpu.memory_space<vmem>>, vector<2x8xf32>,
    %301 = vector.extract_strided_slice %10 {offsets = [6, 16], sizes = [2, 8], strides = [1, 1]} : vector<8x32xf32> to vector<2x8xf32>
    %302 = arith.truncf %301 : vector<2x8xf32> to vector<2x8xbf16>
    %303 = vector.extract_strided_slice %15 {offsets = [6, 16], sizes = [2, 8], strides = [1, 1]} : vector<8x32xf32> to vector<2x8xf32>
    %304 = arith.truncf %303 : vector<2x8xf32> to vector<2x8xbf16>
    %305 = vector.extract_strided_slice %20 {offsets = [6, 16], sizes = [2, 8], strides = [1, 1]} : vector<8x32xf32> to vector<2x8xf32>
    %306 = arith.truncf %305 : vector<2x8xf32> to vector<2x8xbf16>
    %cst_96 = arith.constant dense<0.000000e+00> : vector<2x2xf32>
    %307 = tpu.matmul %302, %304, %cst_96 {dimension_numbers = #tpu.dot_dimension_numbers<[1], [1], [0], [0], [0, 0, 1, 0], [], []>} : vector<2x8xbf16>, vector<2x8xbf16>, vector<2x2xf32> -> vector<2x2xf32>
    %cst_97 = arith.constant dense<0xFF800000> : vector<2xf32>
    %308 = vector.multi_reduction <maximumf>, %307, %cst_97 [1] : vector<2x2xf32> to vector<2xf32>
    %309 = vector.shape_cast %308 : vector<2xf32> to vector<2x1xf32>
    %310 = vector.broadcast %309 : vector<2x1xf32> to vector<2x2xf32>
    %311 = arith.subf %307, %310 : vector<2x2xf32>
    %312 = math.exp %311 : vector<2x2xf32>
    %cst_98 = arith.constant dense<0.000000e+00> : vector<2xf32>
    %313 = vector.multi_reduction <add>, %312, %cst_98 [1] : vector<2x2xf32> to vector<2xf32>
    %314 = vector.shape_cast %313 : vector<2xf32> to vector<2x1xf32>
    %315 = tpu.reciprocal %314 {approx = true} : vector<2x1xf32> -> vector<2x1xf32>
    %316 = vector.broadcast %315 : vector<2x1xf32> to vector<2x2xf32>
    %317 = arith.mulf %312, %316 : vector<2x2xf32>
    %318 = arith.truncf %317 : vector<2x2xf32> to vector<2x2xbf16>
    %cst_99 = arith.constant dense<0.000000e+00> : vector<2x8xf32>
    %319 = tpu.matmul %318, %306, %cst_99 {dimension_numbers = #tpu.dot_dimension_numbers<[1], [0], [0], [1], [0, 0, 1, 1], [], []>} : vector<2x2xbf16>, vector<2x8xbf16>, vector<2x8xf32> -> vector<2x8xf32>
    %c6_100 = arith.constant 6 : index
    %c16_101 = arith.constant 16 : index
    %320 = vector.load %arg14[%c6_100, %c16_101] : memref<8x32xf32, #tpu.memory_space<vmem>>, vector<2x8xf32>
    tpu.vector_store %arg14[%c6_100, %c16_101], %319 {strides = array<i32>} : memref<8x32xf32, #tpu.memory_space<vmem>>, vector<2x8xf32>,
    %321 = vector.extract_strided_slice %10 {offsets = [6, 24], sizes = [2, 8], strides = [1, 1]} : vector<8x32xf32> to vector<2x8xf32>
    %322 = arith.truncf %321 : vector<2x8xf32> to vector<2x8xbf16>
    %323 = vector.extract_strided_slice %15 {offsets = [6, 24], sizes = [2, 8], strides = [1, 1]} : vector<8x32xf32> to vector<2x8xf32>
    %324 = arith.truncf %323 : vector<2x8xf32> to vector<2x8xbf16>
    %325 = vector.extract_strided_slice %20 {offsets = [6, 24], sizes = [2, 8], strides = [1, 1]} : vector<8x32xf32> to vector<2x8xf32>
    %326 = arith.truncf %325 : vector<2x8xf32> to vector<2x8xbf16>
    %cst_102 = arith.constant dense<0.000000e+00> : vector<2x2xf32>
    %327 = tpu.matmul %322, %324, %cst_102 {dimension_numbers = #tpu.dot_dimension_numbers<[1], [1], [0], [0], [0, 0, 1, 0], [], []>} : vector<2x8xbf16>, vector<2x8xbf16>, vector<2x2xf32> -> vector<2x2xf32>
    %cst_103 = arith.constant dense<0xFF800000> : vector<2xf32>
    %328 = vector.multi_reduction <maximumf>, %327, %cst_103 [1] : vector<2x2xf32> to vector<2xf32>
    %329 = vector.shape_cast %328 : vector<2xf32> to vector<2x1xf32>
    %330 = vector.broadcast %329 : vector<2x1xf32> to vector<2x2xf32>
    %331 = arith.subf %327, %330 : vector<2x2xf32>
    %332 = math.exp %331 : vector<2x2xf32>
    %cst_104 = arith.constant dense<0.000000e+00> : vector<2xf32>
    %333 = vector.multi_reduction <add>, %332, %cst_104 [1] : vector<2x2xf32> to vector<2xf32>
    %334 = vector.shape_cast %333 : vector<2xf32> to vector<2x1xf32>
    %335 = tpu.reciprocal %334 {approx = true} : vector<2x1xf32> -> vector<2x1xf32>
    %336 = vector.broadcast %335 : vector<2x1xf32> to vector<2x2xf32>
    %337 = arith.mulf %332, %336 : vector<2x2xf32>
    %338 = arith.truncf %337 : vector<2x2xf32> to vector<2x2xbf16>
    %cst_105 = arith.constant dense<0.000000e+00> : vector<2x8xf32>
    %339 = tpu.matmul %338, %326, %cst_105 {dimension_numbers = #tpu.dot_dimension_numbers<[1], [0], [0], [1], [0, 0, 1, 1], [], []>} : vector<2x2xbf16>, vector<2x8xbf16>, vector<2x8xf32> -> vector<2x8xf32>
    %c6_106 = arith.constant 6 : index
    %c24_107 = arith.constant 24 : index
    %340 = vector.load %arg14[%c6_106, %c24_107] : memref<8x32xf32, #tpu.memory_space<vmem>>, vector<2x8xf32>
    tpu.vector_store %arg14[%c6_106, %c24_107], %339 {strides = array<i32>} : memref<8x32xf32, #tpu.memory_space<vmem>>, vector<2x8xf32>,
    %c0_108 = arith.constant 0 : index
    %c0_109 = arith.constant 0 : index
    %341 = vector.load %arg14[%c0_108, %c0_109] : memref<8x32xf32, #tpu.memory_space<vmem>>, vector<8x32xf32>
    %342 = arith.truncf %341 : vector<8x32xf32> to vector<8x32xbf16>
    %c0_110 = arith.constant 0 : index
    %c0_111 = arith.constant 0 : index
    %343 = vector.load %arg6[%c0_110, %c0_111] : memref<32x32xbf16, #tpu.memory_space<vmem>>, vector<32x32xbf16>
    %cst_112 = arith.constant dense<0.000000e+00> : vector<8x32xf32>
    %344 = tpu.matmul %342, %343, %cst_112 {dimension_numbers = #tpu.dot_dimension_numbers<[1], [0], [0], [1], [0, 0, 1, 1], [], []>} : vector<8x32xbf16>, vector<32x32xbf16>, vector<8x32xf32> -> vector<8x32xf32>
    %c0_113 = arith.constant 0 : index
    %c0_114 = arith.constant 0 : index
    %345 = vector.load %arg10[%c0_113, %c0_114] : memref<1x32xf32, #tpu.memory_space<vmem>>, vector<1x32xf32>
    %346 = vector.broadcast %345 : vector<1x32xf32> to vector<8x32xf32>
    %347 = arith.addf %344, %346 : vector<8x32xf32>
    %348 = arith.addf %0, %347 : vector<8x32xf32>
    %cst_115 = arith.constant dense<0.000000e+00> : vector<8xf32>
    %349 = vector.multi_reduction <add>, %348, %cst_115 [1] : vector<8x32xf32> to vector<8xf32>
    %350 = vector.shape_cast %349 : vector<8xf32> to vector<8x1xf32>
    %cst_116 = arith.constant 3.200000e+01 : f32
    %351 = vector.broadcast %cst_116 : f32 to vector<8x1xf32>
    %352 = arith.divf %350, %351 : vector<8x1xf32>
    %353 = vector.broadcast %352 : vector<8x1xf32> to vector<8x32xf32>
    %354 = arith.subf %348, %353 : vector<8x32xf32>
    %355 = arith.mulf %354, %354 : vector<8x32xf32>
    %cst_117 = arith.constant dense<0.000000e+00> : vector<8xf32>
    %356 = vector.multi_reduction <add>, %355, %cst_117 [1] : vector<8x32xf32> to vector<8xf32>
    %357 = vector.shape_cast %356 : vector<8xf32> to vector<8x1xf32>
    %cst_118 = arith.constant 3.200000e+01 : f32
    %358 = vector.broadcast %cst_118 : f32 to vector<8x1xf32>
    %359 = arith.divf %357, %358 : vector<8x1xf32>
    %cst_119 = arith.constant 9.99999974E-6 : f32
    %360 = vector.broadcast %cst_119 : f32 to vector<8x1xf32>
    %361 = arith.addf %359, %360 : vector<8x1xf32>
    %362 = math.rsqrt %361 : vector<8x1xf32>
    %363 = vector.broadcast %362 : vector<8x1xf32> to vector<8x32xf32>
    %364 = arith.mulf %354, %363 : vector<8x32xf32>
    %c0_120 = arith.constant 0 : index
    %c0_121 = arith.constant 0 : index
    %365 = vector.load %arg11[%c0_120, %c0_121] : memref<1x32xf32, #tpu.memory_space<vmem>>, vector<1x32xf32>
    %366 = vector.broadcast %365 : vector<1x32xf32> to vector<8x32xf32>
    %367 = arith.mulf %364, %366 : vector<8x32xf32>
    %c0_122 = arith.constant 0 : index
    %c0_123 = arith.constant 0 : index
    %368 = vector.load %arg12[%c0_122, %c0_123] : memref<1x32xf32, #tpu.memory_space<vmem>>, vector<1x32xf32>
    %369 = vector.broadcast %368 : vector<1x32xf32> to vector<8x32xf32>
    %370 = arith.addf %367, %369 : vector<8x32xf32>
    %c0_124 = arith.constant 0 : index
    %c0_125 = arith.constant 0 : index
    %371 = vector.load %arg13[%c0_124, %c0_125] : memref<8x32xf32, #tpu.memory_space<vmem>>, vector<8x32xf32>
    tpu.vector_store %arg13[%c0_124, %c0_125], %370 {strides = array<i32>} : memref<8x32xf32, #tpu.memory_space<vmem>>, vector<8x32xf32>,
    return
  }
  func.func @transform_0(%arg0: i32) -> (i32, i32) {
    %c0_i32 = arith.constant 0 : i32
    %c0_i32_0 = arith.constant 0 : i32
    return %arg0, %c0_i32 : i32, i32
  }
  func.func @transform_1(%arg0: i32) -> (i32, i32) {
    %c0_i32 = arith.constant 0 : i32
    %c0_i32_0 = arith.constant 0 : i32
    return %arg0, %c0_i32 : i32, i32
  }
  func.func @transform_2(%arg0: i32) -> (i32, i32) {
    %c0_i32 = arith.constant 0 : i32
    %c0_i32_0 = arith.constant 0 : i32
    %c0_i32_1 = arith.constant 0 : i32
    return %c0_i32, %c0_i32_0 : i32, i32
  }
  func.func @transform_3(%arg0: i32) -> (i32, i32) {
    %c0_i32 = arith.constant 0 : i32
    %c0_i32_0 = arith.constant 0 : i32
    %c0_i32_1 = arith.constant 0 : i32
    return %c0_i32, %c0_i32_0 : i32, i32
  }
  func.func @transform_4(%arg0: i32) -> (i32, i32) {
    %c0_i32 = arith.constant 0 : i32
    %c0_i32_0 = arith.constant 0 : i32
    %c0_i32_1 = arith.constant 0 : i32
    return %c0_i32, %c0_i32_0 : i32, i32
  }
  func.func @transform_5(%arg0: i32) -> (i32, i32) {
    %c0_i32 = arith.constant 0 : i32
    %c0_i32_0 = arith.constant 0 : i32
    %c0_i32_1 = arith.constant 0 : i32
    return %c0_i32, %c0_i32_0 : i32, i32
  }
  func.func @transform_6(%arg0: i32) -> (i32, i32) {
    %c0_i32 = arith.constant 0 : i32
    %c0_i32_0 = arith.constant 0 : i32
    %c0_i32_1 = arith.constant 0 : i32
    return %c0_i32, %c0_i32_0 : i32, i32
  }
  func.func @transform_7(%arg0: i32) -> (i32, i32) {
    %c0_i32 = arith.constant 0 : i32
    %c0_i32_0 = arith.constant 0 : i32
    %c0_i32_1 = arith.constant 0 : i32
    return %c0_i32, %c0_i32_0 : i32, i32
  }
  func.func @transform_8(%arg0: i32) -> (i32, i32) {
    %c0_i32 = arith.constant 0 : i32
    %c0_i32_0 = arith.constant 0 : i32
    %c0_i32_1 = arith.constant 0 : i32
    return %c0_i32, %c0_i32_0 : i32, i32
  }
  func.func @transform_9(%arg0: i32) -> (i32, i32) {
    %c0_i32 = arith.constant 0 : i32
    %c0_i32_0 = arith.constant 0 : i32
    %c0_i32_1 = arith.constant 0 : i32
    return %c0_i32, %c0_i32_0 : i32, i32
  }
  func.func @transform_10(%arg0: i32) -> (i32, i32) {
    %c0_i32 = arith.constant 0 : i32
    %c0_i32_0 = arith.constant 0 : i32
    %c0_i32_1 = arith.constant 0 : i32
    return %c0_i32, %c0_i32_0 : i32, i32
  }
  func.func @transform_11(%arg0: i32) -> (i32, i32) {
    %c0_i32 = arith.constant 0 : i32
    %c0_i32_0 = arith.constant 0 : i32
    %c0_i32_1 = arith.constant 0 : i32
    return %c0_i32, %c0_i32_0 : i32, i32
  }
  func.func @transform_12(%arg0: i32) -> (i32, i32) {
    %c0_i32 = arith.constant 0 : i32
    %c0_i32_0 = arith.constant 0 : i32
    return %arg0, %c0_i32 : i32, i32
  }
}

module attributes {stable_mosaic.version = 11 : i64} {
  func.func @_ffn_block_kernel(%arg0: i32, %arg1: i32, %arg2: memref<8x32xf32, #tpu.memory_space<vmem>>, %arg3: memref<32x1024xbf16, #tpu.memory_space<vmem>>, %arg4: memref<1x1024xf32, #tpu.memory_space<vmem>>, %arg5: memref<1024x32xbf16, #tpu.memory_space<vmem>>, %arg6: memref<1x32xf32, #tpu.memory_space<vmem>>, %arg7: memref<1x32xf32, #tpu.memory_space<vmem>>, %arg8: memref<1x32xf32, #tpu.memory_space<vmem>>, %arg9: memref<8x32xf32, #tpu.memory_space<vmem>>, %arg10: memref<8x32xf32, #tpu.memory_space<vmem>>) attributes {dimension_semantics = [#tpu.dimension_semantics<parallel>, #tpu.dimension_semantics<arbitrary>], iteration_bounds = array<i64: 1, 2>, scalar_prefetch = 0 : i64, scratch_operands = 1 : i64, tpu.core_type = #tpu.core_type<tc>, window_params = [{transform_indices = @transform_0, window_bounds = array<i64: 8, 32>}, {transform_indices = @transform_1, window_bounds = array<i64: 32, 1024>}, {transform_indices = @transform_2, window_bounds = array<i64: 1, 1024>}, {transform_indices = @transform_3, window_bounds = array<i64: 1024, 32>}, {pipeline_mode = #tpu.pipeline_mode<synchronous>, transform_indices = @transform_4, window_bounds = array<i64: 1, 32>}, {pipeline_mode = #tpu.pipeline_mode<synchronous>, transform_indices = @transform_5, window_bounds = array<i64: 1, 32>}, {pipeline_mode = #tpu.pipeline_mode<synchronous>, transform_indices = @transform_6, window_bounds = array<i64: 1, 32>}, {transform_indices = @transform_7, window_bounds = array<i64: 8, 32>}]} {
    %c0 = arith.constant 0 : index
    %c0_0 = arith.constant 0 : index
    %0 = vector.load %arg2[%c0, %c0_0] : memref<8x32xf32, #tpu.memory_space<vmem>>, vector<8x32xf32>
    %1 = arith.truncf %0 : vector<8x32xf32> to vector<8x32xbf16>
    %c0_1 = arith.constant 0 : index
    %c0_2 = arith.constant 0 : index
    %2 = vector.load %arg3[%c0_1, %c0_2] : memref<32x1024xbf16, #tpu.memory_space<vmem>>, vector<32x1024xbf16>
    %cst = arith.constant dense<0.000000e+00> : vector<8x1024xf32>
    %3 = tpu.matmul %1, %2, %cst {dimension_numbers = #tpu.dot_dimension_numbers<[1], [0], [0], [1], [0, 0, 1, 1], [], []>} : vector<8x32xbf16>, vector<32x1024xbf16>, vector<8x1024xf32> -> vector<8x1024xf32>
    %c0_3 = arith.constant 0 : index
    %c0_4 = arith.constant 0 : index
    %4 = vector.load %arg4[%c0_3, %c0_4] : memref<1x1024xf32, #tpu.memory_space<vmem>>, vector<1x1024xf32>
    %5 = vector.broadcast %4 : vector<1x1024xf32> to vector<8x1024xf32>
    %6 = arith.addf %3, %5 : vector<8x1024xf32>
    %cst_5 = arith.constant 0.000000e+00 : f32
    %7 = vector.broadcast %cst_5 : f32 to vector<8x1024xf32>
    %8 = arith.maximumf %6, %7 : vector<8x1024xf32>
    %9 = arith.truncf %8 : vector<8x1024xf32> to vector<8x1024xbf16>
    %c0_6 = arith.constant 0 : index
    %c0_7 = arith.constant 0 : index
    %10 = vector.load %arg5[%c0_6, %c0_7] : memref<1024x32xbf16, #tpu.memory_space<vmem>>, vector<1024x32xbf16>
    %cst_8 = arith.constant dense<0.000000e+00> : vector<8x32xf32>
    %11 = tpu.matmul %9, %10, %cst_8 {dimension_numbers = #tpu.dot_dimension_numbers<[1], [0], [0], [1], [0, 0, 1, 1], [], []>} : vector<8x1024xbf16>, vector<1024x32xbf16>, vector<8x32xf32> -> vector<8x32xf32>
    %c0_i32 = arith.constant 0 : i32
    %12 = arith.cmpi eq, %arg1, %c0_i32 : i32
    %13 = arith.extui %12 : i1 to i32
    %c0_i32_9 = arith.constant 0 : i32
    %14 = arith.cmpi ne, %13, %c0_i32_9 : i32
    scf.if %14 {
      %c0_13 = arith.constant 0 : index
      %c0_14 = arith.constant 0 : index
      %21 = vector.load %arg10[%c0_13, %c0_14] : memref<8x32xf32, #tpu.memory_space<vmem>>, vector<8x32xf32>
      tpu.vector_store %arg10[%c0_13, %c0_14], %11 {strides = array<i32>} : memref<8x32xf32, #tpu.memory_space<vmem>>, vector<8x32xf32>,
    } else {
    }
    %c0_i32_10 = arith.constant 0 : i32
    %15 = arith.cmpi sgt, %arg1, %c0_i32_10 : i32
    %16 = arith.extui %15 : i1 to i32
    %c0_i32_11 = arith.constant 0 : i32
    %17 = arith.cmpi ne, %16, %c0_i32_11 : i32
    scf.if %17 {
      %c0_13 = arith.constant 0 : index
      %c0_14 = arith.constant 0 : index
      %21 = vector.load %arg10[%c0_13, %c0_14] : memref<8x32xf32, #tpu.memory_space<vmem>>, vector<8x32xf32>
      %22 = arith.addf %21, %11 : vector<8x32xf32>
      %c0_15 = arith.constant 0 : index
      %c0_16 = arith.constant 0 : index
      %23 = vector.load %arg10[%c0_15, %c0_16] : memref<8x32xf32, #tpu.memory_space<vmem>>, vector<8x32xf32>
      tpu.vector_store %arg10[%c0_15, %c0_16], %22 {strides = array<i32>} : memref<8x32xf32, #tpu.memory_space<vmem>>, vector<8x32xf32>,
    } else {
    }
    %c1_i32 = arith.constant 1 : i32
    %18 = arith.cmpi eq, %arg1, %c1_i32 : i32
    %19 = arith.extui %18 : i1 to i32
    %c0_i32_12 = arith.constant 0 : i32
    %20 = arith.cmpi ne, %19, %c0_i32_12 : i32
    scf.if %20 {
      %c0_13 = arith.constant 0 : index
      %c0_14 = arith.constant 0 : index
      %21 = vector.load %arg10[%c0_13, %c0_14] : memref<8x32xf32, #tpu.memory_space<vmem>>, vector<8x32xf32>
      %c0_15 = arith.constant 0 : index
      %c0_16 = arith.constant 0 : index
      %22 = vector.load %arg6[%c0_15, %c0_16] : memref<1x32xf32, #tpu.memory_space<vmem>>, vector<1x32xf32>
      %23 = vector.broadcast %22 : vector<1x32xf32> to vector<8x32xf32>
      %24 = arith.addf %21, %23 : vector<8x32xf32>
      %c0_17 = arith.constant 0 : index
      %c0_18 = arith.constant 0 : index
      %25 = vector.load %arg2[%c0_17, %c0_18] : memref<8x32xf32, #tpu.memory_space<vmem>>, vector<8x32xf32>
      %26 = arith.addf %24, %25 : vector<8x32xf32>
      %cst_19 = arith.constant dense<0.000000e+00> : vector<8xf32>
      %27 = vector.multi_reduction <add>, %26, %cst_19 [1] : vector<8x32xf32> to vector<8xf32>
      %28 = vector.shape_cast %27 : vector<8xf32> to vector<8x1xf32>
      %cst_20 = arith.constant 3.200000e+01 : f32
      %29 = vector.broadcast %cst_20 : f32 to vector<8x1xf32>
      %30 = arith.divf %28, %29 : vector<8x1xf32>
      %31 = vector.broadcast %30 : vector<8x1xf32> to vector<8x32xf32>
      %32 = arith.subf %26, %31 : vector<8x32xf32>
      %33 = arith.mulf %32, %32 : vector<8x32xf32>
      %cst_21 = arith.constant dense<0.000000e+00> : vector<8xf32>
      %34 = vector.multi_reduction <add>, %33, %cst_21 [1] : vector<8x32xf32> to vector<8xf32>
      %35 = vector.shape_cast %34 : vector<8xf32> to vector<8x1xf32>
      %cst_22 = arith.constant 3.200000e+01 : f32
      %36 = vector.broadcast %cst_22 : f32 to vector<8x1xf32>
      %37 = arith.divf %35, %36 : vector<8x1xf32>
      %cst_23 = arith.constant 9.99999974E-6 : f32
      %38 = vector.broadcast %cst_23 : f32 to vector<8x1xf32>
      %39 = arith.addf %37, %38 : vector<8x1xf32>
      %40 = math.rsqrt %39 : vector<8x1xf32>
      %41 = vector.broadcast %40 : vector<8x1xf32> to vector<8x32xf32>
      %42 = arith.mulf %32, %41 : vector<8x32xf32>
      %c0_24 = arith.constant 0 : index
      %c0_25 = arith.constant 0 : index
      %43 = vector.load %arg7[%c0_24, %c0_25] : memref<1x32xf32, #tpu.memory_space<vmem>>, vector<1x32xf32>
      %44 = vector.broadcast %43 : vector<1x32xf32> to vector<8x32xf32>
      %45 = arith.mulf %42, %44 : vector<8x32xf32>
      %c0_26 = arith.constant 0 : index
      %c0_27 = arith.constant 0 : index
      %46 = vector.load %arg8[%c0_26, %c0_27] : memref<1x32xf32, #tpu.memory_space<vmem>>, vector<1x32xf32>
      %47 = vector.broadcast %46 : vector<1x32xf32> to vector<8x32xf32>
      %48 = arith.addf %45, %47 : vector<8x32xf32>
      %c0_28 = arith.constant 0 : index
      %c0_29 = arith.constant 0 : index
      %49 = vector.load %arg9[%c0_28, %c0_29] : memref<8x32xf32, #tpu.memory_space<vmem>>, vector<8x32xf32>
      tpu.vector_store %arg9[%c0_28, %c0_29], %48 {strides = array<i32>} : memref<8x32xf32, #tpu.memory_space<vmem>>, vector<8x32xf32>,
    } else {
    }
    return
  }
  func.func @transform_0(%arg0: i32, %arg1: i32) -> (i32, i32) {
    %c0_i32 = arith.constant 0 : i32
    %c0_i32_0 = arith.constant 0 : i32
    return %arg0, %c0_i32 : i32, i32
  }
  func.func @transform_1(%arg0: i32, %arg1: i32) -> (i32, i32) {
    %c0_i32 = arith.constant 0 : i32
    %c0_i32_0 = arith.constant 0 : i32
    return %c0_i32, %arg1 : i32, i32
  }
  func.func @transform_2(%arg0: i32, %arg1: i32) -> (i32, i32) {
    %c0_i32 = arith.constant 0 : i32
    %c0_i32_0 = arith.constant 0 : i32
    return %c0_i32, %arg1 : i32, i32
  }
  func.func @transform_3(%arg0: i32, %arg1: i32) -> (i32, i32) {
    %c0_i32 = arith.constant 0 : i32
    %c0_i32_0 = arith.constant 0 : i32
    return %arg1, %c0_i32 : i32, i32
  }
  func.func @transform_4(%arg0: i32, %arg1: i32) -> (i32, i32) {
    %c0_i32 = arith.constant 0 : i32
    %c0_i32_0 = arith.constant 0 : i32
    %c0_i32_1 = arith.constant 0 : i32
    return %c0_i32, %c0_i32_0 : i32, i32
  }
  func.func @transform_5(%arg0: i32, %arg1: i32) -> (i32, i32) {
    %c0_i32 = arith.constant 0 : i32
    %c0_i32_0 = arith.constant 0 : i32
    %c0_i32_1 = arith.constant 0 : i32
    return %c0_i32, %c0_i32_0 : i32, i32
  }
  func.func @transform_6(%arg0: i32, %arg1: i32) -> (i32, i32) {
    %c0_i32 = arith.constant 0 : i32
    %c0_i32_0 = arith.constant 0 : i32
    %c0_i32_1 = arith.constant 0 : i32
    return %c0_i32, %c0_i32_0 : i32, i32
  }
  func.func @transform_7(%arg0: i32, %arg1: i32) -> (i32, i32) {
    %c0_i32 = arith.constant 0 : i32
    %c0_i32_0 = arith.constant 0 : i32
    return %arg0, %c0_i32 : i32, i32
  }
}

module attributes {stable_mosaic.version = 11 : i64} {
  func.func @_linear_kernel(%arg0: i32, %arg1: memref<8x32xf32, #tpu.memory_space<vmem>>, %arg2: memref<32x16xbf16, #tpu.memory_space<vmem>>, %arg3: memref<1x16xf32, #tpu.memory_space<vmem>>, %arg4: memref<8x16xf32, #tpu.memory_space<vmem>>) attributes {dimension_semantics = [#tpu.dimension_semantics<parallel>], iteration_bounds = array<i64: 1>, scalar_prefetch = 0 : i64, scratch_operands = 0 : i64, tpu.core_type = #tpu.core_type<tc>, window_params = [{transform_indices = @transform_0, window_bounds = array<i64: 8, 32>}, {pipeline_mode = #tpu.pipeline_mode<synchronous>, transform_indices = @transform_1, window_bounds = array<i64: 32, 16>}, {pipeline_mode = #tpu.pipeline_mode<synchronous>, transform_indices = @transform_2, window_bounds = array<i64: 1, 16>}, {transform_indices = @transform_3, window_bounds = array<i64: 8, 16>}]} {
    %c0 = arith.constant 0 : index
    %c0_0 = arith.constant 0 : index
    %0 = vector.load %arg1[%c0, %c0_0] : memref<8x32xf32, #tpu.memory_space<vmem>>, vector<8x32xf32>
    %1 = arith.truncf %0 : vector<8x32xf32> to vector<8x32xbf16>
    %c0_1 = arith.constant 0 : index
    %c0_2 = arith.constant 0 : index
    %2 = vector.load %arg2[%c0_1, %c0_2] : memref<32x16xbf16, #tpu.memory_space<vmem>>, vector<32x16xbf16>
    %cst = arith.constant dense<0.000000e+00> : vector<8x16xf32>
    %3 = tpu.matmul %1, %2, %cst {dimension_numbers = #tpu.dot_dimension_numbers<[1], [0], [0], [1], [0, 0, 1, 1], [], []>} : vector<8x32xbf16>, vector<32x16xbf16>, vector<8x16xf32> -> vector<8x16xf32>
    %c0_3 = arith.constant 0 : index
    %c0_4 = arith.constant 0 : index
    %4 = vector.load %arg3[%c0_3, %c0_4] : memref<1x16xf32, #tpu.memory_space<vmem>>, vector<1x16xf32>
    %5 = vector.broadcast %4 : vector<1x16xf32> to vector<8x16xf32>
    %6 = arith.addf %3, %5 : vector<8x16xf32>
    %c0_5 = arith.constant 0 : index
    %c0_6 = arith.constant 0 : index
    %7 = vector.load %arg4[%c0_5, %c0_6] : memref<8x16xf32, #tpu.memory_space<vmem>>, vector<8x16xf32>
    tpu.vector_store %arg4[%c0_5, %c0_6], %6 {strides = array<i32>} : memref<8x16xf32, #tpu.memory_space<vmem>>, vector<8x16xf32>,
    return
  }
  func.func @transform_0(%arg0: i32) -> (i32, i32) {
    %c0_i32 = arith.constant 0 : i32
    %c0_i32_0 = arith.constant 0 : i32
    return %arg0, %c0_i32 : i32, i32
  }
  func.func @transform_1(%arg0: i32) -> (i32, i32) {
    %c0_i32 = arith.constant 0 : i32
    %c0_i32_0 = arith.constant 0 : i32
    %c0_i32_1 = arith.constant 0 : i32
    return %c0_i32, %c0_i32_0 : i32, i32
  }
  func.func @transform_2(%arg0: i32) -> (i32, i32) {
    %c0_i32 = arith.constant 0 : i32
    %c0_i32_0 = arith.constant 0 : i32
    %c0_i32_1 = arith.constant 0 : i32
    return %c0_i32, %c0_i32_0 : i32, i32
  }
  func.func @transform_3(%arg0: i32) -> (i32, i32) {
    %c0_i32 = arith.constant 0 : i32
    %c0_i32_0 = arith.constant 0 : i32
    return %arg0, %c0_i32 : i32, i32
  }
}

</mosaic_0001>

<bundles_post_ra>
// kernel: transformer_autoencoder_forward.12
= control target key start
LH: loop header
LB: loop body
LE: loop exit
PB: predicated region body
PF: predicated region fallthrough
CT: control target
= control target key end

     0   :  { %vm29_vm0 = vcmask 130048   ;;  %vm46_vm1 = vcmask 261120   ;;  %s91_s1 = inlined_call_operand.vmem [shape: bf16[16,32], index: 1, kind: input, shape index: {}]   ;;  %s92_s0 = inlined_call_operand.vmem [shape: f32[8,16], index: 0, kind: input, shape index: {}]   ;;  %s93_s2 = inlined_call_operand.vmem [shape: f32[1,32], index: 2, kind: input, shape index: {}]   ;;  %s94_s3 = inlined_call_operand.vmem [shape: f32[8,32], index: 3, kind: output, shape index: {}]  }
   0x1   :  { %v57_v0 = vld [vmem:[%s91_s1] sm:$0xff] }
   0x2   :  { %v15_v1 = vld [vmem:[%s92_s0] sm:$0xff]  ;;  %40 = vmatpush.bf16.msra.mxu0 %v57_v0 }
   0x3   :  { %v16_v2 = vpack.c.bf16 %v15_v1, %v15_v1  ;;  %v58_v3 = vld [vmem:[%s93_s2] ss:$0 sm:$0xff] }
   0x5   :  { %56 = vmatmul.msk.bf16.vlgmr.msra.gmra.mxu0 %vm29_vm0, %v16_v2 }
  0x82   :  { %v42_v4 = vpop.f32.mrf.mxu0 }
  0x83   :  { %v43_v5 = vadd.f32 %v58_v3, %v42_v4 }
  0x85   :  { %47 = vst.msk [vmem:[%s94_s3] sm:$0xff] %vm46_vm1, %v43_v5 }
  0x8a   :  { %v44_v6 = vpop.f32.mrf.mxu0 }

// kernel: transformer_autoencoder_forward.14
= control target key start
LH: loop header
LB: loop body
LE: loop exit
PB: predicated region body
PF: predicated region fallthrough
CT: control target
= control target key end

     0   :  { %s1976_s24 = smov 0   ;;  %s1978_s25 = smov 0   ;;  %s2217_s0 = inlined_call_operand.vmem [shape: f32[8,32], index: 0, kind: input, shape index: {}]   ;;  %s2218_s1 = inlined_call_operand.vmem [shape: bf16[32,2048], index: 1, kind: input, shape index: {}]   ;;  %s2219_s2 = inlined_call_operand.vmem [shape: f32[1,2048], index: 2, kind: input, shape index: {}]   ;;  %s2220_s3 = inlined_call_operand.vmem [shape: bf16[2048,32], index: 3, kind: input, shape index: {}]   ;;  %s2221_s4 = inlined_call_operand.vmem [shape: f32[1,32], index: 4, kind: input, shape index: {}]   ;;  %s2222_s5 = inlined_call_operand.vmem [shape: f32[1,32], index: 5, kind: input, shape index: {}]   ;;  %s2223_s6 = inlined_call_operand.vmem [shape: f32[1,32], index: 6, kind: input, shape index: {}]   ;;  %s2224_s7 = inlined_call_operand.vmem [shape: f32[8,32], index: 7, kind: output, shape index: {}]  }
   0x1   :  { %s1980_s26 = smov 0   ;;  %s1982_s27 = smov 0  }
   0x2   :  { %s1984_s28 = smov 0  }
   0x3 LB: > { %s26_s29 = sadd.s32 1, %s1929_s27  ;;  %p69_p1 = scmp.ne.s32.totalorder %s1921_s25, %s1917_s24  ;;  %s1933_s28 = sphi %s1984_s28, %s17_s28   ;;  %s1929_s27 = sphi %s1982_s27, %s2229_s27   ;;  %s1925_s26 = sphi %s1980_s26, %s2228_s26   ;;  %s1921_s25 = sphi %s1978_s25, %s2227_s25   ;;  %s1917_s24 = sphi %s1976_s24, %s2226_s24  }
   0x4   : > { %p27_p0 = scmp.ge.s32.totalorder %s26_s29, 2  ;;  %p70_p2 = scmp.eq.s32.totalorder %s1933_s28, 0 }
   0x5   : > { %s62_s8 = sadd.s32 1, %s1921_s25  ;;  %p1423_p5 = scmp.ge.s32.totalorder %s1933_s28, 2 }
   0x6   : > { %s2231_s29 = smov (%p27_p0, %s26_s29), 0  ;;  %p71_p3 = por %p70_p2, %p69_p1 }
   0x7   : > { %s59_s30 = ssub.s32 %s1929_s27, %s2231_s29  ;;  %252 = sbr.rel (%p1423_p5) target bundleno = 32 (0x20), region = 32 }
   0x8   : > { %p60_p4 = scmp.eq.s32.totalorder %s59_s30, 0 }
   0xa   : > { %s2011_s9 = scalar_select %p60_p4, %s1921_s25, %s62_s8  }
   0xc   : > { %255 = sbr.rel (!%p71_p3) target bundleno = 32 (0x20), region = 36  ;;  %s257_s10 = sand.u32 (%p71_p3), 1, %s1921_s25  }
   0xd   : > { %s1766_s11 = sshll.u32 (%p71_p3), %s1929_s27, 5  ;;  %s1424_s12 = sshll.u32 (%p71_p3), %s257_s10, 7 }
   0xe   : > { %s2019_s15 = scalar_lea.vmem (%p71_p3), %s2218_s1, %s1766_s11  ;;  %s259_s16 = scalar_lea.vmem (%p71_p3), [#allocation3], %s1424_s12 }
   0xf   : > { %v275_v0 = vld [vmem:[%s2019_s15] sm:$0xff] (%p71_p3)  ;;  %v277_v1 = vld [vmem:[%s2019_s15 + $0x8] sm:$0xff] (%p71_p3)  ;;  %v279_v2 = vld [vmem:[%s2019_s15 + $0x10] sm:$0xff] (%p71_p3) }
  0x10   : > { %276 = vst [vmem:[%s259_s16] sm:$0xff] (%p71_p3), %v275_v0  ;;  %v281_v3 = vld [vmem:[%s2019_s15 + $0x18] sm:$0xff] (%p71_p3)  ;;  %v283_v4 = vld [vmem:[%s2019_s15 + $0x40] sm:$0xff] (%p71_p3)  ;;  %v285_v5 = vld [vmem:[%s2019_s15 + $0x48] sm:$0xff] (%p71_p3) }
  0x11   : > { %278 = vst [vmem:[%s259_s16 + $0x8] sm:$0xff] %v277_v1  ;;  %v287_v6 = vld [vmem:[%s2019_s15 + $0x50] sm:$0xff]  ;;  %v289_v7 = vld [vmem:[%s2019_s15 + $0x58] sm:$0xff]  ;;  %v291_v8 = vld [vmem:[%s2019_s15 + $0x80] sm:$0xff] }
  0x12   : > { %280 = vst [vmem:[%s259_s16 + $0x10] sm:$0xff] %v279_v2  ;;  %v293_v9 = vld [vmem:[%s2019_s15 + $0x88] sm:$0xff]  ;;  %v295_v10 = vld [vmem:[%s2019_s15 + $0x90] sm:$0xff]  ;;  %v297_v11 = vld [vmem:[%s2019_s15 + $0x98] sm:$0xff] }
  0x13   : > { %282 = vst [vmem:[%s259_s16 + $0x18] sm:$0xff] %v281_v3  ;;  %v299_v12 = vld [vmem:[%s2019_s15 + $0xc0] sm:$0xff]  ;;  %v301_v13 = vld [vmem:[%s2019_s15 + $0xc8] sm:$0xff]  ;;  %v303_v14 = vld [vmem:[%s2019_s15 + $0xd0] sm:$0xff] }
  0x14   : > { %284 = vst [vmem:[%s259_s16 + $0x20] sm:$0xff] %v283_v4  ;;  %v305_v15 = vld [vmem:[%s2019_s15 + $0xd8] sm:$0xff] }
  0x15   : > { %286 = vst [vmem:[%s259_s16 + $0x28] sm:$0xff] %v285_v5 }
  0x16   : > { %288 = vst [vmem:[%s259_s16 + $0x30] sm:$0xff] %v287_v6 }
  0x17   : > { %290 = vst [vmem:[%s259_s16 + $0x38] sm:$0xff] %v289_v7 }
  0x18   : > { %292 = vst [vmem:[%s259_s16 + $0x40] sm:$0xff] %v291_v8 }
  0x19   : > { %294 = vst [vmem:[%s259_s16 + $0x48] sm:$0xff] %v293_v9 }
  0x1a   : > { %296 = vst [vmem:[%s259_s16 + $0x50] sm:$0xff] %v295_v10 }
  0x1b   : > { %298 = vst [vmem:[%s259_s16 + $0x58] sm:$0xff] %v297_v11 }
  0x1c   : > { %300 = vst [vmem:[%s259_s16 + $0x60] sm:$0xff] %v299_v12 }
  0x1d   : > { %302 = vst [vmem:[%s259_s16 + $0x68] sm:$0xff] %v301_v13 }
  0x1e   : > { %304 = vst [vmem:[%s259_s16 + $0x70] sm:$0xff] %v303_v14 }
  0x1f   : > { %306 = vst [vmem:[%s259_s16 + $0x78] sm:$0xff] %v305_v15 }
  0x20 PF: > { %p1427_p6 = scmp.ge.s32.totalorder %s1933_s28, 1  ;;  %p328_p7 = scmp.lt.s32.totalorder %s1933_s28, 3 }
  0x22   : > { %p329_p8 = pnand %p1427_p6, %p328_p7 }
  0x23   : > { %s335_s17 = sand.u32 (!%p329_p8), 1, %s1917_s24   ;;  %s1430_s18 = sshll.u32 (!%p329_p8), %s1925_s26, 7 }
  0x24   : > { %332 = sbr.rel (%p329_p8) target bundleno = 641 (0x281), region = 67  ;;  %s1428_s19 = sshll.u32 (!%p329_p8), %s335_s17, 7 }
  0x25   : > { %p2043_p9 = scmp.lt.s32.totalorder (!%p329_p8), %s1430_s18, 255  ;;  %s2047_s21 = scalar_lea.vmem (!%p329_p8), [#allocation3], %s1428_s19 }
  0x26   : > { %s1429_s11 = sshll.u32 (!%p329_p8), %s1925_s26, 3  ;;  %p1760_p11 = scmp.ne.s32.totalorder (!%p329_p8), %s1925_s26, 0 }
  0x27   : > { %p384_p10 = scmp.lt.s32.totalorder (!%p329_p8), %s1429_s11, 15 }
  0x29   : > { %vm515_vm0 = vcmask 261120   ;;  %v1466_v16 = vld [vmem:[%s2047_s21 + $0x40] sm:$0xf]  ;;  %v1474_v18 = vld [vmem:[%s2047_s21 + $0x48] sm:$0xf]  ;;  %v399_v23 = vld [vmem:[%s2217_s0] sm:$0xff] }
  0x2a   : > { %v1779_v17 = vld [vmem:[%s2047_s21 + $0x5c] sm:$0xf0]  ;;  %v1780_v20 = vld [vmem:[%s2047_s21 + $0x64] sm:$0xf0]  ;;  %v1776_v21 = vld [vmem:[%s2047_s21 + $0x4c] sm:$0xf]  ;;  %v2070_v43 = vpack.c.bf16 %v399_v23, %v399_v23 }
  0x2b   : > { %v1467_v19 = vor.u32 %v1779_v17, %v1466_v16  ;;  %v1476_v22 = vld [vmem:[%s2047_s21 + $0x68] sm:$0xf0]  ;;  %v1475_v24 = vor.u32 %v1780_v20, %v1474_v18  ;;  %v1775_v26 = vld [vmem:[%s2047_s21 + $0x44] sm:$0xf]  ;;  %v1434_v28 = vld [vmem:[%s2047_s21] sm:$0xf] }
  0x2c   : > { %v1479_v25 = vor.u32 %v1776_v21, %v1476_v22  ;;  %v1468_v27 = vld [vmem:[%s2047_s21 + $0x60] sm:$0xf0]  ;;  %v1771_v30 = vld [vmem:[%s2047_s21 + $0x1c] sm:$0xf0]  ;;  %v1442_v31 = vld [vmem:[%s2047_s21 + $0x8] sm:$0xf] }
  0x2d   : > { %525 = vmatpush.bf16.msra.mxu0 %v1467_v19  ;;  %v1471_v29 = vor.u32 %v1775_v26, %v1468_v27  ;;  %v1772_v32 = vld [vmem:[%s2047_s21 + $0x24] sm:$0xf0]  ;;  %551 = vmatpush.bf16.msra.mxu2 %v1475_v24  ;;  %v1435_v33 = vor.u32 %v1771_v30, %v1434_v28  ;;  %v1768_v35 = vld [vmem:[%s2047_s21 + $0xc] sm:$0xf]  ;;  %v1767_v37 = vld [vmem:[%s2047_s21 + $0x4] sm:$0xf] }
  0x2e   : > { %564 = vmatpush.bf16.msra.mxu3 %v1479_v25  ;;  %v1443_v34 = vor.u32 %v1772_v32, %v1442_v31  ;;  %v1444_v36 = vld [vmem:[%s2047_s21 + $0x28] sm:$0xf0]  ;;  %v1436_v39 = vld [vmem:[%s2047_s21 + $0x20] sm:$0xf0]  ;;  %v1490_v40 = vld [vmem:[%s2047_s21 + $0x58] sm:$0xf] }
  0x2f   : > { %538 = vmatpush.bf16.msra.mxu1 %v1471_v29  ;;  %v1447_v38 = vor.u32 %v1768_v35, %v1444_v36  ;;  %v1782_v41 = vld [vmem:[%s2047_s21 + $0x74] sm:$0xf0]  ;;  %v1439_v42 = vor.u32 %v1767_v37, %v1436_v39  ;;  %v1778_v45 = vld [vmem:[%s2047_s21 + $0x5c] sm:$0xf]  ;;  %v1482_v52 = vld [vmem:[%s2047_s21 + $0x50] sm:$0xf] }
  0x30   : > { %v1491_v44 = vor.u32 %v1782_v41, %v1490_v40  ;;  %v1492_v46 = vld [vmem:[%s2047_s21 + $0x78] sm:$0xf0]  ;;  %v1458_v47 = vld [vmem:[%s2047_s21 + $0x18] sm:$0xf]  ;;  %v1781_v53 = vld [vmem:[%s2047_s21 + $0x6c] sm:$0xf0] }
  0x31   : > { %526 = vmatpush.bf16.msra.mxu0 %v1435_v33  ;;  %v1495_v48 = vor.u32 %v1778_v45, %v1492_v46  ;;  %v1774_v49 = vld [vmem:[%s2047_s21 + $0x34] sm:$0xf0]  ;;  %v1770_v50 = vld [vmem:[%s2047_s21 + $0x1c] sm:$0xf]  ;;  %552 = vmatpush.bf16.msra.mxu2 %v1443_v34  ;;  %v1777_v54 = vld [vmem:[%s2047_s21 + $0x54] sm:$0xf]  ;;  %v1483_v56 = vor.u32 %v1781_v53, %v1482_v52 }
  0x32   : > { %v1460_v51 = vld [vmem:[%s2047_s21 + $0x38] sm:$0xf0]  ;;  %565 = vmatpush.bf16.msra.mxu3 %v1447_v38  ;;  %v1459_v55 = vor.u32 %v1774_v49, %v1458_v47  ;;  %v1484_v57 = vld [vmem:[%s2047_s21 + $0x70] sm:$0xf0]  ;;  %v1450_v58 = vld [vmem:[%s2047_s21 + $0x10] sm:$0xf] }
  0x33   : > { %539 = vmatpush.bf16.msra.mxu1 %v1439_v42  ;;  %v1773_v59 = vld [vmem:[%s2047_s21 + $0x2c] sm:$0xf0]  ;;  %v1463_v60 = vor.u32 %v1770_v50, %v1460_v51  ;;  %v1487_v61 = vor.u32 %v1777_v54, %v1484_v57  ;;  %v1769_v62 = vld [vmem:[%s2047_s21 + $0x14] sm:$0xf]  ;;  %s2233_s18 = smov (!%p2043_p9, %s1430_s18), 255  ;;  %s2235_s11 = smov (!%p384_p10, %s1429_s11), 15 }
  0x34   : > { %1496 = vmatmul.msk.bf16.vlgmr.msra.gmra.mxu0 %vm515_vm0, %v2070_v43  ;;  %v1452_v63 = vld [vmem:[%s2047_s21 + $0x30] sm:$0xf0]  ;;  %1498 = vmatmul.msk.bf16.vlgmr.msra.gmra.mxu2 %vm515_vm0, %v2070_v43  ;;  %v1451_v0 = vor.u32 %v1773_v59, %v1450_v58  ;;  %s1431_s24 = sshll.u32 %s2233_s18, 2  ;;  %s386_s14 = scalar_lea.vmem %s2219_s2, %s2235_s11 }
  0x35   : > { %603 = vmatpush.bf16.msrb.mxu2 %v1491_v44  ;;  %1499 = vmatmul.msk.bf16.vlgmr.msra.gmra.mxu3 %vm515_vm0, %v2070_v43  ;;  %v1455_v1 = vor.u32 %v1769_v62, %v1452_v63  ;;  %s2101_s10 = scalar_lea.vmem %s2220_s3, %s1431_s24 }
  0x36   : > { %616 = vmatpush.bf16.msrb.mxu3 %v1495_v48  ;;  %1497 = vmatmul.msk.bf16.vlgmr.msra.gmra.mxu1 %vm515_vm0, %v2070_v43  ;;  %v1790_v2 = vld [vmem:[%s2101_s10 + $0x38] sm:$0xff]  ;;  %v1789_v6 = vld [vmem:[%s2101_s10 + $0x30] sm:$0xff]  ;;  %v1788_v10 = vld [vmem:[%s2101_s10 + $0x28] sm:$0xff] }
  0x37   : > { %577 = vmatpush.bf16.msrb.mxu0 %v1483_v56  ;;  %590 = vmatpush.bf16.msrb.mxu1 %v1487_v61  ;;  %v1798_v3 = vld [vmem:[%s2101_s10 + $0x78] sm:$0xff]  ;;  %v1797_v7 = vld [vmem:[%s2101_s10 + $0x70] sm:$0xff]  ;;  %v1796_v11 = vld [vmem:[%s2101_s10 + $0x68] sm:$0xff] }
  0x38   : > { %v1806_v4 = vld [vmem:[%s2101_s10 + $0xb8] sm:$0xff]  ;;  %v1805_v8 = vld [vmem:[%s2101_s10 + $0xb0] sm:$0xff]  ;;  %v1804_v12 = vld [vmem:[%s2101_s10 + $0xa8] sm:$0xff] }
  0x39   : > { %604 = vmatpush.bf16.msrb.mxu2 %v1459_v55  ;;  %v1814_v5 = vld [vmem:[%s2101_s10 + $0xf8] sm:$0xff]  ;;  %v1813_v9 = vld [vmem:[%s2101_s10 + $0xf0] sm:$0xff]  ;;  %v1787_v13 = vld [vmem:[%s2101_s10 + $0x20] sm:$0xff] }
  0x3a   : > { %617 = vmatpush.bf16.msrb.mxu3 %v1463_v60  ;;  %v1812_v14 = vld [vmem:[%s2101_s10 + $0xe8] sm:$0xff]  ;;  %v1795_v15 = vld [vmem:[%s2101_s10 + $0x60] sm:$0xff]  ;;  %v1786_v17 = vld [vmem:[%s2101_s10 + $0x18] sm:$0xff] }
  0x3b   : > { %578 = vmatpush.bf16.msrb.mxu0 %v1451_v0  ;;  %591 = vmatpush.bf16.msrb.mxu1 %v1455_v1  ;;  %v1803_v16 = vld [vmem:[%s2101_s10 + $0xa0] sm:$0xff]  ;;  %v1794_v19 = vld [vmem:[%s2101_s10 + $0x58] sm:$0xff]  ;;  %v1785_v21 = vld [vmem:[%s2101_s10 + $0x10] sm:$0xff] }
  0x3c   : > { %v1811_v18 = vld [vmem:[%s2101_s10 + $0xe0] sm:$0xff]  ;;  %v1802_v20 = vld [vmem:[%s2101_s10 + $0x98] sm:$0xff]  ;;  %v1793_v23 = vld [vmem:[%s2101_s10 + $0x50] sm:$0xff] }
  0x3d   : > { %1177 = vmatpush.bf16.msra.mxu2 %v1806_v4  ;;  %v1810_v22 = vld [vmem:[%s2101_s10 + $0xd8] sm:$0xff]  ;;  %v1801_v24 = vld [vmem:[%s2101_s10 + $0x90] sm:$0xff]  ;;  %v1784_v25 = vld [vmem:[%s2101_s10 + $0x8] sm:$0xff] }
  0x3e   : > { %1190 = vmatpush.bf16.msra.mxu3 %v1814_v5  ;;  %v1809_v26 = vld [vmem:[%s2101_s10 + $0xd0] sm:$0xff]  ;;  %v1792_v27 = vld [vmem:[%s2101_s10 + $0x48] sm:$0xff]  ;;  %v1783_v29 = vld [vmem:[%s2101_s10] sm:$0xff] }
  0x3f   : > { %1151 = vmatpush.bf16.msra.mxu0 %v1790_v2  ;;  %1164 = vmatpush.bf16.msra.mxu1 %v1798_v3  ;;  %v1800_v28 = vld [vmem:[%s2101_s10 + $0x88] sm:$0xff]  ;;  %v1822_v31 = vld [vmem:[%s2101_s10 + $0x138] sm:$0xff]  ;;  %v1791_v32 = vld [vmem:[%s2101_s10 + $0x40] sm:$0xff] }
  0x40   : > { %v1808_v30 = vld [vmem:[%s2101_s10 + $0xc8] sm:$0xff]  ;;  %v1830_v33 = vld [vmem:[%s2101_s10 + $0x178] sm:$0xff]  ;;  %v1799_v34 = vld [vmem:[%s2101_s10 + $0x80] sm:$0xff] }
  0x41   : > { %1178 = vmatpush.bf16.msra.mxu2 %v1805_v8  ;;  %v1807_v35 = vld [vmem:[%s2101_s10 + $0xc0] sm:$0xff]  ;;  %v1838_v36 = vld [vmem:[%s2101_s10 + $0x1b8] sm:$0xff]  ;;  %v1821_v37 = vld [vmem:[%s2101_s10 + $0x130] sm:$0xff] }
  0x42   : > { %1191 = vmatpush.bf16.msra.mxu3 %v1813_v9  ;;  %v1846_v38 = vld [vmem:[%s2101_s10 + $0x1f8] sm:$0xff]  ;;  %v1829_v39 = vld [vmem:[%s2101_s10 + $0x170] sm:$0xff]  ;;  %v1820_v40 = vld [vmem:[%s2101_s10 + $0x128] sm:$0xff] }
  0x43   : > { %1152 = vmatpush.bf16.msra.mxu0 %v1789_v6  ;;  %1165 = vmatpush.bf16.msra.mxu1 %v1797_v7  ;;  %v1828_v41 = vld [vmem:[%s2101_s10 + $0x168] sm:$0xff]  ;;  %v1837_v42 = vld [vmem:[%s2101_s10 + $0x1b0] sm:$0xff]  ;;  %v1819_v44 = vld [vmem:[%s2101_s10 + $0x120] sm:$0xff] }
  0x44   : > { %1500 = vmatmul.msk.bf16.vlgmr.msrb.gmra.mxu0 %vm515_vm0, %v2070_v43  ;;  %1502 = vmatmul.msk.bf16.vlgmr.msrb.gmra.mxu2 %vm515_vm0, %v2070_v43  ;;  %v1827_v45 = vld [vmem:[%s2101_s10 + $0x160] sm:$0xff]  ;;  %v1836_v46 = vld [vmem:[%s2101_s10 + $0x1a8] sm:$0xff]  ;;  %v1818_v48 = vld [vmem:[%s2101_s10 + $0x118] sm:$0xff] }
  0x45   : > { %1503 = vmatmul.msk.bf16.vlgmr.msrb.gmra.mxu3 %vm515_vm0, %v2070_v43  ;;  %1179 = vmatpush.bf16.msra.mxu2 %v1804_v12  ;;  %v1844_v47 = vld [vmem:[%s2101_s10 + $0x1e8] sm:$0xff]  ;;  %v1826_v49 = vld [vmem:[%s2101_s10 + $0x158] sm:$0xff]  ;;  %v1835_v50 = vld [vmem:[%s2101_s10 + $0x1a0] sm:$0xff] }
  0x46   : > { %1501 = vmatmul.msk.bf16.vlgmr.msrb.gmra.mxu1 %vm515_vm0, %v2070_v43  ;;  %1192 = vmatpush.bf16.msra.mxu3 %v1812_v14  ;;  %v1845_v43 = vld [vmem:[%s2101_s10 + $0x1f0] sm:$0xff]  ;;  %v1843_v51 = vld [vmem:[%s2101_s10 + $0x1e0] sm:$0xff]  ;;  %v1834_v54 = vld [vmem:[%s2101_s10 + $0x198] sm:$0xff] }
  0x47   : > { %1153 = vmatpush.bf16.msra.mxu0 %v1788_v10  ;;  %1166 = vmatpush.bf16.msra.mxu1 %v1796_v11  ;;  %v1817_v52 = vld [vmem:[%s2101_s10 + $0x110] sm:$0xff]  ;;  %v1842_v55 = vld [vmem:[%s2101_s10 + $0x1d8] sm:$0xff]  ;;  %v1816_v56 = vld [vmem:[%s2101_s10 + $0x108] sm:$0xff] }
  0x48   : > { %v1825_v53 = vld [vmem:[%s2101_s10 + $0x150] sm:$0xff]  ;;  %v1824_v57 = vld [vmem:[%s2101_s10 + $0x148] sm:$0xff]  ;;  %v1815_v60 = vld [vmem:[%s2101_s10 + $0x100] sm:$0xff] }
  0x49   : > { %1180 = vmatpush.bf16.msra.mxu2 %v1803_v16  ;;  %v1833_v58 = vld [vmem:[%s2101_s10 + $0x190] sm:$0xff]  ;;  %v1823_v61 = vld [vmem:[%s2101_s10 + $0x140] sm:$0xff]  ;;  %v1832_v62 = vld [vmem:[%s2101_s10 + $0x188] sm:$0xff] }
  0x4a   : > { %1193 = vmatpush.bf16.msra.mxu3 %v1811_v18  ;;  %v1841_v59 = vld [vmem:[%s2101_s10 + $0x1d0] sm:$0xff]  ;;  %v1840_v63 = vld [vmem:[%s2101_s10 + $0x1c8] sm:$0xff]  ;;  %v1831_v0 = vld [vmem:[%s2101_s10 + $0x180] sm:$0xff] }
  0x4b   : > { %1154 = vmatpush.bf16.msra.mxu0 %v1787_v13  ;;  %1167 = vmatpush.bf16.msra.mxu1 %v1795_v15  ;;  %v1839_v1 = vld [vmem:[%s2101_s10 + $0x1c0] sm:$0xff] }
  0x4c   : > { %v417_v2 = vld [vmem:[%s386_s14] sm:$0xff] }
  0x4d   : > { %1181 = vmatpush.bf16.msra.mxu2 %v1802_v20  ;;  %v419_v3 = vperm.slane %v417_v2, 0  ;;  %v420_v4 = vperm.slane %v417_v2, 1  ;;  %v421_v10 = vperm.slane %v417_v2, 2  ;;  %v422_v11 = vperm.slane %v417_v2, 3 }
  0x4e   : > { %1194 = vmatpush.bf16.msra.mxu3 %v1810_v22 }
  0x4f   : > { %1155 = vmatpush.bf16.msra.mxu0 %v1786_v17  ;;  %1168 = vmatpush.bf16.msra.mxu1 %v1794_v19 }
  0x51   : > { %1182 = vmatpush.bf16.msra.mxu2 %v1801_v24 }
  0x52   : > { %1195 = vmatpush.bf16.msra.mxu3 %v1809_v26 }
  0x53   : > { %1156 = vmatpush.bf16.msra.mxu0 %v1785_v21  ;;  %1169 = vmatpush.bf16.msra.mxu1 %v1793_v23 }
  0x55   : > { %1183 = vmatpush.bf16.msra.mxu2 %v1800_v28  ;;  %v424_v28 = vperm.slane %v417_v2, 5 }
  0x56   : > { %1196 = vmatpush.bf16.msra.mxu3 %v1808_v30 }
  0x57   : > { %1157 = vmatpush.bf16.msra.mxu0 %v1784_v25  ;;  %1170 = vmatpush.bf16.msra.mxu1 %v1792_v27  ;;  %v423_v25 = vperm.slane %v417_v2, 4 }
  0x59   : > { %1184 = vmatpush.bf16.msra.mxu2 %v1799_v34  ;;  %v425_v34 = vperm.slane %v417_v2, 6 }
  0x5a   : > { %1197 = vmatpush.bf16.msra.mxu3 %v1807_v35  ;;  %v426_v35 = vperm.slane %v417_v2, 7 }
  0x5b   : > { %1158 = vmatpush.bf16.msra.mxu0 %v1783_v29  ;;  %1171 = vmatpush.bf16.msra.mxu1 %v1791_v32 }
  0x5d   : > { %1229 = vmatpush.bf16.msrb.mxu2 %v1838_v36 }
  0x5e   : > { %1242 = vmatpush.bf16.msrb.mxu3 %v1846_v38 }
  0x5f   : > { %1203 = vmatpush.bf16.msrb.mxu0 %v1822_v31  ;;  %1216 = vmatpush.bf16.msrb.mxu1 %v1830_v33 }
  0x61   : > { %1230 = vmatpush.bf16.msrb.mxu2 %v1837_v42 }
  0x62   : > { %1243 = vmatpush.bf16.msrb.mxu3 %v1845_v43 }
  0x63   : > { %1204 = vmatpush.bf16.msrb.mxu0 %v1821_v37  ;;  %1217 = vmatpush.bf16.msrb.mxu1 %v1829_v39 }
  0x65   : > { %1231 = vmatpush.bf16.msrb.mxu2 %v1836_v46 }
  0x66   : > { %1244 = vmatpush.bf16.msrb.mxu3 %v1844_v47 }
  0x67   : > { %1205 = vmatpush.bf16.msrb.mxu0 %v1820_v40  ;;  %1218 = vmatpush.bf16.msrb.mxu1 %v1828_v41 }
  0x69   : > { %1232 = vmatpush.bf16.msrb.mxu2 %v1835_v50 }
  0x6a   : > { %1245 = vmatpush.bf16.msrb.mxu3 %v1843_v51 }
  0x6b   : > { %1206 = vmatpush.bf16.msrb.mxu0 %v1819_v44  ;;  %1219 = vmatpush.bf16.msrb.mxu1 %v1827_v45 }
  0x6d   : > { %1233 = vmatpush.bf16.msrb.mxu2 %v1834_v54 }
  0x6e   : > { %1246 = vmatpush.bf16.msrb.mxu3 %v1842_v55 }
  0x6f   : > { %1207 = vmatpush.bf16.msrb.mxu0 %v1818_v48  ;;  %1220 = vmatpush.bf16.msrb.mxu1 %v1826_v49 }
  0x71   : > { %1234 = vmatpush.bf16.msrb.mxu2 %v1833_v58 }
  0x72   : > { %1247 = vmatpush.bf16.msrb.mxu3 %v1841_v59 }
  0x73   : > { %1208 = vmatpush.bf16.msrb.mxu0 %v1817_v52  ;;  %1221 = vmatpush.bf16.msrb.mxu1 %v1825_v53 }
  0x75   : > { %1235 = vmatpush.bf16.msrb.mxu2 %v1832_v62 }
  0x76   : > { %1248 = vmatpush.bf16.msrb.mxu3 %v1840_v63 }
  0x77   : > { %1209 = vmatpush.bf16.msrb.mxu0 %v1816_v56  ;;  %1222 = vmatpush.bf16.msrb.mxu1 %v1824_v57 }
  0x79   : > { %1236 = vmatpush.bf16.msrb.mxu2 %v1831_v0 }
  0x7a   : > { %1249 = vmatpush.bf16.msrb.mxu3 %v1839_v1 }
  0x7b   : > { %1210 = vmatpush.bf16.msrb.mxu0 %v1815_v60  ;;  %1223 = vmatpush.bf16.msrb.mxu1 %v1823_v61 }
  0xb1   : > { %v528_v5 = vpop.f32.mrf.mxu0 }
  0xb2   : > { %v529_v6 = vadd.f32 %v528_v5, %v419_v3 }
  0xb3   : > { %v541_v7 = vpop.f32.mrf.mxu1 }
  0xb4   : > { %v623_v8 = vmax.f32 %v529_v6, 0.0  ;;  %v542_v9 = vadd.f32 %v541_v7, %v420_v4 }
  0xb6   : > { %v631_v12 = vpack.c.bf16 %v623_v8, %v623_v8  ;;  %v624_v13 = vmax.f32 %v542_v9, 0.0 }
  0xb7   : > { %v554_v15 = vpop.f32.mrf.mxu2 }
  0xb8   : > { %v632_v14 = vpack.c.bf16 %v624_v13, %v624_v13  ;;  %v567_v16 = vpop.f32.mrf.mxu3  ;;  %1159 = vmatmul.bf16.vlgmr.msra.gmra.mxu0 %v631_v12  ;;  %v555_v17 = vadd.f32 %v554_v15, %v421_v10 }
  0xb9   : > { %v568_v18 = vadd.f32 %v567_v16, %v422_v11  ;;  %v530_v19 = vpop.f32.mrf.mxu0 }
  0xba   : > { %1172 = vmatmul.bf16.vlgmr.msra.gmra.mxu1 %v632_v14  ;;  %v625_v20 = vmax.f32 %v555_v17, 0.0 }
  0xbb   : > { %v626_v21 = vmax.f32 %v568_v18, 0.0  ;;  %v543_v22 = vpop.f32.mrf.mxu1 }
  0xbc   : > { %v633_v23 = vpack.c.bf16 %v625_v20, %v625_v20 }
  0xbd   : > { %v634_v24 = vpack.c.bf16 %v626_v21, %v626_v21 }
  0xbe   : > { %1185 = vmatmul.bf16.vlgmr.msra.gmra.mxu2 %v633_v23 }
  0xbf   : > { %1198 = vmatmul.bf16.vlgmr.msra.gmra.mxu3 %v634_v24  ;;  %v556_v26 = vpop.f32.mrf.mxu2 }
  0xc0   : > { %v569_v27 = vpop.f32.mrf.mxu3 }
  0xc1   : > { %v580_v29 = vpop.f32.mrf.mxu0 }
  0xc2   : > { %v581_v30 = vadd.f32 %v580_v29, %v423_v25 }
  0xc3   : > { %v593_v31 = vpop.f32.mrf.mxu1 }
  0xc4   : > { %v627_v32 = vmax.f32 %v581_v30, 0.0  ;;  %v594_v33 = vadd.f32 %v593_v31, %v424_v28 }
  0xc6   : > { %v635_v36 = vpack.c.bf16 %v627_v32, %v627_v32  ;;  %v628_v37 = vmax.f32 %v594_v33, 0.0 }
  0xc7   : > { %v606_v39 = vpop.f32.mrf.mxu2 }
  0xc8   : > { %v636_v38 = vpack.c.bf16 %v628_v37, %v628_v37  ;;  %v619_v40 = vpop.f32.mrf.mxu3  ;;  %1211 = vmatmul.bf16.vlgmr.msrb.gmra.mxu0 %v635_v36  ;;  %v607_v41 = vadd.f32 %v606_v39, %v425_v34 }
  0xc9   : > { %v620_v42 = vadd.f32 %v619_v40, %v426_v35  ;;  %v582_v43 = vpop.f32.mrf.mxu0 }
  0xca   : > { %1224 = vmatmul.bf16.vlgmr.msrb.gmra.mxu1 %v636_v38  ;;  %v629_v44 = vmax.f32 %v607_v41, 0.0 }
  0xcb   : > { %v630_v45 = vmax.f32 %v620_v42, 0.0  ;;  %v595_v46 = vpop.f32.mrf.mxu1 }
  0xcc   : > { %v637_v47 = vpack.c.bf16 %v629_v44, %v629_v44 }
  0xcd   : > { %v638_v48 = vpack.c.bf16 %v630_v45, %v630_v45 }
  0xce   : > { %1237 = vmatmul.bf16.vlgmr.msrb.gmra.mxu2 %v637_v47 }
  0xcf   : > { %1250 = vmatmul.bf16.vlgmr.msrb.gmra.mxu3 %v638_v48  ;;  %v608_v49 = vpop.f32.mrf.mxu2 }
  0xd0   : > { %v621_v50 = vpop.f32.mrf.mxu3 }
 0x135   : > { %v1160_v51 = vpop.f32.mrf.mxu0 }
 0x137   : > { %v1173_v52 = vpop.f32.mrf.mxu1 }
 0x138   : > { %v1174_v55 = vadd.f32 %v1173_v52, %v1160_v51 }
 0x13d   : > { %v1162_v53 = vpop.f32.mrf.mxu0 }
 0x13f   : > { %v1175_v54 = vpop.f32.mrf.mxu1 }
 0x141   : > { %v1186_v56 = vpop.f32.mrf.mxu2 }
 0x142   : > { %v1199_v57 = vpop.f32.mrf.mxu3  ;;  %v1187_v58 = vadd.f32 %v1186_v56, %v1174_v55 }
 0x144   : > { %v1200_v61 = vadd.f32 %v1199_v57, %v1187_v58 }
 0x145   : > { %v1212_v59 = vpop.f32.mrf.mxu0 }
 0x146   : > { %v1213_v0 = vadd.f32 %v1212_v59, %v1200_v61 }
 0x147   : > { %v1225_v60 = vpop.f32.mrf.mxu1 }
 0x148   : > { %v1226_v3 = vadd.f32 %v1225_v60, %v1213_v0 }
 0x149   : > { %v1188_v62 = vpop.f32.mrf.mxu2 }
 0x14a   : > { %v1201_v63 = vpop.f32.mrf.mxu3 }
 0x14d   : > { %v1214_v1 = vpop.f32.mrf.mxu0 }
 0x14f   : > { %v1227_v2 = vpop.f32.mrf.mxu1 }
 0x151   : > { %v1238_v4 = vpop.f32.mrf.mxu2 }
 0x152   : > { %v1251_v5 = vpop.f32.mrf.mxu3  ;;  %v1239_v6 = vadd.f32 %v1238_v4, %v1226_v3 }
 0x154   : > { %v1252_v7 = vadd.f32 %v1251_v5, %v1239_v6 }
 0x156   : > { %1258 = sbr.rel (%p1760_p11) target bundleno = 348 (0x15c), region = 75 }
 0x159   : > { %v1240_v8 = vpop.f32.mrf.mxu2 }
 0x15a   : > { %v1253_v9 = vpop.f32.mrf.mxu3 }
 0x15b   : > { %1259 = vst.msk [vmem:[#allocation2] sm:$0xff] %vm515_vm0, %v1252_v7 }
 0x15c PF: > { %p1761_p12 = scmp.le.s32.totalorder %s1925_s26, 0 }
 0x15e   : > { %1263 = sbr.rel (%p1761_p12) target bundleno = 359 (0x167), region = 79 }
 0x163   : > { %v1264_v10 = vld [vmem:[#allocation2] sm:$0xff] }
 0x164   : > { %v1265_v11 = vadd.f32 %v1264_v10, %v1252_v7 }
 0x166   : > { %1266 = vst.msk [vmem:[#allocation2] sm:$0xff] %vm515_vm0, %v1265_v11 }
 0x167 PF: > { %p1762_p13 = scmp.ne.s32.totalorder %s1925_s26, 1 }
 0x169   : > { %1270 = sbr.rel (%p1762_p13) target bundleno = 641 (0x281), region = 83 }
 0x16e   : > { %v1271_v12 = vld [vmem:[#allocation2] sm:$0xff]  ;;  %v1935_v18 = vmov 32.0  }
 0x16f   : > { %v1888_v13 = vld [vmem:[%s2221_s4] ss:$0 sm:$0xff]  ;;  %1891 = vrcp.f32 %v1935_v18 }
 0x170   : > { %v1277_v14 = vld [vmem:[%s2217_s0] sm:$0xff]  ;;  %v1276_v15 = vadd.f32 %v1888_v13, %v1271_v12 }
 0x171   : > { %v1889_v39 = vld [vmem:[%s2222_s5] ss:$0 sm:$0xff] }
 0x172   : > { %v1278_v16 = vadd.f32 %v1277_v14, %v1276_v15  ;;  %v1890_v41 = vld [vmem:[%s2223_s6] ss:$0 sm:$0xff] }
 0x174   : > { %v1279_v17 = vsel %vm515_vm0, %v1278_v16, 0.0 }
 0x175   : > { %1280 = vadd.xlane.f32.xlu0 %v1279_v17  ;;  %v1892_v19 = vpop.eup %1891 }
 0x176   : > { %v1283_v20 = vmul.f32 32.0, %v1892_v19  ;;  %vm1287_vm1 = vweird.f32 %v1892_v19 }
 0x178   : > { %v1284_v21 = vsub.f32 1.0, %v1283_v20 }
 0x17a   : > { %v1285_v22 = vmul.f32 %v1892_v19, %v1284_v21 }
 0x17c   : > { %v1286_v23 = vadd.f32 %v1892_v19, %v1285_v22 }
 0x17e   : > { %v1288_v24 = vsel %vm1287_vm1, %v1892_v19, %v1286_v23 }
 0x1e8   : > { %v1281_v25 = vpop.xlane.xlu0 %1280 }
 0x1e9   : > { %v1289_v26 = vmul.f32 %v1288_v24, %v1281_v25 }
 0x1eb   : > { %v1290_v27 = vsub.f32 %v1278_v16, %v1289_v26 }
 0x1ed   : > { %v1291_v28 = vmul.f32 %v1290_v27, %v1290_v27 }
 0x1ef   : > { %v1292_v29 = vsel %vm515_vm0, %v1291_v28, 0.0 }
 0x1f0   : > { %1293 = vadd.xlane.f32.xlu0 %v1292_v29 }
 0x263   : > { %v1294_v30 = vpop.xlane.xlu0 %1293 }
 0x264   : > { %v1295_v31 = vmul.f32 %v1294_v30, %v1288_v24 }
 0x266   : > { %v1296_v32 = vadd.f32 1e-05, %v1295_v31 }
 0x268   : > { %1893 = vrsqrt.f32 %v1296_v32  ;;  %vm1303_vm3 = vweird.f32 %v1296_v32 }
 0x26e   : > { %v1894_v33 = vpop.eup %1893 }
 0x26f   : > { %v1298_v34 = vmul.f32 %v1894_v33, %v1296_v32  ;;  %vm1304_vm2 = vweird.f32 %v1894_v33 }
 0x270   : > { %vm1305_vm4 = vmor %vm1303_vm3, %vm1304_vm2 }
 0x271   : > { %v1299_v35 = vmul.f32 %v1894_v33, %v1298_v34 }
 0x273   : > { %v1300_v36 = vmul.f32 0.5, %v1299_v35 }
 0x275   : > { %v1301_v37 = vsub.f32 1.5, %v1300_v36 }
 0x277   : > { %v1302_v38 = vmul.f32 %v1894_v33, %v1301_v37 }
 0x279   : > { %v1306_v40 = vsel %vm1305_vm4, %v1894_v33, %v1302_v38 }
 0x27a   : > { %v1307_v42 = vmul.f32 %v1306_v40, %v1290_v27 }
 0x27c   : > { %v1312_v43 = vmul.f32 %v1889_v39, %v1307_v42 }
 0x27e   : > { %v1317_v44 = vadd.f32 %v1890_v41, %v1312_v43 }
 0x280   : > { %1318 = vst.msk [vmem:[%s2224_s7] sm:$0xff] %vm515_vm0, %v1317_v44 }
 0x281 PF: > { %s17_s28 = sadd.s32 1, %s1933_s28   ;;  %s2226_s24 = smov %s1921_s25 }
 0x282   : > { %p14_p0 = scmp.ge.s32.totalorder %s17_s28, 4   ;;  %s2227_s25 = smov %s2011_s9 }
 0x283   : > { %s2228_s26 = smov %s1929_s27  ;;  %s2229_s27 = smov %s2231_s29 }
 0x284   :  { %16 = sbr.rel (!%p14_p0) target bundleno = 3 (0x3), region = 127 }

// kernel: transformer_autoencoder_forward.13
= control target key start
LH: loop header
LB: loop body
LE: loop exit
PB: predicated region body
PF: predicated region fallthrough
CT: control target
= control target key end

     0   :  { %vm66_vm0 = vcmask 261120   ;;  %vm156_vm1 = vcmask 64512   ;;  %s1354_s20 = smov 120   ;;  %vm193_vm2 = vcmask 1040384   ;;  %vm176_vm3 = vcmask 9216   ;;  %s1357_s22 = smov 8   ;;  %s1830_s2 = inlined_call_operand.vmem [shape: bf16[32,32], index: 2, kind: input, shape index: {}]   ;;  %s1831_s3 = inlined_call_operand.vmem [shape: bf16[32,32], index: 3, kind: input, shape index: {}]   ;;  %s1832_s0 = inlined_call_operand.vmem [shape: f32[8,32], index: 0, kind: input, shape index: {}, may-alias: {0,1}]   ;;  %s1833_s1 = inlined_call_operand.vmem [shape: f32[8,32], index: 1, kind: input, shape index: {}, may-alias: {0,1}]   ;;  %s1834_s4 = inlined_call_operand.vmem [shape: bf16[32,32], index: 4, kind: input, shape index: {}]   ;;  %s1835_s6 = inlined_call_operand.vmem [shape: f32[1,32], index: 6, kind: input, shape index: {}]   ;;  %s1836_s7 = inlined_call_operand.vmem [shape: f32[1,32], index: 7, kind: input, shape index: {}]   ;;  %s1837_s8 = inlined_call_operand.vmem [shape: f32[1,32], index: 8, kind: input, shape index: {}]   ;;  %s1838_s9 = inlined_call_operand.vmem [shape: f32[1,32], index: 9, kind: input, shape index: {}]   ;;  %s1839_s5 = inlined_call_operand.vmem [shape: bf16[32,32], index: 5, kind: input, shape index: {}]   ;;  %s1840_s10 = inlined_call_operand.vmem [shape: f32[1,32], index: 10, kind: input, shape index: {}]   ;;  %s1841_s11 = inlined_call_operand.vmem [shape: f32[1,32], index: 11, kind: input, shape index: {}]   ;;  %s1842_s12 = inlined_call_operand.vmem [shape: f32[8,32], index: 12, kind: output, shape index: {}]  }
   0x1   :  { %v1264_v0 = vld [vmem:[%s1830_s2 + $0x8] sm:$0xff]  ;;  %v1263_v2 = vld [vmem:[%s1830_s2] sm:$0xff]  ;;  %vm189_vm4 = vcmask 15360   ;;  %vm210_vm5 = vcmask 58368   ;;  %s1358_s23 = smov 24   ;;  %vm275_vm6 = vcmask 123968  }
   0x2   :  { %v1266_v1 = vld [vmem:[%s1831_s3 + $0x8] sm:$0xff]  ;;  %v1265_v3 = vld [vmem:[%s1831_s3] sm:$0xff]  ;;  %76 = vmatpush.bf16.msra.mxu0 %v1264_v0  ;;  %vm337_vm7 = vcmask 189568   ;;  %vm399_vm8 = vcmask 255168  }
   0x3   :  { %v42_v4 = vld [vmem:[%s1832_s0] sm:$0xff]  ;;  %113 = vmatpush.bf16.msra.mxu1 %v1266_v1  ;;  %v1268_v6 = vld [vmem:[%s1834_s4 + $0x8] sm:$0xff] }
   0x4   :  { %v44_v5 = vld [vmem:[%s1833_s1] sm:$0xff]  ;;  %146 = vmatpush.bf16.msra.mxu2 %v1268_v6  ;;  %v43_v8 = vpack.c.bf16 %v42_v4, %v42_v4 }
   0x5   :  { %v1267_v7 = vld [vmem:[%s1834_s4] sm:$0xff]  ;;  %v45_v9 = vpack.c.bf16 %v44_v5, %v44_v5  ;;  %s1353_s4 = smov 112  }
   0x6   :  { %77 = vmatpush.bf16.msra.mxu0 %v1263_v2  ;;  %v1278_v10 = vld [vmem:[%s1835_s6] ss:$0 sm:$0xff]  ;;  %s1355_s6 = smov 104  }
   0x7   :  { %114 = vmatpush.bf16.msra.mxu1 %v1265_v3  ;;  %v1279_v11 = vld [vmem:[%s1836_s7] ss:$0 sm:$0xff] }
   0x8   :  { %147 = vmatpush.bf16.msra.mxu2 %v1267_v7  ;;  %v1280_v30 = vld [vmem:[%s1837_s8] ss:$0 sm:$0xff]  ;;  %s1356_s8 = smov 16  }
   0x9   :  { %1203 = vmatmul.msk.bf16.vlgmr.msra.gmra.mxu0 %vm66_vm0, %v43_v8 }
   0xa   :  { %1212 = vmatmul.msk.bf16.vlgmr.msra.gmra.mxu1 %vm66_vm0, %v45_v9 }
   0xb   :  { %1221 = vmatmul.msk.bf16.vlgmr.msra.gmra.mxu2 %vm66_vm0, %v45_v9 }
  0x86   :  { %v79_v12 = vpop.f32.mrf.mxu0 }
  0x87   :  { %v116_v13 = vpop.f32.mrf.mxu1  ;;  %v80_v14 = vadd.f32 %v1278_v10, %v79_v12 }
  0x88   :  { %v117_v15 = vadd.f32 %v1279_v11, %v116_v13 }
  0x89   :  { %v83_v16 = vmul.f32 0.35355338, %v80_v14 }
  0x8a   :  { %v154_v17 = vpack.c.bf16 %v117_v15, %v117_v15 }
  0x8b   :  { %v153_v18 = vpack.c.bf16 %v83_v16, %v83_v16 }
  0x8c   :  { %279 = vrot.lane.b32.xlu1 %v154_v17, %s1353_s4  ;;  %216 = vrot.lane.b32.xlu0 %v154_v17, %s1354_s20  ;;  %v161_v19 = vsel %vm156_vm1, %v154_v17, 0  ;;  %v402_v22 = vrot.slane %v154_v17, 1  ;;  %v639_v25 = vrot.slane %v154_v17, 2  ;;  %v1488_v28 = vrot.slane %v154_v17, 3 }
  0x8d   :  { %170 = vmatpush.bf16.xpose.msra.mxu3 %v161_v19  ;;  %277 = vrot.lane.b32.xlu2 %v153_v18, %s1353_s4  ;;  %v1466_v23 = vrot.slane %v153_v18, 1  ;;  %v1477_v26 = vrot.slane %v153_v18, 2  ;;  %v1490_v29 = vrot.slane %v153_v18, 3 }
  0x8e   :  { %v81_v21 = vpop.f32.mrf.mxu0  ;;  %v149_v24 = vpop.f32.mrf.mxu2  ;;  %v407_v42 = vsel %vm156_vm1, %v402_v22, 0  ;;  %v644_v54 = vsel %vm156_vm1, %v639_v25, 0  ;;  %v881_v5 = vsel %vm156_vm1, %v1488_v28, 0 }
  0x8f   :  { %v118_v20 = vpop.f32.mrf.mxu1  ;;  %v150_v31 = vadd.f32 %v1280_v30, %v149_v24 }
  0x91   :  { %v1507_v32 = vpack.c.bf16 %v150_v31, %v150_v31 }
  0x93   :  { %v1516_v33 = vrot.slane %v1507_v32, 1  ;;  %v195_v34 = vsel %vm193_vm2, %v1507_v32, 0 }
  0x94   :  { %341 = vrot.lane.b32.xlu1 %v154_v17, %s1355_s6  ;;  %213 = vrot.lane.b32.xlu0 %v153_v18, %s1354_s20 }
  0x95   :  { %1222 = vmatmul.msk.bf16.vlgmr.msra.gmra.mxu3 %vm156_vm1, %v153_v18  ;;  %339 = vrot.lane.b32.xlu2 %v153_v18, %s1355_s6 }
  0x96   :  { %v151_v27 = vpop.f32.mrf.mxu2  ;;  %204 = vmatpush.bf16.msrb.mxu0 %v195_v34 }
  0x9c   :  { %457 = vrot.lane.b32.xlu0 %v402_v22, %s1354_s20  ;;  %455 = vrot.lane.b32.xlu1 %v1466_v23, %s1354_s20 }
  0x9d   :  { %518 = vrot.lane.b32.xlu2 %v402_v22, %s1353_s4 }
  0xa4   :  { %579 = vrot.lane.b32.xlu0 %v402_v22, %s1355_s6  ;;  %516 = vrot.lane.b32.xlu1 %v1466_v23, %s1353_s4 }
  0xa5   :  { %577 = vrot.lane.b32.xlu2 %v1466_v23, %s1355_s6 }
  0xac   :  { %694 = vrot.lane.b32.xlu0 %v639_v25, %s1354_s20  ;;  %692 = vrot.lane.b32.xlu1 %v1477_v26, %s1354_s20 }
  0xad   :  { %755 = vrot.lane.b32.xlu2 %v639_v25, %s1353_s4 }
  0xb4   :  { %816 = vrot.lane.b32.xlu0 %v639_v25, %s1355_s6  ;;  %753 = vrot.lane.b32.xlu1 %v1477_v26, %s1353_s4 }
  0xb5   :  { %814 = vrot.lane.b32.xlu2 %v1477_v26, %s1355_s6 }
  0xbc   :  { %931 = vrot.lane.b32.xlu0 %v1488_v28, %s1354_s20  ;;  %929 = vrot.lane.b32.xlu1 %v1490_v29, %s1354_s20 }
  0xbd   :  { %992 = vrot.lane.b32.xlu2 %v1488_v28, %s1353_s4 }
  0xc4   :  { %1053 = vrot.lane.b32.xlu0 %v1488_v28, %s1355_s6  ;;  %990 = vrot.lane.b32.xlu1 %v1490_v29, %s1353_s4 }
  0xc5   :  { %1051 = vrot.lane.b32.xlu2 %v1490_v29, %s1355_s6 }
  0xcc   :  { %374 = vrot.lane.b32.xlu1 %v1507_v32, %s1355_s6  ;;  %250 = vrot.lane.b32.xlu0 %v1507_v32, %s1354_s20 }
  0xcd   :  { %312 = vrot.lane.b32.xlu2 %v1507_v32, %s1353_s4 }
  0xd4   :  { %551 = vrot.lane.b32.xlu1 %v1516_v33, %s1353_s4  ;;  %490 = vrot.lane.b32.xlu0 %v1516_v33, %s1354_s20 }
  0xd5   :  { %612 = vrot.lane.b32.xlu2 %v1516_v33, %s1355_s6 }
  0xe7   :  { %v278_v35 = vpop.permute.xlu2 %277 }
  0xef   :  { %v340_v36 = vpop.permute.xlu2 %339 }
  0xf7   :  { %v519_v37 = vpop.permute.xlu2 %518 }
  0xf8   :  { %v524_v45 = vsel %vm156_vm1, %v519_v37, 0 }
  0xfe   :  { %v280_v38 = vpop.permute.xlu1 %279  ;;  %v217_v39 = vpop.permute.xlu0 %216 }
  0xff   :  { %v222_v40 = vsel %vm156_vm1, %v217_v39, 0  ;;  %v285_v41 = vsel %vm156_vm1, %v280_v38, 0  ;;  %v578_v46 = vpop.permute.xlu2 %577 }
 0x100   :  { %231 = vmatpush.bf16.xpose.msrb.mxu1 %v222_v40  ;;  %294 = vmatpush.bf16.xpose.msrb.mxu3 %v285_v41 }
 0x106   :  { %v342_v43 = vpop.permute.xlu1 %341  ;;  %v214_v44 = vpop.permute.xlu0 %213 }
 0x107   :  { %v347_v47 = vsel %vm156_vm1, %v342_v43, 0  ;;  %1224 = vmatmul.msk.bf16.vlgmr.msrb.gmra.mxu1 %vm156_vm1, %v214_v44  ;;  %1226 = vmatmul.msk.bf16.vlgmr.msrb.gmra.mxu3 %vm156_vm1, %v278_v35  ;;  %v756_v50 = vpop.permute.xlu2 %755 }
 0x108   :  { %416 = vmatpush.bf16.xpose.msra.mxu3 %v407_v42  ;;  %356 = vmatpush.bf16.xpose.msra.mxu1 %v347_v47  ;;  %v761_v62 = vsel %vm156_vm1, %v756_v50, 0 }
 0x10e   :  { %v458_v48 = vpop.permute.xlu0 %457  ;;  %v456_v51 = vpop.permute.xlu1 %455 }
 0x10f   :  { %v463_v49 = vsel %vm156_vm1, %v458_v48, 0  ;;  %v815_v57 = vpop.permute.xlu2 %814 }
 0x110   :  { %533 = vmatpush.bf16.xpose.msrb.mxu3 %v524_v45  ;;  %472 = vmatpush.bf16.xpose.msrb.mxu1 %v463_v49 }
 0x116   :  { %v580_v52 = vpop.permute.xlu0 %579  ;;  %v517_v58 = vpop.permute.xlu1 %516 }
 0x117   :  { %v585_v53 = vsel %vm156_vm1, %v580_v52, 0  ;;  %1228 = vmatmul.msk.bf16.vlgmr.msra.gmra.mxu1 %vm156_vm1, %v340_v36  ;;  %1230 = vmatmul.msk.bf16.vlgmr.msra.gmra.mxu3 %vm156_vm1, %v1466_v23  ;;  %v993_v61 = vpop.permute.xlu2 %992 }
 0x118   :  { %v172_v55 = vpop.f32.mrf.mxu3  ;;  %653 = vmatpush.bf16.xpose.msra.mxu3 %v644_v54  ;;  %594 = vmatpush.bf16.xpose.msra.mxu1 %v585_v53  ;;  %v998_v12 = vsel %vm156_vm1, %v993_v61, 0 }
 0x119   :  { %v177_v56 = vsel %vm176_vm3, %v172_v55, -inf }
 0x11a   :  { %178 = vmax.xlane.f32.xlu1 %v177_v56 }
 0x11e   :  { %v695_v60 = vpop.permute.xlu0 %694  ;;  %v693_v0 = vpop.permute.xlu1 %692 }
 0x11f   :  { %v700_v63 = vsel %vm156_vm1, %v695_v60, 0  ;;  %v1052_v1 = vpop.permute.xlu2 %1051 }
 0x120   :  { %v174_v59 = vpop.f32.mrf.mxu3 }
 0x126   :  { %v754_v2 = vpop.permute.xlu1 %753  ;;  %v817_v3 = vpop.permute.xlu0 %816 }
 0x127   :  { %1232 = vmatmul.msk.bf16.vlgmr.msrb.gmra.mxu1 %vm156_vm1, %v456_v51  ;;  %1234 = vmatmul.msk.bf16.vlgmr.msrb.gmra.mxu3 %vm156_vm1, %v517_v58  ;;  %v822_v4 = vsel %vm156_vm1, %v817_v3, 0  ;;  %v313_v6 = vpop.permute.xlu2 %312 }
 0x128   :  { %709 = vmatpush.bf16.xpose.msrb.mxu1 %v700_v63  ;;  %770 = vmatpush.bf16.xpose.msrb.mxu3 %v761_v62  ;;  %v318_v7 = vsel %vm193_vm2, %v313_v6, 0 }
 0x129   :  { %327 = vmatpush.bf16.msra.mxu0 %v318_v7 }
 0x12e   :  { %v930_v8 = vpop.permute.xlu1 %929  ;;  %v932_v9 = vpop.permute.xlu0 %931 }
 0x12f   :  { %v937_v13 = vsel %vm156_vm1, %v932_v9, 0 }
 0x136   :  { %v991_v10 = vpop.permute.xlu1 %990  ;;  %v1054_v11 = vpop.permute.xlu0 %1053 }
 0x137   :  { %1236 = vmatmul.msk.bf16.vlgmr.msra.gmra.mxu1 %vm156_vm1, %v578_v46  ;;  %1238 = vmatmul.msk.bf16.vlgmr.msra.gmra.mxu3 %vm156_vm1, %v1477_v26  ;;  %v1059_v18 = vsel %vm156_vm1, %v1054_v11, 0 }
 0x138   :  { %831 = vmatpush.bf16.xpose.msra.mxu1 %v822_v4  ;;  %890 = vmatpush.bf16.xpose.msra.mxu3 %v881_v5 }
 0x13e   :  { %v375_v14 = vpop.permute.xlu1 %374  ;;  %v251_v15 = vpop.permute.xlu0 %250 }
 0x13f   :  { %v380_v16 = vsel %vm193_vm2, %v375_v14, 0  ;;  %v256_v17 = vsel %vm193_vm2, %v251_v15, 0 }
 0x140   :  { %265 = vmatpush.bf16.msrb.mxu2 %v256_v17 }
 0x144   :  { %389 = vmatpush.bf16.msra.mxu2 %v380_v16 }
 0x146   :  { %v1566_v20 = vpop.permute.xlu1 %551  ;;  %v1626_v4 = vpop.permute.xlu0 %490 }
 0x147   :  { %1240 = vmatmul.msk.bf16.vlgmr.msrb.gmra.mxu1 %vm156_vm1, %v693_v0  ;;  %1242 = vmatmul.msk.bf16.vlgmr.msrb.gmra.mxu3 %vm156_vm1, %v754_v2 }
 0x148   :  { %946 = vmatpush.bf16.xpose.msrb.mxu1 %v937_v13  ;;  %1007 = vmatpush.bf16.xpose.msrb.mxu3 %v998_v12 }
 0x157   :  { %1244 = vmatmul.msk.bf16.vlgmr.msra.gmra.mxu1 %vm156_vm1, %v815_v57  ;;  %1246 = vmatmul.msk.bf16.vlgmr.msra.gmra.mxu3 %vm156_vm1, %v1490_v29 }
 0x158   :  { %1068 = vmatpush.bf16.xpose.msra.mxu1 %v1059_v18 }
 0x167   :  { %1248 = vmatmul.msk.bf16.vlgmr.msrb.gmra.mxu1 %vm156_vm1, %v930_v8  ;;  %1250 = vmatmul.msk.bf16.vlgmr.msrb.gmra.mxu3 %vm156_vm1, %v991_v10  ;;  %v1632_v8 = vpop.permute.xlu2 %612 }
 0x177   :  { %1252 = vmatmul.msk.bf16.vlgmr.msra.gmra.mxu1 %vm156_vm1, %v1052_v1 }
 0x184   :  { %v1564_v19 = vpop.f32.mrf.mxu1 }
 0x185   :  { %v237_v21 = vsel %vm176_vm3, %v1564_v19, -inf }
 0x186   :  { %238 = vmax.xlane.f32.xlu0 %v237_v21 }
 0x18a   :  { %v1570_v22 = vpop.f32.mrf.mxu3 }
 0x18b   :  { %v300_v23 = vsel %vm176_vm3, %v1570_v22, -inf }
 0x18c   :  { %v235_v24 = vpop.f32.mrf.mxu1  ;;  %301 = vmax.xlane.f32.xlu2 %v300_v23 }
 0x18d   :  { %v179_v25 = vpop.xlane.xlu1 %178 }
 0x18e   :  { %v180_v26 = vsub.f32 %v172_v55, %v179_v25 }
 0x190   :  { %v181_v27 = vmul.f32 1.442695, %v180_v26 }
 0x192   :  { %v298_v28 = vpop.f32.mrf.mxu3  ;;  %1284 = vpow2.f32 %v181_v27 }
 0x194   :  { %v1574_v29 = vpop.f32.mrf.mxu1 }
 0x195   :  { %v362_v30 = vsel %vm176_vm3, %v1574_v29, -inf }
 0x196   :  { %363 = vmax.xlane.f32.xlu2 %v362_v30 }
 0x198   :  { %v1578_v31 = vpop.eup %1284 }
 0x199   :  { %v183_v37 = vsel %vm176_vm3, %v1578_v31, 0.0 }
 0x19a   :  { %v1580_v34 = vpop.f32.mrf.mxu3 }
 0x19b   :  { %v422_v35 = vsel %vm176_vm3, %v1580_v34, -inf }
 0x19c   :  { %v360_v36 = vpop.f32.mrf.mxu1  ;;  %423 = vmax.xlane.f32.xlu1 %v422_v35 }
 0x19e   :  { %184 = vadd.xlane.f32.xlu2 %v183_v37 }
 0x1a2   :  { %v420_v38 = vpop.f32.mrf.mxu3 }
 0x1a4   :  { %v1586_v39 = vpop.f32.mrf.mxu1 }
 0x1a5   :  { %v478_v40 = vsel %vm176_vm3, %v1586_v39, -inf }
 0x1a6   :  { %479 = vmax.xlane.f32.xlu0 %v478_v40 }
 0x1aa   :  { %v1590_v41 = vpop.f32.mrf.mxu3 }
 0x1ab   :  { %v539_v42 = vsel %vm176_vm3, %v1590_v41, -inf }
 0x1ac   :  { %v476_v43 = vpop.f32.mrf.mxu1  ;;  %540 = vmax.xlane.f32.xlu1 %v539_v42 }
 0x1ad   :  { %v439_v43 = vsel %vm193_vm2, %v1516_v33, 0 }
 0x1b2   :  { %v537_v44 = vpop.f32.mrf.mxu3 }
 0x1b4   :  { %v1594_v45 = vpop.f32.mrf.mxu1 }
 0x1b5   :  { %v600_v46 = vsel %vm176_vm3, %v1594_v45, -inf }
 0x1b6   :  { %601 = vmax.xlane.f32.xlu2 %v600_v46 }
 0x1ba   :  { %v1598_v47 = vpop.f32.mrf.mxu3 }
 0x1bb   :  { %v659_v48 = vsel %vm176_vm3, %v1598_v47, -inf }
 0x1bc   :  { %v598_v49 = vpop.f32.mrf.mxu1  ;;  %660 = vmax.xlane.f32.xlu1 %v659_v48 }
 0x1c2   :  { %v657_v50 = vpop.f32.mrf.mxu3 }
 0x1c4   :  { %v1602_v51 = vpop.f32.mrf.mxu1 }
 0x1c5   :  { %v715_v52 = vsel %vm176_vm3, %v1602_v51, -inf }
 0x1c6   :  { %716 = vmax.xlane.f32.xlu1 %v715_v52 }
 0x1ca   :  { %v1606_v53 = vpop.f32.mrf.mxu3 }
 0x1cb   :  { %v776_v54 = vsel %vm176_vm3, %v1606_v53, -inf }
 0x1cc   :  { %v713_v55 = vpop.f32.mrf.mxu1  ;;  %777 = vmax.xlane.f32.xlu2 %v776_v54 }
 0x1d2   :  { %v774_v56 = vpop.f32.mrf.mxu3 }
 0x1d4   :  { %v1610_v57 = vpop.f32.mrf.mxu1 }
 0x1d5   :  { %v837_v58 = vsel %vm176_vm3, %v1610_v57, -inf }
 0x1d6   :  { %838 = vmax.xlane.f32.xlu0 %v837_v58 }
 0x1da   :  { %v1614_v59 = vpop.f32.mrf.mxu3 }
 0x1db   :  { %v896_v61 = vsel %vm176_vm3, %v1614_v59, -inf }
 0x1dc   :  { %v835_v60 = vpop.f32.mrf.mxu1 }
 0x1de   :  { %897 = vmax.xlane.f32.xlu0 %v896_v61 }
 0x1e2   :  { %v894_v62 = vpop.f32.mrf.mxu3 }
 0x1e4   :  { %v1618_v63 = vpop.f32.mrf.mxu1 }
 0x1e5   :  { %v952_v0 = vsel %vm176_vm3, %v1618_v63, -inf }
 0x1e6   :  { %953 = vmax.xlane.f32.xlu1 %v952_v0 }
 0x1ea   :  { %v1622_v1 = vpop.f32.mrf.mxu3 }
 0x1eb   :  { %v1013_v2 = vsel %vm176_vm3, %v1622_v1, -inf }
 0x1ec   :  { %v950_v3 = vpop.f32.mrf.mxu1  ;;  %1014 = vmax.xlane.f32.xlu0 %v1013_v2 }
 0x1f2   :  { %v1011_v5 = vpop.f32.mrf.mxu3 }
 0x1f4   :  { %v1628_v6 = vpop.f32.mrf.mxu1 }
 0x1f5   :  { %v1074_v7 = vsel %vm176_vm3, %v1628_v6, -inf }
 0x1f6   :  { %1075 = vmax.xlane.f32.xlu1 %v1074_v7 }
 0x1f9   :  { %v239_v9 = vpop.xlane.xlu0 %238 }
 0x1fa   :  { %v240_v10 = vsub.f32 %v1564_v19, %v239_v9 }
 0x1fc   :  { %v241_v11 = vmul.f32 1.442695, %v240_v10  ;;  %v1072_v12 = vpop.f32.mrf.mxu1 }
 0x1fe   :  { %1286 = vpow2.f32 %v241_v11 }
 0x1ff   :  { %v302_v13 = vpop.xlane.xlu2 %301 }
 0x200   :  { %v303_v14 = vsub.f32 %v1570_v22, %v302_v13  ;;  %v1695_v13 = vrot.slane %v1507_v32, 3 }
 0x202   :  { %v304_v15 = vmul.f32 1.442695, %v303_v14 }
 0x204   :  { %v1636_v16 = vpop.eup %1286  ;;  %1288 = vpow2.f32 %v304_v15 }
 0x205   :  { %v243_v17 = vsel %vm176_vm3, %v1636_v16, 0.0 }
 0x206   :  { %244 = vadd.xlane.f32.xlu0 %v243_v17 }
 0x209   :  { %v364_v18 = vpop.xlane.xlu2 %363 }
 0x20a   :  { %v1640_v21 = vpop.eup %1288  ;;  %v365_v23 = vsub.f32 %v1574_v29, %v364_v18 }
 0x20b   :  { %v306_v19 = vsel %vm176_vm3, %v1640_v21, 0.0 }
 0x20c   :  { %v366_v24 = vmul.f32 1.442695, %v365_v23  ;;  %307 = vadd.xlane.f32.xlu2 %v306_v19 }
 0x20e   :  { %1290 = vpow2.f32 %v366_v24 }
 0x20f   :  { %v424_v22 = vpop.xlane.xlu1 %423 }
 0x210   :  { %v425_v25 = vsub.f32 %v1580_v34, %v424_v22 }
 0x211   :  { %v185_v26 = vpop.xlane.xlu2 %184 }
 0x212   :  { %v426_v27 = vmul.f32 1.442695, %v425_v25  ;;  %1292 = vrcp.f32 %v185_v26 }
 0x214   :  { %v1646_v28 = vpop.eup %1290  ;;  %1294 = vpow2.f32 %v426_v27 }
 0x215   :  { %v368_v30 = vsel %vm176_vm3, %v1646_v28, 0.0 }
 0x216   :  { %369 = vadd.xlane.f32.xlu2 %v368_v30 }
 0x218   :  { %v1293_v29 = vpop.eup %1292 }
 0x219   :  { %v187_v35 = vmul.f32 %v1293_v29, %v1578_v31  ;;  %v480_v36 = vpop.xlane.xlu0 %479 }
 0x21a   :  { %v1651_v37 = vpop.eup %1294  ;;  %v481_v38 = vsub.f32 %v1586_v39, %v480_v36 }
 0x21b   :  { %v428_v34 = vsel %vm176_vm3, %v1651_v37, 0.0  ;;  %v188_v40 = vpack.c.bf16 %v187_v35, %v187_v35 }
 0x21c   :  { %v482_v42 = vmul.f32 1.442695, %v481_v38  ;;  %429 = vadd.xlane.f32.xlu0 %v428_v34 }
 0x21d   :  { %1223 = vmatmul.msk.bf16.vlgmr.msrb.gmra.mxu0 %vm189_vm4, %v188_v40 }
 0x21e   :  { %1296 = vpow2.f32 %v482_v42  ;;  %448 = vmatpush.bf16.msrb.mxu0 %v439_v43 }
 0x21f   :  { %v541_v31 = vpop.xlane.xlu1 %540 }
 0x220   :  { %v542_v44 = vsub.f32 %v1590_v41, %v541_v31  ;;  %v1670_v41 = vrot.slane %v1507_v32, 2 }
 0x222   :  { %v543_v46 = vmul.f32 1.442695, %v542_v44 }
 0x224   :  { %v1660_v48 = vpop.eup %1296  ;;  %1298 = vpow2.f32 %v543_v46 }
 0x225   :  { %v484_v39 = vsel %vm176_vm3, %v1660_v48, 0.0 }
 0x226   :  { %485 = vadd.xlane.f32.xlu1 %v484_v39 }
 0x229   :  { %v602_v49 = vpop.xlane.xlu2 %601 }
 0x22a   :  { %v1664_v50 = vpop.eup %1298  ;;  %v603_v52 = vsub.f32 %v1594_v45, %v602_v49 }
 0x22b   :  { %v545_v33 = vsel %vm176_vm3, %v1664_v50, 0.0 }
 0x22c   :  { %v604_v54 = vmul.f32 1.442695, %v603_v52 }
 0x22e   :  { %1300 = vpow2.f32 %v604_v54  ;;  %546 = vadd.xlane.f32.xlu1 %v545_v33 }
 0x22f   :  { %v661_v55 = vpop.xlane.xlu1 %660 }
 0x230   :  { %v662_v56 = vsub.f32 %v1598_v47, %v661_v55  ;;  %727 = vrot.lane.b32.xlu0 %v1670_v41, %s1354_s20  ;;  %v618_v55 = vsel %vm193_vm2, %v1632_v8, 0  ;;  %v676_v8 = vsel %vm193_vm2, %v1670_v41, 0 }
 0x232   :  { %v663_v58 = vmul.f32 1.442695, %v662_v56 }
 0x234   :  { %v1675_v60 = vpop.eup %1300  ;;  %1302 = vpow2.f32 %v663_v58 }
 0x235   :  { %v606_v45 = vsel %vm176_vm3, %v1675_v60, 0.0 }
 0x236   :  { %607 = vadd.xlane.f32.xlu2 %v606_v45 }
 0x239   :  { %v717_v7 = vpop.xlane.xlu1 %716 }
 0x23a   :  { %v1679_v61 = vpop.eup %1302  ;;  %v718_v9 = vsub.f32 %v1602_v51, %v717_v7 }
 0x23b   :  { %v665_v62 = vsel %vm176_vm3, %v1679_v61, 0.0 }
 0x23c   :  { %666 = vadd.xlane.f32.xlu1 %v665_v62  ;;  %v719_v10 = vmul.f32 1.442695, %v718_v9 }
 0x23f   :  { %v778_v11 = vpop.xlane.xlu2 %777 }
 0x240   :  { %v779_v12 = vsub.f32 %v1606_v53, %v778_v11 }
 0x242   :  { %v780_v15 = vmul.f32 1.442695, %v779_v12 }
 0x249   :  { %v839_v0 = vpop.xlane.xlu0 %838 }
 0x24a   :  { %v840_v47 = vsub.f32 %v1610_v57, %v839_v0 }
 0x24c   :  { %v841_v2 = vmul.f32 1.442695, %v840_v47 }
 0x24e   :  { %849 = vrot.lane.b32.xlu2 %v1670_v41, %s1355_s6  ;;  %1304 = vpow2.f32 %v841_v2 }
 0x24f   :  { %1306 = vpow2.f32 %v719_v10 }
 0x250   :  { %1308 = vpow2.f32 %v780_v15 }
 0x251   :  { %v898_v57 = vpop.xlane.xlu0 %897 }
 0x252   :  { %v899_v14 = vsub.f32 %v1614_v59, %v898_v57 }
 0x254   :  { %v1688_v3 = vpop.eup %1304  ;;  %v900_v17 = vmul.f32 1.442695, %v899_v14 }
 0x255   :  { %788 = vrot.lane.b32.xlu1 %v1670_v41, %s1353_s4  ;;  %v843_v5 = vsel %vm176_vm3, %v1688_v3, 0.0  ;;  %v1700_v19 = vpop.eup %1306 }
 0x256   :  { %1310 = vpow2.f32 %v900_v17  ;;  %v721_v32 = vsel %vm176_vm3, %v1700_v19, 0.0  ;;  %v1705_v59 = vpop.eup %1308 }
 0x257   :  { %v782_v26 = vsel %vm176_vm3, %v1705_v59, 0.0 }
 0x259   :  { %v954_v23 = vpop.xlane.xlu1 %953 }
 0x25a   :  { %844 = vadd.xlane.f32.xlu0 %v843_v5  ;;  %v955_v51 = vsub.f32 %v1618_v63, %v954_v23 }
 0x25c   :  { %v956_v53 = vmul.f32 1.442695, %v955_v51  ;;  %v1707_v22 = vpop.eup %1310 }
 0x25d   :  { %v902_v63 = vsel %vm176_vm3, %v1707_v22, 0.0 }
 0x25f   :  { %v1015_v18 = vpop.xlane.xlu0 %1014 }
 0x260   :  { %v1016_v25 = vsub.f32 %v1622_v1, %v1015_v18  ;;  %v496_v1 = vsel %vm193_vm2, %v1626_v4, 0  ;;  %v557_v4 = vsel %vm193_vm2, %v1566_v20, 0 }
 0x262   :  { %v1017_v29 = vmul.f32 1.442695, %v1016_v25 }
 0x269   :  { %v1076_v38 = vpop.xlane.xlu1 %1075 }
 0x26a   :  { %v1077_v42 = vsub.f32 %v1628_v6, %v1076_v38 }
 0x26c   :  { %v1078_v46 = vmul.f32 1.442695, %v1077_v42 }
 0x26e   :  { %964 = vrot.lane.b32.xlu0 %v1695_v13, %s1354_s20 }
 0x277   :  { %722 = vadd.xlane.f32.xlu2 %v721_v32 }
 0x279   :  { %v245_v24 = vpop.xlane.xlu0 %244 }
 0x27a   :  { %1312 = vrcp.f32 %v245_v24 }
 0x27b   :  { %1314 = vpow2.f32 %v956_v53 }
 0x27f   :  { %783 = vadd.xlane.f32.xlu2 %v782_v26  ;;  %v308_v27 = vpop.xlane.xlu2 %307  ;;  %903 = vadd.xlane.f32.xlu1 %v902_v63 }
 0x280   :  { %v1313_v30 = vpop.eup %1312  ;;  %1316 = vrcp.f32 %v308_v27 }
 0x281   :  { %v247_v35 = vmul.f32 %v1313_v30, %v1636_v16  ;;  %v1715_v36 = vpop.eup %1314  ;;  %1318 = vpow2.f32 %v1017_v29 }
 0x282   :  { %v958_v43 = vsel %vm176_vm3, %v1715_v36, 0.0 }
 0x283   :  { %v248_v34 = vpack.c.bf16 %v247_v35, %v247_v35 }
 0x285   :  { %1225 = vmatmul.msk.bf16.vlgmr.msrb.gmra.mxu2 %vm189_vm4, %v248_v34 }
 0x286   :  { %v1317_v40 = vpop.eup %1316  ;;  %505 = vmatpush.bf16.msrb.mxu2 %v496_v1 }
 0x287   :  { %v310_v31 = vmul.f32 %v1317_v40, %v1640_v21  ;;  %959 = vadd.xlane.f32.xlu2 %v958_v43  ;;  %v1724_v39 = vpop.eup %1318 }
 0x288   :  { %v1019_v6 = vsel %vm176_vm3, %v1724_v39, 0.0 }
 0x289   :  { %v311_v16 = vpack.c.bf16 %v310_v31, %v310_v31  ;;  %v370_v44 = vpop.xlane.xlu2 %369 }
 0x28a   :  { %1320 = vrcp.f32 %v370_v44 }
 0x28b   :  { %1227 = vmatmul.msk.bf16.vlgmr.msra.gmra.mxu0 %vm189_vm4, %v311_v16  ;;  %1322 = vpow2.f32 %v1078_v46 }
 0x28c   :  { %566 = vmatpush.bf16.msra.mxu0 %v557_v4 }
 0x28f   :  { %1020 = vadd.xlane.f32.xlu2 %v1019_v6  ;;  %v430_v49 = vpop.xlane.xlu0 %429 }
 0x290   :  { %v1321_v21 = vpop.eup %1320  ;;  %1324 = vrcp.f32 %v430_v49 }
 0x291   :  { %v372_v52 = vmul.f32 %v1321_v21, %v1646_v28  ;;  %v1732_v33 = vpop.eup %1322 }
 0x292   :  { %v1080_v58 = vsel %vm176_vm3, %v1732_v33, 0.0 }
 0x293   :  { %v373_v54 = vpack.c.bf16 %v372_v52, %v372_v52 }
 0x295   :  { %1229 = vmatmul.msk.bf16.vlgmr.msra.gmra.mxu2 %vm189_vm4, %v373_v54 }
 0x296   :  { %v1325_v20 = vpop.eup %1324  ;;  %627 = vmatpush.bf16.msra.mxu2 %v618_v55 }
 0x297   :  { %v432_v56 = vmul.f32 %v1325_v20, %v1651_v37 }
 0x298   :  { %1086 = vrot.lane.b32.xlu1 %v1695_v13, %s1355_s6  ;;  %1081 = vadd.xlane.f32.xlu0 %v1080_v58 }
 0x299   :  { %v433_v28 = vpack.c.bf16 %v432_v56, %v432_v56  ;;  %v486_v45 = vpop.xlane.xlu1 %485 }
 0x29a   :  { %1326 = vrcp.f32 %v486_v45  ;;  %v206_v62 = vpop.f32.mrf.mxu0 }
 0x29b   :  { %211 = vst.msk [vmem:[#allocation2] sm:$0x3] %vm210_vm5, %v206_v62  ;;  %1231 = vmatmul.msk.bf16.vlgmr.msrb.gmra.mxu0 %vm189_vm4, %v433_v28 }
 0x29c   :  { %685 = vmatpush.bf16.msrb.mxu0 %v676_v8 }
 0x2a0   :  { %v1327_v37 = vpop.eup %1326 }
 0x2a1   :  { %v488_v0 = vmul.f32 %v1327_v37, %v1660_v48  ;;  %v547_v47 = vpop.xlane.xlu1 %546 }
 0x2a2   :  { %1328 = vrcp.f32 %v547_v47  ;;  %v208_v2 = vpop.f32.mrf.mxu0  ;;  %v728_v5 = vpop.permute.xlu0 %727 }
 0x2a3   :  { %v489_v7 = vpack.c.bf16 %v488_v0, %v488_v0  ;;  %v733_v9 = vsel %vm193_vm2, %v728_v5, 0 }
 0x2a5   :  { %1233 = vmatmul.msk.bf16.vlgmr.msrb.gmra.mxu2 %vm189_vm4, %v489_v7 }
 0x2a6   :  { %742 = vmatpush.bf16.msrb.mxu2 %v733_v9 }
 0x2a7   :  { %1025 = vrot.lane.b32.xlu2 %v1695_v13, %s1353_s4 }
 0x2a8   :  { %v1329_v10 = vpop.eup %1328 }
 0x2a9   :  { %v549_v41 = vmul.f32 %v1329_v10, %v1664_v50  ;;  %v608_v11 = vpop.xlane.xlu2 %607 }
 0x2aa   :  { %1330 = vrcp.f32 %v608_v11 }
 0x2ab   :  { %v550_v57 = vpack.c.bf16 %v549_v41, %v549_v41 }
 0x2ad   :  { %1235 = vmatmul.msk.bf16.vlgmr.msra.gmra.mxu0 %vm189_vm4, %v550_v57 }
 0x2af   :  { %v667_v48 = vpop.xlane.xlu1 %666 }
 0x2b0   :  { %v1331_v12 = vpop.eup %1330  ;;  %1332 = vrcp.f32 %v667_v48 }
 0x2b1   :  { %v610_v14 = vmul.f32 %v1331_v12, %v1675_v60  ;;  %v850_v15 = vpop.permute.xlu2 %849  ;;  %v913_v60 = vsel %vm193_vm2, %v1695_v13, 0 }
 0x2b2   :  { %v855_v18 = vsel %vm193_vm2, %v850_v15, 0 }
 0x2b3   :  { %v611_v17 = vpack.c.bf16 %v610_v14, %v610_v14 }
 0x2b5   :  { %1237 = vmatmul.msk.bf16.vlgmr.msra.gmra.mxu2 %vm189_vm4, %v611_v17 }
 0x2b6   :  { %v1333_v23 = vpop.eup %1332  ;;  %864 = vmatpush.bf16.msra.mxu2 %v855_v18 }
 0x2b7   :  { %v669_v50 = vmul.f32 %v1333_v23, %v1679_v61 }
 0x2b9   :  { %v670_v51 = vpack.c.bf16 %v669_v50, %v669_v50 }
 0x2bd   :  { %1239 = vmatmul.msk.bf16.vlgmr.msrb.gmra.mxu0 %vm189_vm4, %v670_v51 }
 0x2c7   :  { %v789_v32 = vpop.permute.xlu1 %788 }
 0x2c8   :  { %v794_v53 = vsel %vm193_vm2, %v789_v32, 0 }
 0x2c9   :  { %803 = vmatpush.bf16.msra.mxu0 %v794_v53 }
 0x2cd   :  { %922 = vmatpush.bf16.msrb.mxu0 %v913_v60  ;;  %v845_v25 = vpop.xlane.xlu0 %844 }
 0x2e0   :  { %v965_v30 = vpop.permute.xlu0 %964 }
 0x2e1   :  { %v970_v29 = vsel %vm193_vm2, %v965_v30, 0 }
 0x2ea   :  { %v723_v24 = vpop.xlane.xlu2 %722 }
 0x2eb   :  { %1334 = vrcp.f32 %v723_v24 }
 0x2f1   :  { %v1335_v26 = vpop.eup %1334 }
 0x2f2   :  { %v725_v63 = vmul.f32 %v1335_v26, %v1700_v19  ;;  %v784_v27 = vpop.xlane.xlu2 %783  ;;  %v904_v1 = vpop.xlane.xlu1 %903 }
 0x2f3   :  { %1336 = vrcp.f32 %v784_v27 }
 0x2f4   :  { %v726_v61 = vpack.c.bf16 %v725_v63, %v725_v63  ;;  %1338 = vrcp.f32 %v845_v25 }
 0x2f5   :  { %1340 = vrcp.f32 %v904_v1 }
 0x2f6   :  { %1241 = vmatmul.msk.bf16.vlgmr.msrb.gmra.mxu2 %vm189_vm4, %v726_v61 }
 0x2f7   :  { %979 = vmatpush.bf16.msrb.mxu2 %v970_v29 }
 0x2f9   :  { %v1337_v35 = vpop.eup %1336 }
 0x2fa   :  { %v786_v13 = vmul.f32 %v1337_v35, %v1705_v59  ;;  %v960_v38 = vpop.xlane.xlu2 %959  ;;  %v1339_v40 = vpop.eup %1338  ;;  %v1270_v35 = vld [vmem:[%s1839_s5 + $0x8] sm:$0xff] }
 0x2fb   :  { %v847_v19 = vmul.f32 %v1339_v40, %v1688_v3  ;;  %v1341_v31 = vpop.eup %1340  ;;  %1342 = vrcp.f32 %v960_v38  ;;  %1143 = vmatpush.bf16.msra.mxu3 %v1270_v35 }
 0x2fc   :  { %v787_v34 = vpack.c.bf16 %v786_v13, %v786_v13  ;;  %v906_v16 = vmul.f32 %v1341_v31, %v1707_v22  ;;  %v1269_v13 = vld [vmem:[%s1839_s5] sm:$0xff] }
 0x2fd   :  { %v848_v43 = vpack.c.bf16 %v847_v19, %v847_v19 }
 0x2fe   :  { %1243 = vmatmul.msk.bf16.vlgmr.msra.gmra.mxu0 %vm189_vm4, %v787_v34  ;;  %v907_v49 = vpack.c.bf16 %v906_v16, %v906_v16 }
 0x2ff   :  { %1144 = vmatpush.bf16.msra.mxu3 %v1269_v13 }
 0x301   :  { %v1343_v21 = vpop.eup %1342 }
 0x302   :  { %v1021_v42 = vpop.xlane.xlu2 %1020  ;;  %v962_v22 = vmul.f32 %v1343_v21, %v1715_v36 }
 0x303   :  { %1344 = vrcp.f32 %v1021_v42 }
 0x304   :  { %v963_v55 = vpack.c.bf16 %v962_v22, %v962_v22 }
 0x306   :  { %1245 = vmatmul.msk.bf16.vlgmr.msra.gmra.mxu2 %vm189_vm4, %v848_v43  ;;  %v1281_v43 = vld [vmem:[%s1838_s9] ss:$0 sm:$0xff] }
 0x308   :  { %v267_v44 = vpop.f32.mrf.mxu2  ;;  %v329_v46 = vpop.f32.mrf.mxu0 }
 0x309   :  { %334 = vrot.lane.b32.xlu2 %v329_v46, %s1356_s8  ;;  %272 = vrot.lane.b32.xlu0 %v267_v44, %s1357_s22  ;;  %v1345_v56 = vpop.eup %1344  ;;  %v1352_v44 = vld [vmem:[%s1832_s0] sm:$0xff] }
 0x30a   :  { %v1087_v59 = vpop.permute.xlu1 %1086  ;;  %v1026_v4 = vpop.permute.xlu2 %1025  ;;  %v1023_v58 = vmul.f32 %v1345_v56, %v1724_v39 }
 0x30b   :  { %v1092_v3 = vsel %vm193_vm2, %v1087_v59, 0  ;;  %v1031_v6 = vsel %vm193_vm2, %v1026_v4, 0  ;;  %v1082_v20 = vpop.xlane.xlu0 %1081 }
 0x30c   :  { %1040 = vmatpush.bf16.msra.mxu0 %v1031_v6  ;;  %1101 = vmatpush.bf16.msra.mxu2 %v1092_v3  ;;  %1346 = vrcp.f32 %v1082_v20  ;;  %v1024_v62 = vpack.c.bf16 %v1023_v58, %v1023_v58  ;;  %v1359_v3 = vmov 32.0  }
 0x30d   :  { %1348 = vrcp.f32 %v1359_v3 }
 0x30e   :  { %1247 = vmatmul.msk.bf16.vlgmr.msrb.gmra.mxu0 %vm189_vm4, %v907_v49 }
 0x310   :  { %v269_v52 = vpop.f32.mrf.mxu2  ;;  %v331_v54 = vpop.f32.mrf.mxu0 }
 0x312   :  { %v1347_v8 = vpop.eup %1346 }
 0x313   :  { %v1084_v36 = vmul.f32 %v1347_v8, %v1732_v33  ;;  %v1349_v6 = vpop.eup %1348 }
 0x314   :  { %v1155_v49 = vmul.f32 32.0, %v1349_v6  ;;  %vm1159_vm9 = vweird.f32 %v1349_v6 }
 0x315   :  { %v1085_v47 = vpack.c.bf16 %v1084_v36, %v1084_v36 }
 0x316   :  { %1249 = vmatmul.msk.bf16.vlgmr.msrb.gmra.mxu2 %vm189_vm4, %v963_v55  ;;  %v1156_v21 = vsub.f32 1.0, %v1155_v49 }
 0x318   :  { %v391_v28 = vpop.f32.mrf.mxu2  ;;  %v450_v45 = vpop.f32.mrf.mxu0  ;;  %v1157_v22 = vmul.f32 %v1349_v6, %v1156_v21 }
 0x319   :  { %454 = vst.msk [vmem:[#allocation2 + $0x2] sm:$0x3] %vm210_vm5, %v450_v45  ;;  %396 = vrot.lane.b32.xlu1 %v391_v28, %s1358_s23 }
 0x31a   :  { %v1158_v52 = vadd.f32 %v1349_v6, %v1157_v22 }
 0x31c   :  { %v1160_v54 = vsel %vm1159_vm9, %v1349_v6, %v1158_v52 }
 0x31e   :  { %1251 = vmatmul.msk.bf16.vlgmr.msra.gmra.mxu0 %vm189_vm4, %v1024_v62 }
 0x320   :  { %v393_v37 = vpop.f32.mrf.mxu2  ;;  %v452_v0 = vpop.f32.mrf.mxu0 }
 0x326   :  { %1253 = vmatmul.msk.bf16.vlgmr.msra.gmra.mxu2 %vm189_vm4, %v1085_v47 }
 0x328   :  { %v507_v2 = vpop.f32.mrf.mxu2 }
 0x329   :  { %512 = vrot.lane.b32.xlu1 %v507_v2, %s1357_s22 }
 0x32a   :  { %v568_v39 = vpop.f32.mrf.mxu0 }
 0x330   :  { %v509_v5 = vpop.f32.mrf.mxu2 }
 0x331   :  { %573 = vrot.lane.b32.xlu1 %v568_v39, %s1356_s8  ;;  %v1282_v5 = vld [vmem:[%s1840_s10] ss:$0 sm:$0xff] }
 0x332   :  { %v570_v7 = vpop.f32.mrf.mxu0 }
 0x338   :  { %v629_v9 = vpop.f32.mrf.mxu2 }
 0x33a   :  { %v687_v10 = vpop.f32.mrf.mxu0 }
 0x33b   :  { %691 = vst.msk [vmem:[#allocation2 + $0x4] sm:$0x3] %vm210_vm5, %v687_v10 }
 0x340   :  { %v631_v41 = vpop.f32.mrf.mxu2 }
 0x342   :  { %v689_v11 = vpop.f32.mrf.mxu0 }
 0x363   :  { %v335_v12 = vpop.permute.xlu2 %334 }
 0x379   :  { %v744_v33 = vpop.f32.mrf.mxu2 }
 0x37a   :  { %749 = vrot.lane.b32.xlu2 %v744_v33, %s1357_s22 }
 0x37b   :  { %v805_v57 = vpop.f32.mrf.mxu0  ;;  %v273_v48 = vpop.permute.xlu0 %272 }
 0x37c   :  { %276 = vst.msk [vmem:[#allocation2] sm:$0x3] %vm275_vm6, %v273_v48 }
 0x37d   :  { %338 = vst.msk [vmem:[#allocation2] sm:$0x3] %vm337_vm7, %v335_v12 }
 0x381   :  { %v746_v14 = vpop.f32.mrf.mxu2 }
 0x382   :  { %810 = vrot.lane.b32.xlu2 %v805_v57, %s1356_s8 }
 0x383   :  { %v807_v15 = vpop.f32.mrf.mxu0 }
 0x389   :  { %v866_v17 = vpop.f32.mrf.mxu2 }
 0x38a   :  { %634 = vrot.lane.b32.xlu2 %v629_v9, %s1358_s23  ;;  %v1283_v9 = vld [vmem:[%s1841_s11] ss:$0 sm:$0xff] }
 0x38b   :  { %v397_v18 = vpop.permute.xlu1 %396  ;;  %v924_v23 = vpop.f32.mrf.mxu0 }
 0x38c   :  { %400 = vst.msk [vmem:[#allocation2] sm:$0x3] %vm399_vm8, %v397_v18 }
 0x38d   :  { %928 = vst.msk [vmem:[#allocation2 + $0x6] sm:$0x3] %vm210_vm5, %v924_v23 }
 0x391   :  { %v868_v50 = vpop.f32.mrf.mxu2 }
 0x393   :  { %v926_v51 = vpop.f32.mrf.mxu0 }
 0x399   :  { %v981_v32 = vpop.f32.mrf.mxu2 }
 0x39a   :  { %986 = vrot.lane.b32.xlu1 %v981_v32, %s1357_s22 }
 0x39b   :  { %v513_v53 = vpop.permute.xlu1 %512  ;;  %v1042_v60 = vpop.f32.mrf.mxu0 }
 0x39c   :  { %515 = vst.msk [vmem:[#allocation2 + $0x2] sm:$0x3] %vm275_vm6, %v513_v53  ;;  %1047 = vrot.lane.b32.xlu0 %v1042_v60, %s1356_s8 }
 0x3a1   :  { %v983_v24 = vpop.f32.mrf.mxu2 }
 0x3a3   :  { %v574_v25 = vpop.permute.xlu1 %573  ;;  %v1044_v26 = vpop.f32.mrf.mxu0 }
 0x3a4   :  { %576 = vst.msk [vmem:[#allocation2 + $0x2] sm:$0x3] %vm337_vm7, %v574_v25  ;;  %871 = vrot.lane.b32.xlu0 %v866_v17, %s1358_s23 }
 0x3a9   :  { %v1103_v63 = vpop.f32.mrf.mxu2 }
 0x3aa   :  { %1108 = vrot.lane.b32.xlu1 %v1103_v63, %s1358_s23 }
 0x3b1   :  { %v1105_v27 = vpop.f32.mrf.mxu2 }
 0x3d4   :  { %v750_v30 = vpop.permute.xlu2 %749 }
 0x3d5   :  { %752 = vst.msk [vmem:[#allocation2 + $0x4] sm:$0x3] %vm275_vm6, %v750_v30 }
 0x3dc   :  { %v811_v61 = vpop.permute.xlu2 %810 }
 0x3dd   :  { %813 = vst.msk [vmem:[#allocation2 + $0x4] sm:$0x3] %vm337_vm7, %v811_v61 }
 0x3e4   :  { %v635_v29 = vpop.permute.xlu2 %634 }
 0x3e5   :  { %637 = vst.msk [vmem:[#allocation2 + $0x2] sm:$0x3] %vm399_vm8, %v635_v29 }
 0x40c   :  { %v987_v38 = vpop.permute.xlu1 %986 }
 0x40d   :  { %989 = vst.msk [vmem:[#allocation2 + $0x6] sm:$0x3] %vm275_vm6, %v987_v38 }
 0x40e   :  { %v1048_v34 = vpop.permute.xlu0 %1047 }
 0x40f   :  { %1050 = vst.msk [vmem:[#allocation2 + $0x6] sm:$0x3] %vm337_vm7, %v1048_v34 }
 0x416   :  { %v872_v1 = vpop.permute.xlu0 %871 }
 0x417   :  { %874 = vst.msk [vmem:[#allocation2 + $0x4] sm:$0x3] %vm399_vm8, %v872_v1 }
 0x41c   :  { %v1109_v40 = vpop.permute.xlu1 %1108 }
 0x41d   :  { %1111 = vst.msk [vmem:[#allocation2 + $0x6] sm:$0x3] %vm399_vm8, %v1109_v40 }
 0x424   :  { %v1112_v19 = vld [vmem:[#allocation2] sm:$0xff] }
 0x425   :  { %v1113_v42 = vpack.c.bf16 %v1112_v19, %v1112_v19 }
 0x427   :  { %1262 = vmatmul.msk.bf16.vlgmr.msra.gmra.mxu3 %vm66_vm0, %v1113_v42 }
 0x4aa   :  { %v1146_v31 = vpop.f32.mrf.mxu3 }
 0x4ab   :  { %v1147_v16 = vadd.f32 %v1281_v43, %v1146_v31 }
 0x4ad   :  { %v1150_v46 = vadd.f32 %v1352_v44, %v1147_v16 }
 0x4af   :  { %v1151_v59 = vsel %vm66_vm0, %v1150_v46, 0.0 }
 0x4b0   :  { %1152 = vadd.xlane.f32.xlu2 %v1151_v59 }
 0x4b2   :  { %v1148_v4 = vpop.f32.mrf.mxu3 }
 0x523   :  { %v1153_v55 = vpop.xlane.xlu2 %1152 }
 0x524   :  { %v1161_v20 = vmul.f32 %v1160_v54, %v1153_v55 }
 0x526   :  { %v1162_v56 = vsub.f32 %v1150_v46, %v1161_v20 }
 0x528   :  { %v1163_v58 = vmul.f32 %v1162_v56, %v1162_v56 }
 0x52a   :  { %v1164_v28 = vsel %vm66_vm0, %v1163_v58, 0.0 }
 0x52b   :  { %1165 = vadd.xlane.f32.xlu0 %v1164_v28 }
 0x59e   :  { %v1166_v45 = vpop.xlane.xlu0 %1165 }
 0x59f   :  { %v1167_v62 = vmul.f32 %v1166_v45, %v1160_v54 }
 0x5a1   :  { %v1168_v8 = vadd.f32 1e-05, %v1167_v62 }
 0x5a3   :  { %1350 = vrsqrt.f32 %v1168_v8  ;;  %vm1175_vm11 = vweird.f32 %v1168_v8 }
 0x5a9   :  { %v1351_v36 = vpop.eup %1350 }
 0x5aa   :  { %v1170_v37 = vmul.f32 %v1351_v36, %v1168_v8  ;;  %vm1176_vm10 = vweird.f32 %v1351_v36 }
 0x5ab   :  { %vm1177_vm12 = vmor %vm1175_vm11, %vm1176_vm10 }
 0x5ac   :  { %v1171_v0 = vmul.f32 %v1351_v36, %v1170_v37 }
 0x5ae   :  { %v1172_v47 = vmul.f32 0.5, %v1171_v0 }
 0x5b0   :  { %v1173_v2 = vsub.f32 1.5, %v1172_v47 }
 0x5b2   :  { %v1174_v39 = vmul.f32 %v1351_v36, %v1173_v2 }
 0x5b4   :  { %v1178_v7 = vsel %vm1177_vm12, %v1351_v36, %v1174_v39 }
 0x5b5   :  { %v1179_v10 = vmul.f32 %v1178_v7, %v1162_v56 }
 0x5b7   :  { %v1184_v41 = vmul.f32 %v1282_v5, %v1179_v10 }
 0x5b9   :  { %v1189_v11 = vadd.f32 %v1283_v9, %v1184_v41 }
 0x5bb   :  { %1190 = vst.msk [vmem:[%s1842_s12] sm:$0xff] %vm66_vm0, %v1189_v11 }

// kernel: transformer_autoencoder_forward.23
= control target key start
LH: loop header
LB: loop body
LE: loop exit
PB: predicated region body
PF: predicated region fallthrough
CT: control target
= control target key end

     0   :  { %s148_s0 = inlined_call_operand.vmem [shape: f32[8,32], index: 0, kind: input, shape index: {}]   ;;  %s149_s1 = inlined_call_operand.vmem [shape: bf16[32,16], index: 1, kind: input, shape index: {}]   ;;  %s150_s2 = inlined_call_operand.vmem [shape: f32[1,16], index: 2, kind: input, shape index: {}]   ;;  %s151_s3 = inlined_call_operand.hbm [shape: f32[8,16], index: 3, kind: output, shape index: {}]  }
   0x1   :  { %v83_v0 = vld [vmem:[%s149_s1 + $0x8] sm:$0xff] }
   0x2   :  { %8 = vsyncpa [#allocation3], 0  ;;  %48 = vmatpush.bf16.msra.mxu0 %v83_v0  ;;  %v82_v1 = vld [vmem:[%s149_s1] sm:$0xff]  ;;  %vm38_vm0 = vcmask 261120   ;;  %s112_s20 = smov [#allocation2]   ;;  %s64_s24 = sshll.u32 %s151_s3, 4  ;;  %s65_s24 = int_to_ptr.hbm [resolvable:$true] %s64_s24 }
   0x3   :  { %v16_v2 = vld [vmem:[%s148_s0] sm:$0xff]  ;;  %s62_s21 = sshll.u32 %s112_s20, 4  ;;  %vm55_vm1 = vcmask 130048   ;;  %s63_s21 = int_to_ptr.vmem [resolvable:$true] %s62_s21 }
   0x4   :  { %v17_v3 = vpack.c.bf16 %v16_v2, %v16_v2  ;;  %v85_v4 = vld [vmem:[%s150_s2] ss:$0 sm:$0xff] }
   0x6   :  { %49 = vmatpush.bf16.msra.mxu0 %v82_v1 }
   0x9   :  { %81 = vmatmul.msk.bf16.vlgmr.msra.gmra.mxu0 %vm38_vm0, %v17_v3 }
  0x86   :  { %v51_v5 = vpop.f32.mrf.mxu0 }
  0x87   :  { %v52_v6 = vadd.f32 %v85_v4, %v51_v5 }
  0x89   :  { %56 = vst.msk [vmem:[#allocation2] sm:$0xff] %vm55_vm1, %v52_v6 }
  0x8a   :  { %67 = dma.vmem_to_hbm [thread:$0]  %s63_s21, 128, %s65_s24, [#allocation3]  }
  0x8e   :  { %v53_v7 = vpop.f32.mrf.mxu0 }
  0x8f   :  { %110 = dma.done.wait [#allocation3], 128  }
  0x90   :  { %111 = vsyncadd [#allocation3], 4294967168 }
  0x91   :  { %72 = vsyncpa [#allocation3], 1 }

</bundles_post_ra>
